<compile_context>
chip_gen: v7x
topology: tpu7x:2x2x1
jax: 0.10.0
libtpu: 0.0.40
codegen_flags: <defaults>
</compile_context>

<pallas_src>
from functools import partial

import numpy as np
import jax
import jax.numpy as jnp
from jax import lax
from jax.experimental import pallas as pl
from jax.experimental.pallas import tpu as pltpu


def _conv_relpos_kernel(kblk_ref, q_ref, v_ref, w_ref, b_ref, o_ref, vsh_ref,
                        *, Kmax, H, W, W_al, Bb, Hs, taps, k_options):
    # kblk_ref : (n_cblk,) int32 SMEM  largest window size per channel block
    # q_ref    : (Bb, H, W, Cb)   VMEM query tile
    # v_ref    : (Bb, H, W, Cb)   VMEM value tile (unpadded)
    # w_ref    : (Kmax*Kmax, Cb)  VMEM per-channel depthwise weights (ring-tap order)
    # b_ref    : (1, Cb)          VMEM per-channel bias
    # o_ref    : (Bb, H, W, Cb)   VMEM output = q * (depthwise_conv(v) + bias)
    # vsh_ref  : (Kmax, Hp, W_al, Cb) VMEM f32: W-shifted zero-padded copies of v
    pad = Kmax // 2
    Cb = q_ref.shape[-1]
    n_strips = H // Hs

    def run(k_blk):
        rb = (k_blk - 1) // 2                 # radius this block actually uses
        nt = k_blk * k_blk                    # active ring-ordered taps
        bias = b_ref[...].astype(jnp.float32)          # (1, Cb)

        for bi in range(Bb):                  # static per-image loop in the block
            # ---- scratch prep: only the shifts this block reads; only the
            #      padding borders are zeroed (interior fully overwritten).
            for dx in range(pad - rb, pad + rb + 1):
                lo = max(0, pad - dx)
                hi = min(W, W + pad - dx)
                s0, s1 = lo + dx - pad, hi + dx - pad
                if rb > 0:                    # top / bottom padding rows
                    vsh_ref[dx, pad - rb:pad, :, :] = jnp.zeros(
                        (rb, W_al, Cb), jnp.float32)
                    vsh_ref[dx, pad + H:pad + H + rb, :, :] = jnp.zeros(
                        (rb, W_al, Cb), jnp.float32)
                if lo > 0:                    # left padding columns of this shift
                    vsh_ref[dx, pad:pad + H, 0:lo, :] = jnp.zeros(
                        (H, lo, Cb), jnp.float32)
                if hi < W:                    # right padding columns of this shift
                    vsh_ref[dx, pad:pad + H, hi:W, :] = jnp.zeros(
                        (H, W - hi, Cb), jnp.float32)
                vsh_ref[dx, pad:pad + H, lo:hi, :] = (
                    v_ref[bi, :, s0:s1, :].astype(jnp.float32))

            # ---- strip-mined accumulation over H: the f32 accumulator strip
            #      stays register-resident across all nt taps (no VMEM spill).
            def strip(r0):
                acc = jnp.broadcast_to(bias[None], (Hs, W, Cb)).astype(jnp.float32)
                for t in range(nt):
                    dy, dx = taps[t]
                    w_t = w_ref[t, :].astype(jnp.float32)        # (Cb,)
                    win = vsh_ref[dx, pl.ds(dy + r0, Hs), 0:W, :]  # f32, dense
                    acc = acc + win * w_t[None, None, :]
                q_s = q_ref[bi, pl.ds(r0, Hs), :, :].astype(jnp.float32)
                o_ref[bi, pl.ds(r0, Hs), :, :] = (q_s * acc).astype(o_ref.dtype)

            if n_strips == 1:
                strip(0)
            else:
                def body(s, carry):
                    strip(s * Hs)
                    return carry
                lax.fori_loop(0, n_strips, body, 0)

    if len(k_options) == 1:
        run(k_options[0])
    else:
        kb = kblk_ref[pl.program_id(0)]
        for k in k_options:
            @pl.when(kb == k)
            def _(k=k):
                run(k)


def _pick_channel_block(C, channel_splits, windows):
    """Lane-dense (128-multiple) channel block minimizing total tap work.

    Prefers window-pure blocks; ties go to the smaller block (better megacore
    balance, smaller per-step VMEM)."""
    if C % 128 != 0:
        return C
    bounds = np.cumsum([0] + list(channel_splits))

    def tap_work(cblk):
        total = 0
        for c0 in range(0, C, cblk):
            c1 = c0 + cblk
            kb = max(k for k, s0, s1 in zip(windows, bounds[:-1], bounds[1:])
                     if s0 < c1 and c0 < s1)
            total += kb * kb * cblk
        return total

    cands = [c for c in (128, 256, 384, 512) if C % c == 0] or [C]
    return min(cands, key=lambda c: (tap_work(c), c))


def _pick_batch_block(B, per_image_bytes, target_bytes=256 << 10, cap=8):
    """Pack several images per grid step for small tiles (amortize ~0.35us/step)."""
    best = 1
    for d in range(1, min(B, cap) + 1):
        if B % d == 0:
            best = d
            if d * per_image_bytes >= target_bytes:
                break
    return best


def _pick_row_strip(H, W, Cb, vreg_budget=16):
    """Rows per accumulator strip so the f32 strip stays within ~vreg_budget vregs."""
    per_row = max(1, (-(-W // 8)) * (-(-Cb // 128)))
    cap = max(1, vreg_budget // per_row)
    for hs in range(min(H, cap), 0, -1):
        if H % hs == 0:
            return hs
    return 1


def conv_rel_pos_enc_nhwc(q_img, v_img, windows, weights, biases):
    """ConvRelPosEnc on channel-last images.

    q_img, v_img : [B, H, W, C] with C = h*Ch (channel index = head*Ch + ch)
    windows      : list of odd window sizes, one per head split
    weights      : list of depthwise weights, torch layout [Csplit, 1, K, K]
    biases       : list of biases [Csplit]
    returns      : [B, H, W, C]
    """
    B, H, W, C = q_img.shape
    channel_splits = [int(w.shape[0]) for w in weights]
    assert sum(channel_splits) == C
    assert all(k % 2 == 1 for k in windows), "window sizes must be odd"

    Kmax = max(windows)
    pad = Kmax // 2
    Hp = H + 2 * pad
    W_al = max(8, -(-W // 8) * 8)        # scratch width rounded up to sublanes

    # ring-ordered taps: the first (2r+1)^2 taps form the centred (2r+1)x(2r+1)
    # window, so a channel block whose largest window is K only needs K*K taps.
    ctr = pad
    taps = tuple(sorted(((dy, dx) for dy in range(Kmax) for dx in range(Kmax)),
                        key=lambda t: (max(abs(t[0] - ctr), abs(t[1] - ctr)),
                                       t[0], t[1])))

    # combined per-channel depthwise weights, rows in ring-tap order; smaller
    # windows are centre-embedded (zeros elsewhere), identical under SAME pad.
    w_parts = []
    for K_s, w_s in zip(windows, weights):
        off = (Kmax - K_s) // 2
        w_hwc = jnp.transpose(w_s[:, 0], (1, 2, 0)).astype(jnp.float32)
        w_full = jnp.zeros((Kmax, Kmax, w_s.shape[0]), jnp.float32)
        w_full = w_full.at[off:off + K_s, off:off + K_s, :].set(w_hwc)
        w_parts.append(w_full)
    w_grid = jnp.concatenate(w_parts, axis=-1).reshape(Kmax * Kmax, C)
    order = np.asarray([dy * Kmax + dx for dy, dx in taps], dtype=np.int32)
    w_comb = w_grid[order]                                       # (Kmax*Kmax, C)
    b_comb = jnp.concatenate(biases, axis=0).reshape(1, C).astype(jnp.float32)

    # channel-block grid axis + per-block largest active window size
    Cblk = _pick_channel_block(C, channel_splits, windows)
    n_cblk = C // Cblk
    bounds = np.cumsum([0] + channel_splits)
    kblk_per_block = []
    for cb in range(n_cblk):
        c0, c1 = cb * Cblk, (cb + 1) * Cblk
        kblk_per_block.append(int(max(
            K_s for K_s, s0, s1 in zip(windows, bounds[:-1], bounds[1:])
            if s0 < c1 and c0 < s1)))
    k_options = tuple(sorted(set(kblk_per_block)))
    kblk_arr = jnp.asarray(kblk_per_block, dtype=jnp.int32)

    # batch packing and register-resident accumulator strip size
    itemsize = q_img.dtype.itemsize
    Bb = _pick_batch_block(B, H * W * Cblk * itemsize)
    n_bblk = B // Bb
    Hs = _pick_row_strip(H, W, Cblk)

    # VMEM budget: double-buffered q/v/o blocks + weights/bias + scratch + slack.
    tile_b = Bb * H * W * Cblk * itemsize
    scratch_b = Kmax * Hp * W_al * Cblk * 4
    wbias_b = (Kmax * Kmax + 1) * Cblk * 4
    needed = 3 * 2 * tile_b + 2 * wbias_b + scratch_b
    vmem_limit = int(min(max(needed * 5 // 4 + (2 << 20), 32 << 20), 64 << 20))

    kernel = partial(_conv_relpos_kernel, Kmax=Kmax, H=H, W=W, W_al=W_al,
                     Bb=Bb, Hs=Hs, taps=taps, k_options=k_options)

    out_img = pl.pallas_call(
        kernel,
        out_shape=jax.ShapeDtypeStruct((B, H, W, C), q_img.dtype),
        grid_spec=pltpu.PrefetchScalarGridSpec(
            num_scalar_prefetch=1,
            # channel blocks outermost: w/b tiles are constant along the inner
            # batch axis (their re-DMA is elided) and the window gate is too.
            grid=(n_cblk, n_bblk),
            in_specs=[
                pl.BlockSpec((Bb, H, W, Cblk), lambda cb, b, kt: (b, 0, 0, cb)),
                pl.BlockSpec((Bb, H, W, Cblk), lambda cb, b, kt: (b, 0, 0, cb)),
                pl.BlockSpec((Kmax * Kmax, Cblk), lambda cb, b, kt: (0, cb)),
                pl.BlockSpec((1, Cblk), lambda cb, b, kt: (0, cb)),
            ],
            out_specs=pl.BlockSpec((Bb, H, W, Cblk),
                                   lambda cb, b, kt: (b, 0, 0, cb)),
            scratch_shapes=[pltpu.VMEM((Kmax, Hp, W_al, Cblk), jnp.float32)],
        ),
        compiler_params=pltpu.CompilerParams(
            dimension_semantics=("parallel", "parallel"),
            vmem_limit_bytes=vmem_limit),
    )(kblk_arr, q_img, v_img, w_comb, b_comb)
    return out_img


def conv_rel_pos_enc(q, v, size, windows, weights, biases):
    """Pallas implementation of ConvRelPosEnc.forward on [B, h, N, Ch] tensors."""
    B, h, N, Ch = q.shape
    H, W = size
    assert H * W == N
    C = h * Ch
    # NOTE: if neighbouring ops already produce/consume channel-last
    # [B, H, W, h*Ch], call conv_rel_pos_enc_nhwc directly and skip these
    # transposes (each is an extra HBM pass on a memory-bound op).
    q_img = q.transpose(0, 2, 1, 3).reshape(B, H, W, C)
    v_img = v.transpose(0, 2, 1, 3).reshape(B, H, W, C)
    out_img = conv_rel_pos_enc_nhwc(q_img, v_img, windows, weights, biases)
    return out_img.reshape(B, H, W, h, Ch).transpose(0, 3, 1, 2, 4).reshape(
        B, h, N, Ch)


def conv_rel_pos_enc_reference(q, v, size, windows, weights, biases):
    """Pure-JAX reference mirroring the PyTorch forward (computed in f32)."""
    B, h, N, Ch = q.shape
    H, W = size
    C = h * Ch
    v_img = v.astype(jnp.float32).transpose(0, 2, 1, 3).reshape(B, H, W, C)
    outs = []
    start = 0
    for K, w, bb in zip(windows, weights, biases):
        cs = w.shape[0]
        x = v_img[..., start:start + cs]
        w_hwio = jnp.transpose(w, (2, 3, 1, 0)).astype(jnp.float32)  # [K,K,1,cs]
        y = lax.conv_general_dilated(
            x, w_hwio, window_strides=(1, 1),
            padding=((K // 2, K // 2), (K // 2, K // 2)),
            dimension_numbers=('NHWC', 'HWIO', 'NHWC'),
            feature_group_count=cs)
        y = y + bb[None, None, None, :]
        outs.append(y)
        start += cs
    conv_v = jnp.concatenate(outs, axis=-1)
    conv_v = conv_v.reshape(B, H, W, h, Ch).transpose(0, 3, 1, 2, 4).reshape(
        B, h, N, Ch)
    return q.astype(jnp.float32) * conv_v


def _run_case(name, key, B, h, Ch, H, W, window, dtype, atol, rtol):
    windows = list(window.keys())
    head_splits = list(window.values())
    channel_splits = [hs * Ch for hs in head_splits]
    N = H * W

    kq, kv, *kws = jax.random.split(key, 2 + 2 * len(windows))
    q = jax.random.normal(kq, (B, h, N, Ch), dtype=jnp.float32).astype(dtype)
    v = jax.random.normal(kv, (B, h, N, Ch), dtype=jnp.float32).astype(dtype)

    # Deterministic "Conv2d" parameters (torch depthwise layout [C, 1, K, K]).
    weights, biases = [], []
    for i, (K, cs) in enumerate(zip(windows, channel_splits)):
        wkey, bkey = kws[2 * i], kws[2 * i + 1]
        fan_in = K * K                      # groups == channels
        bound = 1.0 / (fan_in ** 0.5)
        weights.append(jax.random.uniform(
            wkey, (cs, 1, K, K), jnp.float32, -bound, bound))
        biases.append(jax.random.uniform(
            bkey, (cs,), jnp.float32, -bound, bound))

    out = conv_rel_pos_enc(q, v, (H, W), windows, weights, biases)
    out = jax.block_until_ready(out)
    assert out.shape == (B, h, N, Ch) and out.dtype == dtype, name

    ref = conv_rel_pos_enc_reference(q, v, (H, W), windows, weights, biases)
    ok = jnp.allclose(out.astype(jnp.float32), ref.astype(jnp.float32),
                      atol=atol, rtol=rtol)
    assert bool(ok), f"{name}: mismatch vs reference"


if __name__ == "__main__":
    key = jax.random.PRNGKey(0)
    k1, k2 = jax.random.split(key)

    # Case 1: small, f32, aligned W, single (mixed-window) channel block.
    _run_case("f32_8x8", k1, B=2, h=4, Ch=32, H=8, W=8,
              window={3: 2, 5: 2}, dtype=jnp.float32, atol=1e-4, rtol=1e-4)

    # Case 2: MPViT-like head config (h=8, window {3:2,5:3,7:3}), bf16 I/O,
    # W not a multiple of 8, two channel blocks (exercises the per-block window
    # gating and uneven splits), two accumulator strips per image.
    _run_case("bf16_14x14", k2, B=2, h=8, Ch=32, H=14, W=14,
              window={3: 2, 5: 3, 7: 3}, dtype=jnp.bfloat16,
              atol=5e-2, rtol=5e-2)

    print("KERNEL_OK")
</pallas_src>

<mosaic_0001>
module attributes {stable_mosaic.version = 11 : i64} {
  func.func @_conv_relpos_kernel(%arg0: i32, %arg1: i32, %arg2: memref<1xi32, #tpu.memory_space<smem>>, %arg3: memref<2x8x8x128xf32, #tpu.memory_space<vmem>>, %arg4: memref<2x8x8x128xf32, #tpu.memory_space<vmem>>, %arg5: memref<25x128xf32, #tpu.memory_space<vmem>>, %arg6: memref<1x128xf32, #tpu.memory_space<vmem>>, %arg7: memref<2x8x8x128xf32, #tpu.memory_space<vmem>>, %arg8: memref<5x12x8x128xf32, #tpu.memory_space<vmem>>) attributes {dimension_semantics = [#tpu.dimension_semantics<parallel>, #tpu.dimension_semantics<parallel>], iteration_bounds = array<i64: 1, 1>, scalar_prefetch = 1 : i64, scratch_operands = 1 : i64, tpu.core_type = #tpu.core_type<tc>, window_params = [{transform_indices = @transform_0, window_bounds = array<i64: 2, 8, 8, 128>}, {transform_indices = @transform_1, window_bounds = array<i64: 2, 8, 8, 128>}, {transform_indices = @transform_2, window_bounds = array<i64: 25, 128>}, {transform_indices = @transform_3, window_bounds = array<i64: 1, 128>}, {transform_indices = @transform_4, window_bounds = array<i64: 2, 8, 8, 128>}]} {
    %c0 = arith.constant 0 : index
    %c0_0 = arith.constant 0 : index
    %0 = vector.load %arg6[%c0, %c0_0] : memref<1x128xf32, #tpu.memory_space<vmem>>, vector<1x128xf32>
    %cst = arith.constant 0.000000e+00 : f32
    %1 = vector.broadcast %cst : f32 to vector<2x8x128xf32>
    %c0_1 = arith.constant 0 : index
    %c0_2 = arith.constant 0 : index
    %c0_3 = arith.constant 0 : index
    %c0_4 = arith.constant 0 : index
    %2 = vector.load %arg8[%c0_1, %c0_2, %c0_3, %c0_4] : memref<5x12x8x128xf32, #tpu.memory_space<vmem>>, vector<1x2x8x128xf32>
    %3 = vector.shape_cast %2 : vector<1x2x8x128xf32> to vector<2x8x128xf32>
    %4 = vector.shape_cast %1 : vector<2x8x128xf32> to vector<1x2x8x128xf32>
    tpu.vector_store %arg8[%c0_1, %c0_2, %c0_3, %c0_4], %4 {strides = array<i32>} : memref<5x12x8x128xf32, #tpu.memory_space<vmem>>, vector<1x2x8x128xf32>,
    %cst_5 = arith.constant 0.000000e+00 : f32
    %5 = vector.broadcast %cst_5 : f32 to vector<2x8x128xf32>
    %c0_6 = arith.constant 0 : index
    %c10 = arith.constant 10 : index
    %c0_7 = arith.constant 0 : index
    %c0_8 = arith.constant 0 : index
    %6 = vector.load %arg8[%c0_6, %c10, %c0_7, %c0_8] : memref<5x12x8x128xf32, #tpu.memory_space<vmem>>, vector<1x2x8x128xf32>
    %7 = vector.shape_cast %6 : vector<1x2x8x128xf32> to vector<2x8x128xf32>
    %8 = vector.shape_cast %5 : vector<2x8x128xf32> to vector<1x2x8x128xf32>
    tpu.vector_store %arg8[%c0_6, %c10, %c0_7, %c0_8], %8 {strides = array<i32>} : memref<5x12x8x128xf32, #tpu.memory_space<vmem>>, vector<1x2x8x128xf32>,
    %cst_9 = arith.constant 0.000000e+00 : f32
    %9 = vector.broadcast %cst_9 : f32 to vector<8x2x128xf32>
    %c0_10 = arith.constant 0 : index
    %c2 = arith.constant 2 : index
    %c0_11 = arith.constant 0 : index
    %c0_12 = arith.constant 0 : index
    %10 = vector.load %arg8[%c0_10, %c2, %c0_11, %c0_12] : memref<5x12x8x128xf32, #tpu.memory_space<vmem>>, vector<1x8x2x128xf32>
    %11 = vector.shape_cast %10 : vector<1x8x2x128xf32> to vector<8x2x128xf32>
    %12 = vector.shape_cast %9 : vector<8x2x128xf32> to vector<1x8x2x128xf32>
    tpu.vector_store %arg8[%c0_10, %c2, %c0_11, %c0_12], %12 {strides = array<i32>} : memref<5x12x8x128xf32, #tpu.memory_space<vmem>>, vector<1x8x2x128xf32>,
    %c0_13 = arith.constant 0 : index
    %c0_14 = arith.constant 0 : index
    %c0_15 = arith.constant 0 : index
    %c0_16 = arith.constant 0 : index
    %13 = vector.load %arg4[%c0_13, %c0_14, %c0_15, %c0_16] : memref<2x8x8x128xf32, #tpu.memory_space<vmem>>, vector<1x8x6x128xf32>
    %14 = vector.shape_cast %13 : vector<1x8x6x128xf32> to vector<8x6x128xf32>
    %c0_17 = arith.constant 0 : index
    %c2_18 = arith.constant 2 : index
    %c2_19 = arith.constant 2 : index
    %c0_20 = arith.constant 0 : index
    %15 = vector.load %arg8[%c0_17, %c2_18, %c2_19, %c0_20] : memref<5x12x8x128xf32, #tpu.memory_space<vmem>>, vector<1x8x6x128xf32>
    %16 = vector.shape_cast %15 : vector<1x8x6x128xf32> to vector<8x6x128xf32>
    %17 = vector.shape_cast %14 : vector<8x6x128xf32> to vector<1x8x6x128xf32>
    tpu.vector_store %arg8[%c0_17, %c2_18, %c2_19, %c0_20], %17 {strides = array<i32>} : memref<5x12x8x128xf32, #tpu.memory_space<vmem>>, vector<1x8x6x128xf32>,
    %cst_21 = arith.constant 0.000000e+00 : f32
    %18 = vector.broadcast %cst_21 : f32 to vector<2x8x128xf32>
    %c1 = arith.constant 1 : index
    %c0_22 = arith.constant 0 : index
    %c0_23 = arith.constant 0 : index
    %c0_24 = arith.constant 0 : index
    %19 = vector.load %arg8[%c1, %c0_22, %c0_23, %c0_24] : memref<5x12x8x128xf32, #tpu.memory_space<vmem>>, vector<1x2x8x128xf32>
    %20 = vector.shape_cast %19 : vector<1x2x8x128xf32> to vector<2x8x128xf32>
    %21 = vector.shape_cast %18 : vector<2x8x128xf32> to vector<1x2x8x128xf32>
    tpu.vector_store %arg8[%c1, %c0_22, %c0_23, %c0_24], %21 {strides = array<i32>} : memref<5x12x8x128xf32, #tpu.memory_space<vmem>>, vector<1x2x8x128xf32>,
    %cst_25 = arith.constant 0.000000e+00 : f32
    %22 = vector.broadcast %cst_25 : f32 to vector<2x8x128xf32>
    %c1_26 = arith.constant 1 : index
    %c10_27 = arith.constant 10 : index
    %c0_28 = arith.constant 0 : index
    %c0_29 = arith.constant 0 : index
    %23 = vector.load %arg8[%c1_26, %c10_27, %c0_28, %c0_29] : memref<5x12x8x128xf32, #tpu.memory_space<vmem>>, vector<1x2x8x128xf32>
    %24 = vector.shape_cast %23 : vector<1x2x8x128xf32> to vector<2x8x128xf32>
    %25 = vector.shape_cast %22 : vector<2x8x128xf32> to vector<1x2x8x128xf32>
    tpu.vector_store %arg8[%c1_26, %c10_27, %c0_28, %c0_29], %25 {strides = array<i32>} : memref<5x12x8x128xf32, #tpu.memory_space<vmem>>, vector<1x2x8x128xf32>,
    %cst_30 = arith.constant 0.000000e+00 : f32
    %26 = vector.broadcast %cst_30 : f32 to vector<8x1x128xf32>
    %c1_31 = arith.constant 1 : index
    %c2_32 = arith.constant 2 : index
    %c0_33 = arith.constant 0 : index
    %c0_34 = arith.constant 0 : index
    %27 = vector.load %arg8[%c1_31, %c2_32, %c0_33, %c0_34] : memref<5x12x8x128xf32, #tpu.memory_space<vmem>>, vector<1x8x1x128xf32>
    %28 = vector.shape_cast %27 : vector<1x8x1x128xf32> to vector<8x1x128xf32>
    %29 = vector.shape_cast %26 : vector<8x1x128xf32> to vector<1x8x1x128xf32>
    tpu.vector_store %arg8[%c1_31, %c2_32, %c0_33, %c0_34], %29 {strides = array<i32>} : memref<5x12x8x128xf32, #tpu.memory_space<vmem>>, vector<1x8x1x128xf32>,
    %c0_35 = arith.constant 0 : index
    %c0_36 = arith.constant 0 : index
    %c0_37 = arith.constant 0 : index
    %c0_38 = arith.constant 0 : index
    %30 = vector.load %arg4[%c0_35, %c0_36, %c0_37, %c0_38] : memref<2x8x8x128xf32, #tpu.memory_space<vmem>>, vector<1x8x7x128xf32>
    %31 = vector.shape_cast %30 : vector<1x8x7x128xf32> to vector<8x7x128xf32>
    %c1_39 = arith.constant 1 : index
    %c2_40 = arith.constant 2 : index
    %c1_41 = arith.constant 1 : index
    %c0_42 = arith.constant 0 : index
    %32 = vector.load %arg8[%c1_39, %c2_40, %c1_41, %c0_42] : memref<5x12x8x128xf32, #tpu.memory_space<vmem>>, vector<1x8x7x128xf32>
    %33 = vector.shape_cast %32 : vector<1x8x7x128xf32> to vector<8x7x128xf32>
    %34 = vector.shape_cast %31 : vector<8x7x128xf32> to vector<1x8x7x128xf32>
    tpu.vector_store %arg8[%c1_39, %c2_40, %c1_41, %c0_42], %34 {strides = array<i32>} : memref<5x12x8x128xf32, #tpu.memory_space<vmem>>, vector<1x8x7x128xf32>,
    %cst_43 = arith.constant 0.000000e+00 : f32
    %35 = vector.broadcast %cst_43 : f32 to vector<2x8x128xf32>
    %c2_44 = arith.constant 2 : index
    %c0_45 = arith.constant 0 : index
    %c0_46 = arith.constant 0 : index
    %c0_47 = arith.constant 0 : index
    %36 = vector.load %arg8[%c2_44, %c0_45, %c0_46, %c0_47] : memref<5x12x8x128xf32, #tpu.memory_space<vmem>>, vector<1x2x8x128xf32>
    %37 = vector.shape_cast %36 : vector<1x2x8x128xf32> to vector<2x8x128xf32>
    %38 = vector.shape_cast %35 : vector<2x8x128xf32> to vector<1x2x8x128xf32>
    tpu.vector_store %arg8[%c2_44, %c0_45, %c0_46, %c0_47], %38 {strides = array<i32>} : memref<5x12x8x128xf32, #tpu.memory_space<vmem>>, vector<1x2x8x128xf32>,
    %cst_48 = arith.constant 0.000000e+00 : f32
    %39 = vector.broadcast %cst_48 : f32 to vector<2x8x128xf32>
    %c2_49 = arith.constant 2 : index
    %c10_50 = arith.constant 10 : index
    %c0_51 = arith.constant 0 : index
    %c0_52 = arith.constant 0 : index
    %40 = vector.load %arg8[%c2_49, %c10_50, %c0_51, %c0_52] : memref<5x12x8x128xf32, #tpu.memory_space<vmem>>, vector<1x2x8x128xf32>
    %41 = vector.shape_cast %40 : vector<1x2x8x128xf32> to vector<2x8x128xf32>
    %42 = vector.shape_cast %39 : vector<2x8x128xf32> to vector<1x2x8x128xf32>
    tpu.vector_store %arg8[%c2_49, %c10_50, %c0_51, %c0_52], %42 {strides = array<i32>} : memref<5x12x8x128xf32, #tpu.memory_space<vmem>>, vector<1x2x8x128xf32>,
    %c0_53 = arith.constant 0 : index
    %c0_54 = arith.constant 0 : index
    %c0_55 = arith.constant 0 : index
    %c0_56 = arith.constant 0 : index
    %43 = vector.load %arg4[%c0_53, %c0_54, %c0_55, %c0_56] : memref<2x8x8x128xf32, #tpu.memory_space<vmem>>, vector<1x8x8x128xf32>
    %44 = vector.shape_cast %43 : vector<1x8x8x128xf32> to vector<8x8x128xf32>
    %c2_57 = arith.constant 2 : index
    %c2_58 = arith.constant 2 : index
    %c0_59 = arith.constant 0 : index
    %c0_60 = arith.constant 0 : index
    %45 = vector.load %arg8[%c2_57, %c2_58, %c0_59, %c0_60] : memref<5x12x8x128xf32, #tpu.memory_space<vmem>>, vector<1x8x8x128xf32>
    %46 = vector.shape_cast %45 : vector<1x8x8x128xf32> to vector<8x8x128xf32>
    %47 = vector.shape_cast %44 : vector<8x8x128xf32> to vector<1x8x8x128xf32>
    tpu.vector_store %arg8[%c2_57, %c2_58, %c0_59, %c0_60], %47 {strides = array<i32>} : memref<5x12x8x128xf32, #tpu.memory_space<vmem>>, vector<1x8x8x128xf32>,
    %cst_61 = arith.constant 0.000000e+00 : f32
    %48 = vector.broadcast %cst_61 : f32 to vector<2x8x128xf32>
    %c3 = arith.constant 3 : index
    %c0_62 = arith.constant 0 : index
    %c0_63 = arith.constant 0 : index
    %c0_64 = arith.constant 0 : index
    %49 = vector.load %arg8[%c3, %c0_62, %c0_63, %c0_64] : memref<5x12x8x128xf32, #tpu.memory_space<vmem>>, vector<1x2x8x128xf32>
    %50 = vector.shape_cast %49 : vector<1x2x8x128xf32> to vector<2x8x128xf32>
    %51 = vector.shape_cast %48 : vector<2x8x128xf32> to vector<1x2x8x128xf32>
    tpu.vector_store %arg8[%c3, %c0_62, %c0_63, %c0_64], %51 {strides = array<i32>} : memref<5x12x8x128xf32, #tpu.memory_space<vmem>>, vector<1x2x8x128xf32>,
    %cst_65 = arith.constant 0.000000e+00 : f32
    %52 = vector.broadcast %cst_65 : f32 to vector<2x8x128xf32>
    %c3_66 = arith.constant 3 : index
    %c10_67 = arith.constant 10 : index
    %c0_68 = arith.constant 0 : index
    %c0_69 = arith.constant 0 : index
    %53 = vector.load %arg8[%c3_66, %c10_67, %c0_68, %c0_69] : memref<5x12x8x128xf32, #tpu.memory_space<vmem>>, vector<1x2x8x128xf32>
    %54 = vector.shape_cast %53 : vector<1x2x8x128xf32> to vector<2x8x128xf32>
    %55 = vector.shape_cast %52 : vector<2x8x128xf32> to vector<1x2x8x128xf32>
    tpu.vector_store %arg8[%c3_66, %c10_67, %c0_68, %c0_69], %55 {strides = array<i32>} : memref<5x12x8x128xf32, #tpu.memory_space<vmem>>, vector<1x2x8x128xf32>,
    %cst_70 = arith.constant 0.000000e+00 : f32
    %56 = vector.broadcast %cst_70 : f32 to vector<8x1x128xf32>
    %c3_71 = arith.constant 3 : index
    %c2_72 = arith.constant 2 : index
    %c7 = arith.constant 7 : index
    %c0_73 = arith.constant 0 : index
    %57 = vector.load %arg8[%c3_71, %c2_72, %c7, %c0_73] : memref<5x12x8x128xf32, #tpu.memory_space<vmem>>, vector<1x8x1x128xf32>
    %58 = vector.shape_cast %57 : vector<1x8x1x128xf32> to vector<8x1x128xf32>
    %59 = vector.shape_cast %56 : vector<8x1x128xf32> to vector<1x8x1x128xf32>
    tpu.vector_store %arg8[%c3_71, %c2_72, %c7, %c0_73], %59 {strides = array<i32>} : memref<5x12x8x128xf32, #tpu.memory_space<vmem>>, vector<1x8x1x128xf32>,
    %c0_74 = arith.constant 0 : index
    %c0_75 = arith.constant 0 : index
    %c1_76 = arith.constant 1 : index
    %c0_77 = arith.constant 0 : index
    %60 = vector.load %arg4[%c0_74, %c0_75, %c1_76, %c0_77] : memref<2x8x8x128xf32, #tpu.memory_space<vmem>>, vector<1x8x7x128xf32>
    %61 = vector.shape_cast %60 : vector<1x8x7x128xf32> to vector<8x7x128xf32>
    %c3_78 = arith.constant 3 : index
    %c2_79 = arith.constant 2 : index
    %c0_80 = arith.constant 0 : index
    %c0_81 = arith.constant 0 : index
    %62 = vector.load %arg8[%c3_78, %c2_79, %c0_80, %c0_81] : memref<5x12x8x128xf32, #tpu.memory_space<vmem>>, vector<1x8x7x128xf32>
    %63 = vector.shape_cast %62 : vector<1x8x7x128xf32> to vector<8x7x128xf32>
    %64 = vector.shape_cast %61 : vector<8x7x128xf32> to vector<1x8x7x128xf32>
    tpu.vector_store %arg8[%c3_78, %c2_79, %c0_80, %c0_81], %64 {strides = array<i32>} : memref<5x12x8x128xf32, #tpu.memory_space<vmem>>, vector<1x8x7x128xf32>,
    %cst_82 = arith.constant 0.000000e+00 : f32
    %65 = vector.broadcast %cst_82 : f32 to vector<2x8x128xf32>
    %c4 = arith.constant 4 : index
    %c0_83 = arith.constant 0 : index
    %c0_84 = arith.constant 0 : index
    %c0_85 = arith.constant 0 : index
    %66 = vector.load %arg8[%c4, %c0_83, %c0_84, %c0_85] : memref<5x12x8x128xf32, #tpu.memory_space<vmem>>, vector<1x2x8x128xf32>
    %67 = vector.shape_cast %66 : vector<1x2x8x128xf32> to vector<2x8x128xf32>
    %68 = vector.shape_cast %65 : vector<2x8x128xf32> to vector<1x2x8x128xf32>
    tpu.vector_store %arg8[%c4, %c0_83, %c0_84, %c0_85], %68 {strides = array<i32>} : memref<5x12x8x128xf32, #tpu.memory_space<vmem>>, vector<1x2x8x128xf32>,
    %cst_86 = arith.constant 0.000000e+00 : f32
    %69 = vector.broadcast %cst_86 : f32 to vector<2x8x128xf32>
    %c4_87 = arith.constant 4 : index
    %c10_88 = arith.constant 10 : index
    %c0_89 = arith.constant 0 : index
    %c0_90 = arith.constant 0 : index
    %70 = vector.load %arg8[%c4_87, %c10_88, %c0_89, %c0_90] : memref<5x12x8x128xf32, #tpu.memory_space<vmem>>, vector<1x2x8x128xf32>
    %71 = vector.shape_cast %70 : vector<1x2x8x128xf32> to vector<2x8x128xf32>
    %72 = vector.shape_cast %69 : vector<2x8x128xf32> to vector<1x2x8x128xf32>
    tpu.vector_store %arg8[%c4_87, %c10_88, %c0_89, %c0_90], %72 {strides = array<i32>} : memref<5x12x8x128xf32, #tpu.memory_space<vmem>>, vector<1x2x8x128xf32>,
    %cst_91 = arith.constant 0.000000e+00 : f32
    %73 = vector.broadcast %cst_91 : f32 to vector<8x2x128xf32>
    %c4_92 = arith.constant 4 : index
    %c2_93 = arith.constant 2 : index
    %c6 = arith.constant 6 : index
    %c0_94 = arith.constant 0 : index
    %74 = vector.load %arg8[%c4_92, %c2_93, %c6, %c0_94] : memref<5x12x8x128xf32, #tpu.memory_space<vmem>>, vector<1x8x2x128xf32>
    %75 = vector.shape_cast %74 : vector<1x8x2x128xf32> to vector<8x2x128xf32>
    %76 = vector.shape_cast %73 : vector<8x2x128xf32> to vector<1x8x2x128xf32>
    tpu.vector_store %arg8[%c4_92, %c2_93, %c6, %c0_94], %76 {strides = array<i32>} : memref<5x12x8x128xf32, #tpu.memory_space<vmem>>, vector<1x8x2x128xf32>,
    %c0_95 = arith.constant 0 : index
    %c0_96 = arith.constant 0 : index
    %c2_97 = arith.constant 2 : index
    %c0_98 = arith.constant 0 : index
    %77 = vector.load %arg4[%c0_95, %c0_96, %c2_97, %c0_98] : memref<2x8x8x128xf32, #tpu.memory_space<vmem>>, vector<1x8x6x128xf32>
    %78 = vector.shape_cast %77 : vector<1x8x6x128xf32> to vector<8x6x128xf32>
    %c4_99 = arith.constant 4 : index
    %c2_100 = arith.constant 2 : index
    %c0_101 = arith.constant 0 : index
    %c0_102 = arith.constant 0 : index
    %79 = vector.load %arg8[%c4_99, %c2_100, %c0_101, %c0_102] : memref<5x12x8x128xf32, #tpu.memory_space<vmem>>, vector<1x8x6x128xf32>
    %80 = vector.shape_cast %79 : vector<1x8x6x128xf32> to vector<8x6x128xf32>
    %81 = vector.shape_cast %78 : vector<8x6x128xf32> to vector<1x8x6x128xf32>
    tpu.vector_store %arg8[%c4_99, %c2_100, %c0_101, %c0_102], %81 {strides = array<i32>} : memref<5x12x8x128xf32, #tpu.memory_space<vmem>>, vector<1x8x6x128xf32>,
    %82 = vector.shape_cast %0 : vector<1x128xf32> to vector<1x1x128xf32>
    %83 = vector.shape_cast %82 : vector<1x1x128xf32> to vector<1x1x128xf32>
    %84 = vector.broadcast %83 : vector<1x1x128xf32> to vector<8x8x128xf32>
    %c0_103 = arith.constant 0 : index
    %c0_104 = arith.constant 0 : index
    %85 = vector.load %arg5[%c0_103, %c0_104] : memref<25x128xf32, #tpu.memory_space<vmem>>, vector<1x128xf32>
    %86 = vector.shape_cast %85 : vector<1x128xf32> to vector<128xf32>
    %c2_105 = arith.constant 2 : index
    %c2_106 = arith.constant 2 : index
    %c0_107 = arith.constant 0 : index
    %c0_108 = arith.constant 0 : index
    %87 = vector.load %arg8[%c2_105, %c2_106, %c0_107, %c0_108] : memref<5x12x8x128xf32, #tpu.memory_space<vmem>>, vector<1x8x8x128xf32>
    %88 = vector.shape_cast %87 : vector<1x8x8x128xf32> to vector<8x8x128xf32>
    %89 = vector.shape_cast %86 : vector<128xf32> to vector<1x1x128xf32>
    %90 = vector.broadcast %89 : vector<1x1x128xf32> to vector<8x8x128xf32>
    %91 = arith.mulf %88, %90 : vector<8x8x128xf32>
    %92 = arith.addf %84, %91 : vector<8x8x128xf32>
    %c1_109 = arith.constant 1 : index
    %c0_110 = arith.constant 0 : index
    %93 = vector.load %arg5[%c1_109, %c0_110] : memref<25x128xf32, #tpu.memory_space<vmem>>, vector<1x128xf32>
    %94 = vector.shape_cast %93 : vector<1x128xf32> to vector<128xf32>
    %c1_111 = arith.constant 1 : index
    %c1_112 = arith.constant 1 : index
    %c0_113 = arith.constant 0 : index
    %c0_114 = arith.constant 0 : index
    %95 = vector.load %arg8[%c1_111, %c1_112, %c0_113, %c0_114] : memref<5x12x8x128xf32, #tpu.memory_space<vmem>>, vector<1x8x8x128xf32>
    %96 = vector.shape_cast %95 : vector<1x8x8x128xf32> to vector<8x8x128xf32>
    %97 = vector.shape_cast %94 : vector<128xf32> to vector<1x1x128xf32>
    %98 = vector.broadcast %97 : vector<1x1x128xf32> to vector<8x8x128xf32>
    %99 = arith.mulf %96, %98 : vector<8x8x128xf32>
    %100 = arith.addf %92, %99 : vector<8x8x128xf32>
    %c2_115 = arith.constant 2 : index
    %c0_116 = arith.constant 0 : index
    %101 = vector.load %arg5[%c2_115, %c0_116] : memref<25x128xf32, #tpu.memory_space<vmem>>, vector<1x128xf32>
    %102 = vector.shape_cast %101 : vector<1x128xf32> to vector<128xf32>
    %c2_117 = arith.constant 2 : index
    %c1_118 = arith.constant 1 : index
    %c0_119 = arith.constant 0 : index
    %c0_120 = arith.constant 0 : index
    %103 = vector.load %arg8[%c2_117, %c1_118, %c0_119, %c0_120] : memref<5x12x8x128xf32, #tpu.memory_space<vmem>>, vector<1x8x8x128xf32>
    %104 = vector.shape_cast %103 : vector<1x8x8x128xf32> to vector<8x8x128xf32>
    %105 = vector.shape_cast %102 : vector<128xf32> to vector<1x1x128xf32>
    %106 = vector.broadcast %105 : vector<1x1x128xf32> to vector<8x8x128xf32>
    %107 = arith.mulf %104, %106 : vector<8x8x128xf32>
    %108 = arith.addf %100, %107 : vector<8x8x128xf32>
    %c3_121 = arith.constant 3 : index
    %c0_122 = arith.constant 0 : index
    %109 = vector.load %arg5[%c3_121, %c0_122] : memref<25x128xf32, #tpu.memory_space<vmem>>, vector<1x128xf32>
    %110 = vector.shape_cast %109 : vector<1x128xf32> to vector<128xf32>
    %c3_123 = arith.constant 3 : index
    %c1_124 = arith.constant 1 : index
    %c0_125 = arith.constant 0 : index
    %c0_126 = arith.constant 0 : index
    %111 = vector.load %arg8[%c3_123, %c1_124, %c0_125, %c0_126] : memref<5x12x8x128xf32, #tpu.memory_space<vmem>>, vector<1x8x8x128xf32>
    %112 = vector.shape_cast %111 : vector<1x8x8x128xf32> to vector<8x8x128xf32>
    %113 = vector.shape_cast %110 : vector<128xf32> to vector<1x1x128xf32>
    %114 = vector.broadcast %113 : vector<1x1x128xf32> to vector<8x8x128xf32>
    %115 = arith.mulf %112, %114 : vector<8x8x128xf32>
    %116 = arith.addf %108, %115 : vector<8x8x128xf32>
    %c4_127 = arith.constant 4 : index
    %c0_128 = arith.constant 0 : index
    %117 = vector.load %arg5[%c4_127, %c0_128] : memref<25x128xf32, #tpu.memory_space<vmem>>, vector<1x128xf32>
    %118 = vector.shape_cast %117 : vector<1x128xf32> to vector<128xf32>
    %c1_129 = arith.constant 1 : index
    %c2_130 = arith.constant 2 : index
    %c0_131 = arith.constant 0 : index
    %c0_132 = arith.constant 0 : index
    %119 = vector.load %arg8[%c1_129, %c2_130, %c0_131, %c0_132] : memref<5x12x8x128xf32, #tpu.memory_space<vmem>>, vector<1x8x8x128xf32>
    %120 = vector.shape_cast %119 : vector<1x8x8x128xf32> to vector<8x8x128xf32>
    %121 = vector.shape_cast %118 : vector<128xf32> to vector<1x1x128xf32>
    %122 = vector.broadcast %121 : vector<1x1x128xf32> to vector<8x8x128xf32>
    %123 = arith.mulf %120, %122 : vector<8x8x128xf32>
    %124 = arith.addf %116, %123 : vector<8x8x128xf32>
    %c5 = arith.constant 5 : index
    %c0_133 = arith.constant 0 : index
    %125 = vector.load %arg5[%c5, %c0_133] : memref<25x128xf32, #tpu.memory_space<vmem>>, vector<1x128xf32>
    %126 = vector.shape_cast %125 : vector<1x128xf32> to vector<128xf32>
    %c3_134 = arith.constant 3 : index
    %c2_135 = arith.constant 2 : index
    %c0_136 = arith.constant 0 : index
    %c0_137 = arith.constant 0 : index
    %127 = vector.load %arg8[%c3_134, %c2_135, %c0_136, %c0_137] : memref<5x12x8x128xf32, #tpu.memory_space<vmem>>, vector<1x8x8x128xf32>
    %128 = vector.shape_cast %127 : vector<1x8x8x128xf32> to vector<8x8x128xf32>
    %129 = vector.shape_cast %126 : vector<128xf32> to vector<1x1x128xf32>
    %130 = vector.broadcast %129 : vector<1x1x128xf32> to vector<8x8x128xf32>
    %131 = arith.mulf %128, %130 : vector<8x8x128xf32>
    %132 = arith.addf %124, %131 : vector<8x8x128xf32>
    %c6_138 = arith.constant 6 : index
    %c0_139 = arith.constant 0 : index
    %133 = vector.load %arg5[%c6_138, %c0_139] : memref<25x128xf32, #tpu.memory_space<vmem>>, vector<1x128xf32>
    %134 = vector.shape_cast %133 : vector<1x128xf32> to vector<128xf32>
    %c1_140 = arith.constant 1 : index
    %c3_141 = arith.constant 3 : index
    %c0_142 = arith.constant 0 : index
    %c0_143 = arith.constant 0 : index
    %135 = vector.load %arg8[%c1_140, %c3_141, %c0_142, %c0_143] : memref<5x12x8x128xf32, #tpu.memory_space<vmem>>, vector<1x8x8x128xf32>
    %136 = vector.shape_cast %135 : vector<1x8x8x128xf32> to vector<8x8x128xf32>
    %137 = vector.shape_cast %134 : vector<128xf32> to vector<1x1x128xf32>
    %138 = vector.broadcast %137 : vector<1x1x128xf32> to vector<8x8x128xf32>
    %139 = arith.mulf %136, %138 : vector<8x8x128xf32>
    %140 = arith.addf %132, %139 : vector<8x8x128xf32>
    %c7_144 = arith.constant 7 : index
    %c0_145 = arith.constant 0 : index
    %141 = vector.load %arg5[%c7_144, %c0_145] : memref<25x128xf32, #tpu.memory_space<vmem>>, vector<1x128xf32>
    %142 = vector.shape_cast %141 : vector<1x128xf32> to vector<128xf32>
    %c2_146 = arith.constant 2 : index
    %c3_147 = arith.constant 3 : index
    %c0_148 = arith.constant 0 : index
    %c0_149 = arith.constant 0 : index
    %143 = vector.load %arg8[%c2_146, %c3_147, %c0_148, %c0_149] : memref<5x12x8x128xf32, #tpu.memory_space<vmem>>, vector<1x8x8x128xf32>
    %144 = vector.shape_cast %143 : vector<1x8x8x128xf32> to vector<8x8x128xf32>
    %145 = vector.shape_cast %142 : vector<128xf32> to vector<1x1x128xf32>
    %146 = vector.broadcast %145 : vector<1x1x128xf32> to vector<8x8x128xf32>
    %147 = arith.mulf %144, %146 : vector<8x8x128xf32>
    %148 = arith.addf %140, %147 : vector<8x8x128xf32>
    %c8 = arith.constant 8 : index
    %c0_150 = arith.constant 0 : index
    %149 = vector.load %arg5[%c8, %c0_150] : memref<25x128xf32, #tpu.memory_space<vmem>>, vector<1x128xf32>
    %150 = vector.shape_cast %149 : vector<1x128xf32> to vector<128xf32>
    %c3_151 = arith.constant 3 : index
    %c3_152 = arith.constant 3 : index
    %c0_153 = arith.constant 0 : index
    %c0_154 = arith.constant 0 : index
    %151 = vector.load %arg8[%c3_151, %c3_152, %c0_153, %c0_154] : memref<5x12x8x128xf32, #tpu.memory_space<vmem>>, vector<1x8x8x128xf32>
    %152 = vector.shape_cast %151 : vector<1x8x8x128xf32> to vector<8x8x128xf32>
    %153 = vector.shape_cast %150 : vector<128xf32> to vector<1x1x128xf32>
    %154 = vector.broadcast %153 : vector<1x1x128xf32> to vector<8x8x128xf32>
    %155 = arith.mulf %152, %154 : vector<8x8x128xf32>
    %156 = arith.addf %148, %155 : vector<8x8x128xf32>
    %c9 = arith.constant 9 : index
    %c0_155 = arith.constant 0 : index
    %157 = vector.load %arg5[%c9, %c0_155] : memref<25x128xf32, #tpu.memory_space<vmem>>, vector<1x128xf32>
    %158 = vector.shape_cast %157 : vector<1x128xf32> to vector<128xf32>
    %c0_156 = arith.constant 0 : index
    %c0_157 = arith.constant 0 : index
    %c0_158 = arith.constant 0 : index
    %c0_159 = arith.constant 0 : index
    %159 = vector.load %arg8[%c0_156, %c0_157, %c0_158, %c0_159] : memref<5x12x8x128xf32, #tpu.memory_space<vmem>>, vector<1x8x8x128xf32>
    %160 = vector.shape_cast %159 : vector<1x8x8x128xf32> to vector<8x8x128xf32>
    %161 = vector.shape_cast %158 : vector<128xf32> to vector<1x1x128xf32>
    %162 = vector.broadcast %161 : vector<1x1x128xf32> to vector<8x8x128xf32>
    %163 = arith.mulf %160, %162 : vector<8x8x128xf32>
    %164 = arith.addf %156, %163 : vector<8x8x128xf32>
    %c10_160 = arith.constant 10 : index
    %c0_161 = arith.constant 0 : index
    %165 = vector.load %arg5[%c10_160, %c0_161] : memref<25x128xf32, #tpu.memory_space<vmem>>, vector<1x128xf32>
    %166 = vector.shape_cast %165 : vector<1x128xf32> to vector<128xf32>
    %c1_162 = arith.constant 1 : index
    %c0_163 = arith.constant 0 : index
    %c0_164 = arith.constant 0 : index
    %c0_165 = arith.constant 0 : index
    %167 = vector.load %arg8[%c1_162, %c0_163, %c0_164, %c0_165] : memref<5x12x8x128xf32, #tpu.memory_space<vmem>>, vector<1x8x8x128xf32>
    %168 = vector.shape_cast %167 : vector<1x8x8x128xf32> to vector<8x8x128xf32>
    %169 = vector.shape_cast %166 : vector<128xf32> to vector<1x1x128xf32>
    %170 = vector.broadcast %169 : vector<1x1x128xf32> to vector<8x8x128xf32>
    %171 = arith.mulf %168, %170 : vector<8x8x128xf32>
    %172 = arith.addf %164, %171 : vector<8x8x128xf32>
    %c11 = arith.constant 11 : index
    %c0_166 = arith.constant 0 : index
    %173 = vector.load %arg5[%c11, %c0_166] : memref<25x128xf32, #tpu.memory_space<vmem>>, vector<1x128xf32>
    %174 = vector.shape_cast %173 : vector<1x128xf32> to vector<128xf32>
    %c2_167 = arith.constant 2 : index
    %c0_168 = arith.constant 0 : index
    %c0_169 = arith.constant 0 : index
    %c0_170 = arith.constant 0 : index
    %175 = vector.load %arg8[%c2_167, %c0_168, %c0_169, %c0_170] : memref<5x12x8x128xf32, #tpu.memory_space<vmem>>, vector<1x8x8x128xf32>
    %176 = vector.shape_cast %175 : vector<1x8x8x128xf32> to vector<8x8x128xf32>
    %177 = vector.shape_cast %174 : vector<128xf32> to vector<1x1x128xf32>
    %178 = vector.broadcast %177 : vector<1x1x128xf32> to vector<8x8x128xf32>
    %179 = arith.mulf %176, %178 : vector<8x8x128xf32>
    %180 = arith.addf %172, %179 : vector<8x8x128xf32>
    %c12 = arith.constant 12 : index
    %c0_171 = arith.constant 0 : index
    %181 = vector.load %arg5[%c12, %c0_171] : memref<25x128xf32, #tpu.memory_space<vmem>>, vector<1x128xf32>
    %182 = vector.shape_cast %181 : vector<1x128xf32> to vector<128xf32>
    %c3_172 = arith.constant 3 : index
    %c0_173 = arith.constant 0 : index
    %c0_174 = arith.constant 0 : index
    %c0_175 = arith.constant 0 : index
    %183 = vector.load %arg8[%c3_172, %c0_173, %c0_174, %c0_175] : memref<5x12x8x128xf32, #tpu.memory_space<vmem>>, vector<1x8x8x128xf32>
    %184 = vector.shape_cast %183 : vector<1x8x8x128xf32> to vector<8x8x128xf32>
    %185 = vector.shape_cast %182 : vector<128xf32> to vector<1x1x128xf32>
    %186 = vector.broadcast %185 : vector<1x1x128xf32> to vector<8x8x128xf32>
    %187 = arith.mulf %184, %186 : vector<8x8x128xf32>
    %188 = arith.addf %180, %187 : vector<8x8x128xf32>
    %c13 = arith.constant 13 : index
    %c0_176 = arith.constant 0 : index
    %189 = vector.load %arg5[%c13, %c0_176] : memref<25x128xf32, #tpu.memory_space<vmem>>, vector<1x128xf32>
    %190 = vector.shape_cast %189 : vector<1x128xf32> to vector<128xf32>
    %c4_177 = arith.constant 4 : index
    %c0_178 = arith.constant 0 : index
    %c0_179 = arith.constant 0 : index
    %c0_180 = arith.constant 0 : index
    %191 = vector.load %arg8[%c4_177, %c0_178, %c0_179, %c0_180] : memref<5x12x8x128xf32, #tpu.memory_space<vmem>>, vector<1x8x8x128xf32>
    %192 = vector.shape_cast %191 : vector<1x8x8x128xf32> to vector<8x8x128xf32>
    %193 = vector.shape_cast %190 : vector<128xf32> to vector<1x1x128xf32>
    %194 = vector.broadcast %193 : vector<1x1x128xf32> to vector<8x8x128xf32>
    %195 = arith.mulf %192, %194 : vector<8x8x128xf32>
    %196 = arith.addf %188, %195 : vector<8x8x128xf32>
    %c14 = arith.constant 14 : index
    %c0_181 = arith.constant 0 : index
    %197 = vector.load %arg5[%c14, %c0_181] : memref<25x128xf32, #tpu.memory_space<vmem>>, vector<1x128xf32>
    %198 = vector.shape_cast %197 : vector<1x128xf32> to vector<128xf32>
    %c0_182 = arith.constant 0 : index
    %c1_183 = arith.constant 1 : index
    %c0_184 = arith.constant 0 : index
    %c0_185 = arith.constant 0 : index
    %199 = vector.load %arg8[%c0_182, %c1_183, %c0_184, %c0_185] : memref<5x12x8x128xf32, #tpu.memory_space<vmem>>, vector<1x8x8x128xf32>
    %200 = vector.shape_cast %199 : vector<1x8x8x128xf32> to vector<8x8x128xf32>
    %201 = vector.shape_cast %198 : vector<128xf32> to vector<1x1x128xf32>
    %202 = vector.broadcast %201 : vector<1x1x128xf32> to vector<8x8x128xf32>
    %203 = arith.mulf %200, %202 : vector<8x8x128xf32>
    %204 = arith.addf %196, %203 : vector<8x8x128xf32>
    %c15 = arith.constant 15 : index
    %c0_186 = arith.constant 0 : index
    %205 = vector.load %arg5[%c15, %c0_186] : memref<25x128xf32, #tpu.memory_space<vmem>>, vector<1x128xf32>
    %206 = vector.shape_cast %205 : vector<1x128xf32> to vector<128xf32>
    %c4_187 = arith.constant 4 : index
    %c1_188 = arith.constant 1 : index
    %c0_189 = arith.constant 0 : index
    %c0_190 = arith.constant 0 : index
    %207 = vector.load %arg8[%c4_187, %c1_188, %c0_189, %c0_190] : memref<5x12x8x128xf32, #tpu.memory_space<vmem>>, vector<1x8x8x128xf32>
    %208 = vector.shape_cast %207 : vector<1x8x8x128xf32> to vector<8x8x128xf32>
    %209 = vector.shape_cast %206 : vector<128xf32> to vector<1x1x128xf32>
    %210 = vector.broadcast %209 : vector<1x1x128xf32> to vector<8x8x128xf32>
    %211 = arith.mulf %208, %210 : vector<8x8x128xf32>
    %212 = arith.addf %204, %211 : vector<8x8x128xf32>
    %c16 = arith.constant 16 : index
    %c0_191 = arith.constant 0 : index
    %213 = vector.load %arg5[%c16, %c0_191] : memref<25x128xf32, #tpu.memory_space<vmem>>, vector<1x128xf32>
    %214 = vector.shape_cast %213 : vector<1x128xf32> to vector<128xf32>
    %c0_192 = arith.constant 0 : index
    %c2_193 = arith.constant 2 : index
    %c0_194 = arith.constant 0 : index
    %c0_195 = arith.constant 0 : index
    %215 = vector.load %arg8[%c0_192, %c2_193, %c0_194, %c0_195] : memref<5x12x8x128xf32, #tpu.memory_space<vmem>>, vector<1x8x8x128xf32>
    %216 = vector.shape_cast %215 : vector<1x8x8x128xf32> to vector<8x8x128xf32>
    %217 = vector.shape_cast %214 : vector<128xf32> to vector<1x1x128xf32>
    %218 = vector.broadcast %217 : vector<1x1x128xf32> to vector<8x8x128xf32>
    %219 = arith.mulf %216, %218 : vector<8x8x128xf32>
    %220 = arith.addf %212, %219 : vector<8x8x128xf32>
    %c17 = arith.constant 17 : index
    %c0_196 = arith.constant 0 : index
    %221 = vector.load %arg5[%c17, %c0_196] : memref<25x128xf32, #tpu.memory_space<vmem>>, vector<1x128xf32>
    %222 = vector.shape_cast %221 : vector<1x128xf32> to vector<128xf32>
    %c4_197 = arith.constant 4 : index
    %c2_198 = arith.constant 2 : index
    %c0_199 = arith.constant 0 : index
    %c0_200 = arith.constant 0 : index
    %223 = vector.load %arg8[%c4_197, %c2_198, %c0_199, %c0_200] : memref<5x12x8x128xf32, #tpu.memory_space<vmem>>, vector<1x8x8x128xf32>
    %224 = vector.shape_cast %223 : vector<1x8x8x128xf32> to vector<8x8x128xf32>
    %225 = vector.shape_cast %222 : vector<128xf32> to vector<1x1x128xf32>
    %226 = vector.broadcast %225 : vector<1x1x128xf32> to vector<8x8x128xf32>
    %227 = arith.mulf %224, %226 : vector<8x8x128xf32>
    %228 = arith.addf %220, %227 : vector<8x8x128xf32>
    %c18 = arith.constant 18 : index
    %c0_201 = arith.constant 0 : index
    %229 = vector.load %arg5[%c18, %c0_201] : memref<25x128xf32, #tpu.memory_space<vmem>>, vector<1x128xf32>
    %230 = vector.shape_cast %229 : vector<1x128xf32> to vector<128xf32>
    %c0_202 = arith.constant 0 : index
    %c3_203 = arith.constant 3 : index
    %c0_204 = arith.constant 0 : index
    %c0_205 = arith.constant 0 : index
    %231 = vector.load %arg8[%c0_202, %c3_203, %c0_204, %c0_205] : memref<5x12x8x128xf32, #tpu.memory_space<vmem>>, vector<1x8x8x128xf32>
    %232 = vector.shape_cast %231 : vector<1x8x8x128xf32> to vector<8x8x128xf32>
    %233 = vector.shape_cast %230 : vector<128xf32> to vector<1x1x128xf32>
    %234 = vector.broadcast %233 : vector<1x1x128xf32> to vector<8x8x128xf32>
    %235 = arith.mulf %232, %234 : vector<8x8x128xf32>
    %236 = arith.addf %228, %235 : vector<8x8x128xf32>
    %c19 = arith.constant 19 : index
    %c0_206 = arith.constant 0 : index
    %237 = vector.load %arg5[%c19, %c0_206] : memref<25x128xf32, #tpu.memory_space<vmem>>, vector<1x128xf32>
    %238 = vector.shape_cast %237 : vector<1x128xf32> to vector<128xf32>
    %c4_207 = arith.constant 4 : index
    %c3_208 = arith.constant 3 : index
    %c0_209 = arith.constant 0 : index
    %c0_210 = arith.constant 0 : index
    %239 = vector.load %arg8[%c4_207, %c3_208, %c0_209, %c0_210] : memref<5x12x8x128xf32, #tpu.memory_space<vmem>>, vector<1x8x8x128xf32>
    %240 = vector.shape_cast %239 : vector<1x8x8x128xf32> to vector<8x8x128xf32>
    %241 = vector.shape_cast %238 : vector<128xf32> to vector<1x1x128xf32>
    %242 = vector.broadcast %241 : vector<1x1x128xf32> to vector<8x8x128xf32>
    %243 = arith.mulf %240, %242 : vector<8x8x128xf32>
    %244 = arith.addf %236, %243 : vector<8x8x128xf32>
    %c20 = arith.constant 20 : index
    %c0_211 = arith.constant 0 : index
    %245 = vector.load %arg5[%c20, %c0_211] : memref<25x128xf32, #tpu.memory_space<vmem>>, vector<1x128xf32>
    %246 = vector.shape_cast %245 : vector<1x128xf32> to vector<128xf32>
    %c0_212 = arith.constant 0 : index
    %c4_213 = arith.constant 4 : index
    %c0_214 = arith.constant 0 : index
    %c0_215 = arith.constant 0 : index
    %247 = vector.load %arg8[%c0_212, %c4_213, %c0_214, %c0_215] : memref<5x12x8x128xf32, #tpu.memory_space<vmem>>, vector<1x8x8x128xf32>
    %248 = vector.shape_cast %247 : vector<1x8x8x128xf32> to vector<8x8x128xf32>
    %249 = vector.shape_cast %246 : vector<128xf32> to vector<1x1x128xf32>
    %250 = vector.broadcast %249 : vector<1x1x128xf32> to vector<8x8x128xf32>
    %251 = arith.mulf %248, %250 : vector<8x8x128xf32>
    %252 = arith.addf %244, %251 : vector<8x8x128xf32>
    %c21 = arith.constant 21 : index
    %c0_216 = arith.constant 0 : index
    %253 = vector.load %arg5[%c21, %c0_216] : memref<25x128xf32, #tpu.memory_space<vmem>>, vector<1x128xf32>
    %254 = vector.shape_cast %253 : vector<1x128xf32> to vector<128xf32>
    %c1_217 = arith.constant 1 : index
    %c4_218 = arith.constant 4 : index
    %c0_219 = arith.constant 0 : index
    %c0_220 = arith.constant 0 : index
    %255 = vector.load %arg8[%c1_217, %c4_218, %c0_219, %c0_220] : memref<5x12x8x128xf32, #tpu.memory_space<vmem>>, vector<1x8x8x128xf32>
    %256 = vector.shape_cast %255 : vector<1x8x8x128xf32> to vector<8x8x128xf32>
    %257 = vector.shape_cast %254 : vector<128xf32> to vector<1x1x128xf32>
    %258 = vector.broadcast %257 : vector<1x1x128xf32> to vector<8x8x128xf32>
    %259 = arith.mulf %256, %258 : vector<8x8x128xf32>
    %260 = arith.addf %252, %259 : vector<8x8x128xf32>
    %c22 = arith.constant 22 : index
    %c0_221 = arith.constant 0 : index
    %261 = vector.load %arg5[%c22, %c0_221] : memref<25x128xf32, #tpu.memory_space<vmem>>, vector<1x128xf32>
    %262 = vector.shape_cast %261 : vector<1x128xf32> to vector<128xf32>
    %c2_222 = arith.constant 2 : index
    %c4_223 = arith.constant 4 : index
    %c0_224 = arith.constant 0 : index
    %c0_225 = arith.constant 0 : index
    %263 = vector.load %arg8[%c2_222, %c4_223, %c0_224, %c0_225] : memref<5x12x8x128xf32, #tpu.memory_space<vmem>>, vector<1x8x8x128xf32>
    %264 = vector.shape_cast %263 : vector<1x8x8x128xf32> to vector<8x8x128xf32>
    %265 = vector.shape_cast %262 : vector<128xf32> to vector<1x1x128xf32>
    %266 = vector.broadcast %265 : vector<1x1x128xf32> to vector<8x8x128xf32>
    %267 = arith.mulf %264, %266 : vector<8x8x128xf32>
    %268 = arith.addf %260, %267 : vector<8x8x128xf32>
    %c23 = arith.constant 23 : index
    %c0_226 = arith.constant 0 : index
    %269 = vector.load %arg5[%c23, %c0_226] : memref<25x128xf32, #tpu.memory_space<vmem>>, vector<1x128xf32>
    %270 = vector.shape_cast %269 : vector<1x128xf32> to vector<128xf32>
    %c3_227 = arith.constant 3 : index
    %c4_228 = arith.constant 4 : index
    %c0_229 = arith.constant 0 : index
    %c0_230 = arith.constant 0 : index
    %271 = vector.load %arg8[%c3_227, %c4_228, %c0_229, %c0_230] : memref<5x12x8x128xf32, #tpu.memory_space<vmem>>, vector<1x8x8x128xf32>
    %272 = vector.shape_cast %271 : vector<1x8x8x128xf32> to vector<8x8x128xf32>
    %273 = vector.shape_cast %270 : vector<128xf32> to vector<1x1x128xf32>
    %274 = vector.broadcast %273 : vector<1x1x128xf32> to vector<8x8x128xf32>
    %275 = arith.mulf %272, %274 : vector<8x8x128xf32>
    %276 = arith.addf %268, %275 : vector<8x8x128xf32>
    %c24 = arith.constant 24 : index
    %c0_231 = arith.constant 0 : index
    %277 = vector.load %arg5[%c24, %c0_231] : memref<25x128xf32, #tpu.memory_space<vmem>>, vector<1x128xf32>
    %278 = vector.shape_cast %277 : vector<1x128xf32> to vector<128xf32>
    %c4_232 = arith.constant 4 : index
    %c4_233 = arith.constant 4 : index
    %c0_234 = arith.constant 0 : index
    %c0_235 = arith.constant 0 : index
    %279 = vector.load %arg8[%c4_232, %c4_233, %c0_234, %c0_235] : memref<5x12x8x128xf32, #tpu.memory_space<vmem>>, vector<1x8x8x128xf32>
    %280 = vector.shape_cast %279 : vector<1x8x8x128xf32> to vector<8x8x128xf32>
    %281 = vector.shape_cast %278 : vector<128xf32> to vector<1x1x128xf32>
    %282 = vector.broadcast %281 : vector<1x1x128xf32> to vector<8x8x128xf32>
    %283 = arith.mulf %280, %282 : vector<8x8x128xf32>
    %284 = arith.addf %276, %283 : vector<8x8x128xf32>
    %c0_236 = arith.constant 0 : index
    %c0_237 = arith.constant 0 : index
    %c0_238 = arith.constant 0 : index
    %c0_239 = arith.constant 0 : index
    %285 = vector.load %arg3[%c0_236, %c0_237, %c0_238, %c0_239] : memref<2x8x8x128xf32, #tpu.memory_space<vmem>>, vector<1x8x8x128xf32>
    %286 = vector.shape_cast %285 : vector<1x8x8x128xf32> to vector<8x8x128xf32>
    %287 = arith.mulf %286, %284 : vector<8x8x128xf32>
    %c0_240 = arith.constant 0 : index
    %c0_241 = arith.constant 0 : index
    %c0_242 = arith.constant 0 : index
    %c0_243 = arith.constant 0 : index
    %288 = vector.load %arg7[%c0_240, %c0_241, %c0_242, %c0_243] : memref<2x8x8x128xf32, #tpu.memory_space<vmem>>, vector<1x8x8x128xf32>
    %289 = vector.shape_cast %288 : vector<1x8x8x128xf32> to vector<8x8x128xf32>
    %290 = vector.shape_cast %287 : vector<8x8x128xf32> to vector<1x8x8x128xf32>
    tpu.vector_store %arg7[%c0_240, %c0_241, %c0_242, %c0_243], %290 {strides = array<i32>} : memref<2x8x8x128xf32, #tpu.memory_space<vmem>>, vector<1x8x8x128xf32>,
    %cst_244 = arith.constant 0.000000e+00 : f32
    %291 = vector.broadcast %cst_244 : f32 to vector<2x8x128xf32>
    %c0_245 = arith.constant 0 : index
    %c0_246 = arith.constant 0 : index
    %c0_247 = arith.constant 0 : index
    %c0_248 = arith.constant 0 : index
    %292 = vector.load %arg8[%c0_245, %c0_246, %c0_247, %c0_248] : memref<5x12x8x128xf32, #tpu.memory_space<vmem>>, vector<1x2x8x128xf32>
    %293 = vector.shape_cast %292 : vector<1x2x8x128xf32> to vector<2x8x128xf32>
    %294 = vector.shape_cast %291 : vector<2x8x128xf32> to vector<1x2x8x128xf32>
    tpu.vector_store %arg8[%c0_245, %c0_246, %c0_247, %c0_248], %294 {strides = array<i32>} : memref<5x12x8x128xf32, #tpu.memory_space<vmem>>, vector<1x2x8x128xf32>,
    %cst_249 = arith.constant 0.000000e+00 : f32
    %295 = vector.broadcast %cst_249 : f32 to vector<2x8x128xf32>
    %c0_250 = arith.constant 0 : index
    %c10_251 = arith.constant 10 : index
    %c0_252 = arith.constant 0 : index
    %c0_253 = arith.constant 0 : index
    %296 = vector.load %arg8[%c0_250, %c10_251, %c0_252, %c0_253] : memref<5x12x8x128xf32, #tpu.memory_space<vmem>>, vector<1x2x8x128xf32>
    %297 = vector.shape_cast %296 : vector<1x2x8x128xf32> to vector<2x8x128xf32>
    %298 = vector.shape_cast %295 : vector<2x8x128xf32> to vector<1x2x8x128xf32>
    tpu.vector_store %arg8[%c0_250, %c10_251, %c0_252, %c0_253], %298 {strides = array<i32>} : memref<5x12x8x128xf32, #tpu.memory_space<vmem>>, vector<1x2x8x128xf32>,
    %cst_254 = arith.constant 0.000000e+00 : f32
    %299 = vector.broadcast %cst_254 : f32 to vector<8x2x128xf32>
    %c0_255 = arith.constant 0 : index
    %c2_256 = arith.constant 2 : index
    %c0_257 = arith.constant 0 : index
    %c0_258 = arith.constant 0 : index
    %300 = vector.load %arg8[%c0_255, %c2_256, %c0_257, %c0_258] : memref<5x12x8x128xf32, #tpu.memory_space<vmem>>, vector<1x8x2x128xf32>
    %301 = vector.shape_cast %300 : vector<1x8x2x128xf32> to vector<8x2x128xf32>
    %302 = vector.shape_cast %299 : vector<8x2x128xf32> to vector<1x8x2x128xf32>
    tpu.vector_store %arg8[%c0_255, %c2_256, %c0_257, %c0_258], %302 {strides = array<i32>} : memref<5x12x8x128xf32, #tpu.memory_space<vmem>>, vector<1x8x2x128xf32>,
    %c1_259 = arith.constant 1 : index
    %c0_260 = arith.constant 0 : index
    %c0_261 = arith.constant 0 : index
    %c0_262 = arith.constant 0 : index
    %303 = vector.load %arg4[%c1_259, %c0_260, %c0_261, %c0_262] : memref<2x8x8x128xf32, #tpu.memory_space<vmem>>, vector<1x8x6x128xf32>
    %304 = vector.shape_cast %303 : vector<1x8x6x128xf32> to vector<8x6x128xf32>
    %c0_263 = arith.constant 0 : index
    %c2_264 = arith.constant 2 : index
    %c2_265 = arith.constant 2 : index
    %c0_266 = arith.constant 0 : index
    %305 = vector.load %arg8[%c0_263, %c2_264, %c2_265, %c0_266] : memref<5x12x8x128xf32, #tpu.memory_space<vmem>>, vector<1x8x6x128xf32>
    %306 = vector.shape_cast %305 : vector<1x8x6x128xf32> to vector<8x6x128xf32>
    %307 = vector.shape_cast %304 : vector<8x6x128xf32> to vector<1x8x6x128xf32>
    tpu.vector_store %arg8[%c0_263, %c2_264, %c2_265, %c0_266], %307 {strides = array<i32>} : memref<5x12x8x128xf32, #tpu.memory_space<vmem>>, vector<1x8x6x128xf32>,
    %cst_267 = arith.constant 0.000000e+00 : f32
    %308 = vector.broadcast %cst_267 : f32 to vector<2x8x128xf32>
    %c1_268 = arith.constant 1 : index
    %c0_269 = arith.constant 0 : index
    %c0_270 = arith.constant 0 : index
    %c0_271 = arith.constant 0 : index
    %309 = vector.load %arg8[%c1_268, %c0_269, %c0_270, %c0_271] : memref<5x12x8x128xf32, #tpu.memory_space<vmem>>, vector<1x2x8x128xf32>
    %310 = vector.shape_cast %309 : vector<1x2x8x128xf32> to vector<2x8x128xf32>
    %311 = vector.shape_cast %308 : vector<2x8x128xf32> to vector<1x2x8x128xf32>
    tpu.vector_store %arg8[%c1_268, %c0_269, %c0_270, %c0_271], %311 {strides = array<i32>} : memref<5x12x8x128xf32, #tpu.memory_space<vmem>>, vector<1x2x8x128xf32>,
    %cst_272 = arith.constant 0.000000e+00 : f32
    %312 = vector.broadcast %cst_272 : f32 to vector<2x8x128xf32>
    %c1_273 = arith.constant 1 : index
    %c10_274 = arith.constant 10 : index
    %c0_275 = arith.constant 0 : index
    %c0_276 = arith.constant 0 : index
    %313 = vector.load %arg8[%c1_273, %c10_274, %c0_275, %c0_276] : memref<5x12x8x128xf32, #tpu.memory_space<vmem>>, vector<1x2x8x128xf32>
    %314 = vector.shape_cast %313 : vector<1x2x8x128xf32> to vector<2x8x128xf32>
    %315 = vector.shape_cast %312 : vector<2x8x128xf32> to vector<1x2x8x128xf32>
    tpu.vector_store %arg8[%c1_273, %c10_274, %c0_275, %c0_276], %315 {strides = array<i32>} : memref<5x12x8x128xf32, #tpu.memory_space<vmem>>, vector<1x2x8x128xf32>,
    %cst_277 = arith.constant 0.000000e+00 : f32
    %316 = vector.broadcast %cst_277 : f32 to vector<8x1x128xf32>
    %c1_278 = arith.constant 1 : index
    %c2_279 = arith.constant 2 : index
    %c0_280 = arith.constant 0 : index
    %c0_281 = arith.constant 0 : index
    %317 = vector.load %arg8[%c1_278, %c2_279, %c0_280, %c0_281] : memref<5x12x8x128xf32, #tpu.memory_space<vmem>>, vector<1x8x1x128xf32>
    %318 = vector.shape_cast %317 : vector<1x8x1x128xf32> to vector<8x1x128xf32>
    %319 = vector.shape_cast %316 : vector<8x1x128xf32> to vector<1x8x1x128xf32>
    tpu.vector_store %arg8[%c1_278, %c2_279, %c0_280, %c0_281], %319 {strides = array<i32>} : memref<5x12x8x128xf32, #tpu.memory_space<vmem>>, vector<1x8x1x128xf32>,
    %c1_282 = arith.constant 1 : index
    %c0_283 = arith.constant 0 : index
    %c0_284 = arith.constant 0 : index
    %c0_285 = arith.constant 0 : index
    %320 = vector.load %arg4[%c1_282, %c0_283, %c0_284, %c0_285] : memref<2x8x8x128xf32, #tpu.memory_space<vmem>>, vector<1x8x7x128xf32>
    %321 = vector.shape_cast %320 : vector<1x8x7x128xf32> to vector<8x7x128xf32>
    %c1_286 = arith.constant 1 : index
    %c2_287 = arith.constant 2 : index
    %c1_288 = arith.constant 1 : index
    %c0_289 = arith.constant 0 : index
    %322 = vector.load %arg8[%c1_286, %c2_287, %c1_288, %c0_289] : memref<5x12x8x128xf32, #tpu.memory_space<vmem>>, vector<1x8x7x128xf32>
    %323 = vector.shape_cast %322 : vector<1x8x7x128xf32> to vector<8x7x128xf32>
    %324 = vector.shape_cast %321 : vector<8x7x128xf32> to vector<1x8x7x128xf32>
    tpu.vector_store %arg8[%c1_286, %c2_287, %c1_288, %c0_289], %324 {strides = array<i32>} : memref<5x12x8x128xf32, #tpu.memory_space<vmem>>, vector<1x8x7x128xf32>,
    %cst_290 = arith.constant 0.000000e+00 : f32
    %325 = vector.broadcast %cst_290 : f32 to vector<2x8x128xf32>
    %c2_291 = arith.constant 2 : index
    %c0_292 = arith.constant 0 : index
    %c0_293 = arith.constant 0 : index
    %c0_294 = arith.constant 0 : index
    %326 = vector.load %arg8[%c2_291, %c0_292, %c0_293, %c0_294] : memref<5x12x8x128xf32, #tpu.memory_space<vmem>>, vector<1x2x8x128xf32>
    %327 = vector.shape_cast %326 : vector<1x2x8x128xf32> to vector<2x8x128xf32>
    %328 = vector.shape_cast %325 : vector<2x8x128xf32> to vector<1x2x8x128xf32>
    tpu.vector_store %arg8[%c2_291, %c0_292, %c0_293, %c0_294], %328 {strides = array<i32>} : memref<5x12x8x128xf32, #tpu.memory_space<vmem>>, vector<1x2x8x128xf32>,
    %cst_295 = arith.constant 0.000000e+00 : f32
    %329 = vector.broadcast %cst_295 : f32 to vector<2x8x128xf32>
    %c2_296 = arith.constant 2 : index
    %c10_297 = arith.constant 10 : index
    %c0_298 = arith.constant 0 : index
    %c0_299 = arith.constant 0 : index
    %330 = vector.load %arg8[%c2_296, %c10_297, %c0_298, %c0_299] : memref<5x12x8x128xf32, #tpu.memory_space<vmem>>, vector<1x2x8x128xf32>
    %331 = vector.shape_cast %330 : vector<1x2x8x128xf32> to vector<2x8x128xf32>
    %332 = vector.shape_cast %329 : vector<2x8x128xf32> to vector<1x2x8x128xf32>
    tpu.vector_store %arg8[%c2_296, %c10_297, %c0_298, %c0_299], %332 {strides = array<i32>} : memref<5x12x8x128xf32, #tpu.memory_space<vmem>>, vector<1x2x8x128xf32>,
    %c1_300 = arith.constant 1 : index
    %c0_301 = arith.constant 0 : index
    %c0_302 = arith.constant 0 : index
    %c0_303 = arith.constant 0 : index
    %333 = vector.load %arg4[%c1_300, %c0_301, %c0_302, %c0_303] : memref<2x8x8x128xf32, #tpu.memory_space<vmem>>, vector<1x8x8x128xf32>
    %334 = vector.shape_cast %333 : vector<1x8x8x128xf32> to vector<8x8x128xf32>
    %c2_304 = arith.constant 2 : index
    %c2_305 = arith.constant 2 : index
    %c0_306 = arith.constant 0 : index
    %c0_307 = arith.constant 0 : index
    %335 = vector.load %arg8[%c2_304, %c2_305, %c0_306, %c0_307] : memref<5x12x8x128xf32, #tpu.memory_space<vmem>>, vector<1x8x8x128xf32>
    %336 = vector.shape_cast %335 : vector<1x8x8x128xf32> to vector<8x8x128xf32>
    %337 = vector.shape_cast %334 : vector<8x8x128xf32> to vector<1x8x8x128xf32>
    tpu.vector_store %arg8[%c2_304, %c2_305, %c0_306, %c0_307], %337 {strides = array<i32>} : memref<5x12x8x128xf32, #tpu.memory_space<vmem>>, vector<1x8x8x128xf32>,
    %cst_308 = arith.constant 0.000000e+00 : f32
    %338 = vector.broadcast %cst_308 : f32 to vector<2x8x128xf32>
    %c3_309 = arith.constant 3 : index
    %c0_310 = arith.constant 0 : index
    %c0_311 = arith.constant 0 : index
    %c0_312 = arith.constant 0 : index
    %339 = vector.load %arg8[%c3_309, %c0_310, %c0_311, %c0_312] : memref<5x12x8x128xf32, #tpu.memory_space<vmem>>, vector<1x2x8x128xf32>
    %340 = vector.shape_cast %339 : vector<1x2x8x128xf32> to vector<2x8x128xf32>
    %341 = vector.shape_cast %338 : vector<2x8x128xf32> to vector<1x2x8x128xf32>
    tpu.vector_store %arg8[%c3_309, %c0_310, %c0_311, %c0_312], %341 {strides = array<i32>} : memref<5x12x8x128xf32, #tpu.memory_space<vmem>>, vector<1x2x8x128xf32>,
    %cst_313 = arith.constant 0.000000e+00 : f32
    %342 = vector.broadcast %cst_313 : f32 to vector<2x8x128xf32>
    %c3_314 = arith.constant 3 : index
    %c10_315 = arith.constant 10 : index
    %c0_316 = arith.constant 0 : index
    %c0_317 = arith.constant 0 : index
    %343 = vector.load %arg8[%c3_314, %c10_315, %c0_316, %c0_317] : memref<5x12x8x128xf32, #tpu.memory_space<vmem>>, vector<1x2x8x128xf32>
    %344 = vector.shape_cast %343 : vector<1x2x8x128xf32> to vector<2x8x128xf32>
    %345 = vector.shape_cast %342 : vector<2x8x128xf32> to vector<1x2x8x128xf32>
    tpu.vector_store %arg8[%c3_314, %c10_315, %c0_316, %c0_317], %345 {strides = array<i32>} : memref<5x12x8x128xf32, #tpu.memory_space<vmem>>, vector<1x2x8x128xf32>,
    %cst_318 = arith.constant 0.000000e+00 : f32
    %346 = vector.broadcast %cst_318 : f32 to vector<8x1x128xf32>
    %c3_319 = arith.constant 3 : index
    %c2_320 = arith.constant 2 : index
    %c7_321 = arith.constant 7 : index
    %c0_322 = arith.constant 0 : index
    %347 = vector.load %arg8[%c3_319, %c2_320, %c7_321, %c0_322] : memref<5x12x8x128xf32, #tpu.memory_space<vmem>>, vector<1x8x1x128xf32>
    %348 = vector.shape_cast %347 : vector<1x8x1x128xf32> to vector<8x1x128xf32>
    %349 = vector.shape_cast %346 : vector<8x1x128xf32> to vector<1x8x1x128xf32>
    tpu.vector_store %arg8[%c3_319, %c2_320, %c7_321, %c0_322], %349 {strides = array<i32>} : memref<5x12x8x128xf32, #tpu.memory_space<vmem>>, vector<1x8x1x128xf32>,
    %c1_323 = arith.constant 1 : index
    %c0_324 = arith.constant 0 : index
    %c1_325 = arith.constant 1 : index
    %c0_326 = arith.constant 0 : index
    %350 = vector.load %arg4[%c1_323, %c0_324, %c1_325, %c0_326] : memref<2x8x8x128xf32, #tpu.memory_space<vmem>>, vector<1x8x7x128xf32>
    %351 = vector.shape_cast %350 : vector<1x8x7x128xf32> to vector<8x7x128xf32>
    %c3_327 = arith.constant 3 : index
    %c2_328 = arith.constant 2 : index
    %c0_329 = arith.constant 0 : index
    %c0_330 = arith.constant 0 : index
    %352 = vector.load %arg8[%c3_327, %c2_328, %c0_329, %c0_330] : memref<5x12x8x128xf32, #tpu.memory_space<vmem>>, vector<1x8x7x128xf32>
    %353 = vector.shape_cast %352 : vector<1x8x7x128xf32> to vector<8x7x128xf32>
    %354 = vector.shape_cast %351 : vector<8x7x128xf32> to vector<1x8x7x128xf32>
    tpu.vector_store %arg8[%c3_327, %c2_328, %c0_329, %c0_330], %354 {strides = array<i32>} : memref<5x12x8x128xf32, #tpu.memory_space<vmem>>, vector<1x8x7x128xf32>,
    %cst_331 = arith.constant 0.000000e+00 : f32
    %355 = vector.broadcast %cst_331 : f32 to vector<2x8x128xf32>
    %c4_332 = arith.constant 4 : index
    %c0_333 = arith.constant 0 : index
    %c0_334 = arith.constant 0 : index
    %c0_335 = arith.constant 0 : index
    %356 = vector.load %arg8[%c4_332, %c0_333, %c0_334, %c0_335] : memref<5x12x8x128xf32, #tpu.memory_space<vmem>>, vector<1x2x8x128xf32>
    %357 = vector.shape_cast %356 : vector<1x2x8x128xf32> to vector<2x8x128xf32>
    %358 = vector.shape_cast %355 : vector<2x8x128xf32> to vector<1x2x8x128xf32>
    tpu.vector_store %arg8[%c4_332, %c0_333, %c0_334, %c0_335], %358 {strides = array<i32>} : memref<5x12x8x128xf32, #tpu.memory_space<vmem>>, vector<1x2x8x128xf32>,
    %cst_336 = arith.constant 0.000000e+00 : f32
    %359 = vector.broadcast %cst_336 : f32 to vector<2x8x128xf32>
    %c4_337 = arith.constant 4 : index
    %c10_338 = arith.constant 10 : index
    %c0_339 = arith.constant 0 : index
    %c0_340 = arith.constant 0 : index
    %360 = vector.load %arg8[%c4_337, %c10_338, %c0_339, %c0_340] : memref<5x12x8x128xf32, #tpu.memory_space<vmem>>, vector<1x2x8x128xf32>
    %361 = vector.shape_cast %360 : vector<1x2x8x128xf32> to vector<2x8x128xf32>
    %362 = vector.shape_cast %359 : vector<2x8x128xf32> to vector<1x2x8x128xf32>
    tpu.vector_store %arg8[%c4_337, %c10_338, %c0_339, %c0_340], %362 {strides = array<i32>} : memref<5x12x8x128xf32, #tpu.memory_space<vmem>>, vector<1x2x8x128xf32>,
    %cst_341 = arith.constant 0.000000e+00 : f32
    %363 = vector.broadcast %cst_341 : f32 to vector<8x2x128xf32>
    %c4_342 = arith.constant 4 : index
    %c2_343 = arith.constant 2 : index
    %c6_344 = arith.constant 6 : index
    %c0_345 = arith.constant 0 : index
    %364 = vector.load %arg8[%c4_342, %c2_343, %c6_344, %c0_345] : memref<5x12x8x128xf32, #tpu.memory_space<vmem>>, vector<1x8x2x128xf32>
    %365 = vector.shape_cast %364 : vector<1x8x2x128xf32> to vector<8x2x128xf32>
    %366 = vector.shape_cast %363 : vector<8x2x128xf32> to vector<1x8x2x128xf32>
    tpu.vector_store %arg8[%c4_342, %c2_343, %c6_344, %c0_345], %366 {strides = array<i32>} : memref<5x12x8x128xf32, #tpu.memory_space<vmem>>, vector<1x8x2x128xf32>,
    %c1_346 = arith.constant 1 : index
    %c0_347 = arith.constant 0 : index
    %c2_348 = arith.constant 2 : index
    %c0_349 = arith.constant 0 : index
    %367 = vector.load %arg4[%c1_346, %c0_347, %c2_348, %c0_349] : memref<2x8x8x128xf32, #tpu.memory_space<vmem>>, vector<1x8x6x128xf32>
    %368 = vector.shape_cast %367 : vector<1x8x6x128xf32> to vector<8x6x128xf32>
    %c4_350 = arith.constant 4 : index
    %c2_351 = arith.constant 2 : index
    %c0_352 = arith.constant 0 : index
    %c0_353 = arith.constant 0 : index
    %369 = vector.load %arg8[%c4_350, %c2_351, %c0_352, %c0_353] : memref<5x12x8x128xf32, #tpu.memory_space<vmem>>, vector<1x8x6x128xf32>
    %370 = vector.shape_cast %369 : vector<1x8x6x128xf32> to vector<8x6x128xf32>
    %371 = vector.shape_cast %368 : vector<8x6x128xf32> to vector<1x8x6x128xf32>
    tpu.vector_store %arg8[%c4_350, %c2_351, %c0_352, %c0_353], %371 {strides = array<i32>} : memref<5x12x8x128xf32, #tpu.memory_space<vmem>>, vector<1x8x6x128xf32>,
    %372 = vector.shape_cast %0 : vector<1x128xf32> to vector<1x1x128xf32>
    %373 = vector.shape_cast %372 : vector<1x1x128xf32> to vector<1x1x128xf32>
    %374 = vector.broadcast %373 : vector<1x1x128xf32> to vector<8x8x128xf32>
    %c0_354 = arith.constant 0 : index
    %c0_355 = arith.constant 0 : index
    %375 = vector.load %arg5[%c0_354, %c0_355] : memref<25x128xf32, #tpu.memory_space<vmem>>, vector<1x128xf32>
    %376 = vector.shape_cast %375 : vector<1x128xf32> to vector<128xf32>
    %c2_356 = arith.constant 2 : index
    %c2_357 = arith.constant 2 : index
    %c0_358 = arith.constant 0 : index
    %c0_359 = arith.constant 0 : index
    %377 = vector.load %arg8[%c2_356, %c2_357, %c0_358, %c0_359] : memref<5x12x8x128xf32, #tpu.memory_space<vmem>>, vector<1x8x8x128xf32>
    %378 = vector.shape_cast %377 : vector<1x8x8x128xf32> to vector<8x8x128xf32>
    %379 = vector.shape_cast %376 : vector<128xf32> to vector<1x1x128xf32>
    %380 = vector.broadcast %379 : vector<1x1x128xf32> to vector<8x8x128xf32>
    %381 = arith.mulf %378, %380 : vector<8x8x128xf32>
    %382 = arith.addf %374, %381 : vector<8x8x128xf32>
    %c1_360 = arith.constant 1 : index
    %c0_361 = arith.constant 0 : index
    %383 = vector.load %arg5[%c1_360, %c0_361] : memref<25x128xf32, #tpu.memory_space<vmem>>, vector<1x128xf32>
    %384 = vector.shape_cast %383 : vector<1x128xf32> to vector<128xf32>
    %c1_362 = arith.constant 1 : index
    %c1_363 = arith.constant 1 : index
    %c0_364 = arith.constant 0 : index
    %c0_365 = arith.constant 0 : index
    %385 = vector.load %arg8[%c1_362, %c1_363, %c0_364, %c0_365] : memref<5x12x8x128xf32, #tpu.memory_space<vmem>>, vector<1x8x8x128xf32>
    %386 = vector.shape_cast %385 : vector<1x8x8x128xf32> to vector<8x8x128xf32>
    %387 = vector.shape_cast %384 : vector<128xf32> to vector<1x1x128xf32>
    %388 = vector.broadcast %387 : vector<1x1x128xf32> to vector<8x8x128xf32>
    %389 = arith.mulf %386, %388 : vector<8x8x128xf32>
    %390 = arith.addf %382, %389 : vector<8x8x128xf32>
    %c2_366 = arith.constant 2 : index
    %c0_367 = arith.constant 0 : index
    %391 = vector.load %arg5[%c2_366, %c0_367] : memref<25x128xf32, #tpu.memory_space<vmem>>, vector<1x128xf32>
    %392 = vector.shape_cast %391 : vector<1x128xf32> to vector<128xf32>
    %c2_368 = arith.constant 2 : index
    %c1_369 = arith.constant 1 : index
    %c0_370 = arith.constant 0 : index
    %c0_371 = arith.constant 0 : index
    %393 = vector.load %arg8[%c2_368, %c1_369, %c0_370, %c0_371] : memref<5x12x8x128xf32, #tpu.memory_space<vmem>>, vector<1x8x8x128xf32>
    %394 = vector.shape_cast %393 : vector<1x8x8x128xf32> to vector<8x8x128xf32>
    %395 = vector.shape_cast %392 : vector<128xf32> to vector<1x1x128xf32>
    %396 = vector.broadcast %395 : vector<1x1x128xf32> to vector<8x8x128xf32>
    %397 = arith.mulf %394, %396 : vector<8x8x128xf32>
    %398 = arith.addf %390, %397 : vector<8x8x128xf32>
    %c3_372 = arith.constant 3 : index
    %c0_373 = arith.constant 0 : index
    %399 = vector.load %arg5[%c3_372, %c0_373] : memref<25x128xf32, #tpu.memory_space<vmem>>, vector<1x128xf32>
    %400 = vector.shape_cast %399 : vector<1x128xf32> to vector<128xf32>
    %c3_374 = arith.constant 3 : index
    %c1_375 = arith.constant 1 : index
    %c0_376 = arith.constant 0 : index
    %c0_377 = arith.constant 0 : index
    %401 = vector.load %arg8[%c3_374, %c1_375, %c0_376, %c0_377] : memref<5x12x8x128xf32, #tpu.memory_space<vmem>>, vector<1x8x8x128xf32>
    %402 = vector.shape_cast %401 : vector<1x8x8x128xf32> to vector<8x8x128xf32>
    %403 = vector.shape_cast %400 : vector<128xf32> to vector<1x1x128xf32>
    %404 = vector.broadcast %403 : vector<1x1x128xf32> to vector<8x8x128xf32>
    %405 = arith.mulf %402, %404 : vector<8x8x128xf32>
    %406 = arith.addf %398, %405 : vector<8x8x128xf32>
    %c4_378 = arith.constant 4 : index
    %c0_379 = arith.constant 0 : index
    %407 = vector.load %arg5[%c4_378, %c0_379] : memref<25x128xf32, #tpu.memory_space<vmem>>, vector<1x128xf32>
    %408 = vector.shape_cast %407 : vector<1x128xf32> to vector<128xf32>
    %c1_380 = arith.constant 1 : index
    %c2_381 = arith.constant 2 : index
    %c0_382 = arith.constant 0 : index
    %c0_383 = arith.constant 0 : index
    %409 = vector.load %arg8[%c1_380, %c2_381, %c0_382, %c0_383] : memref<5x12x8x128xf32, #tpu.memory_space<vmem>>, vector<1x8x8x128xf32>
    %410 = vector.shape_cast %409 : vector<1x8x8x128xf32> to vector<8x8x128xf32>
    %411 = vector.shape_cast %408 : vector<128xf32> to vector<1x1x128xf32>
    %412 = vector.broadcast %411 : vector<1x1x128xf32> to vector<8x8x128xf32>
    %413 = arith.mulf %410, %412 : vector<8x8x128xf32>
    %414 = arith.addf %406, %413 : vector<8x8x128xf32>
    %c5_384 = arith.constant 5 : index
    %c0_385 = arith.constant 0 : index
    %415 = vector.load %arg5[%c5_384, %c0_385] : memref<25x128xf32, #tpu.memory_space<vmem>>, vector<1x128xf32>
    %416 = vector.shape_cast %415 : vector<1x128xf32> to vector<128xf32>
    %c3_386 = arith.constant 3 : index
    %c2_387 = arith.constant 2 : index
    %c0_388 = arith.constant 0 : index
    %c0_389 = arith.constant 0 : index
    %417 = vector.load %arg8[%c3_386, %c2_387, %c0_388, %c0_389] : memref<5x12x8x128xf32, #tpu.memory_space<vmem>>, vector<1x8x8x128xf32>
    %418 = vector.shape_cast %417 : vector<1x8x8x128xf32> to vector<8x8x128xf32>
    %419 = vector.shape_cast %416 : vector<128xf32> to vector<1x1x128xf32>
    %420 = vector.broadcast %419 : vector<1x1x128xf32> to vector<8x8x128xf32>
    %421 = arith.mulf %418, %420 : vector<8x8x128xf32>
    %422 = arith.addf %414, %421 : vector<8x8x128xf32>
    %c6_390 = arith.constant 6 : index
    %c0_391 = arith.constant 0 : index
    %423 = vector.load %arg5[%c6_390, %c0_391] : memref<25x128xf32, #tpu.memory_space<vmem>>, vector<1x128xf32>
    %424 = vector.shape_cast %423 : vector<1x128xf32> to vector<128xf32>
    %c1_392 = arith.constant 1 : index
    %c3_393 = arith.constant 3 : index
    %c0_394 = arith.constant 0 : index
    %c0_395 = arith.constant 0 : index
    %425 = vector.load %arg8[%c1_392, %c3_393, %c0_394, %c0_395] : memref<5x12x8x128xf32, #tpu.memory_space<vmem>>, vector<1x8x8x128xf32>
    %426 = vector.shape_cast %425 : vector<1x8x8x128xf32> to vector<8x8x128xf32>
    %427 = vector.shape_cast %424 : vector<128xf32> to vector<1x1x128xf32>
    %428 = vector.broadcast %427 : vector<1x1x128xf32> to vector<8x8x128xf32>
    %429 = arith.mulf %426, %428 : vector<8x8x128xf32>
    %430 = arith.addf %422, %429 : vector<8x8x128xf32>
    %c7_396 = arith.constant 7 : index
    %c0_397 = arith.constant 0 : index
    %431 = vector.load %arg5[%c7_396, %c0_397] : memref<25x128xf32, #tpu.memory_space<vmem>>, vector<1x128xf32>
    %432 = vector.shape_cast %431 : vector<1x128xf32> to vector<128xf32>
    %c2_398 = arith.constant 2 : index
    %c3_399 = arith.constant 3 : index
    %c0_400 = arith.constant 0 : index
    %c0_401 = arith.constant 0 : index
    %433 = vector.load %arg8[%c2_398, %c3_399, %c0_400, %c0_401] : memref<5x12x8x128xf32, #tpu.memory_space<vmem>>, vector<1x8x8x128xf32>
    %434 = vector.shape_cast %433 : vector<1x8x8x128xf32> to vector<8x8x128xf32>
    %435 = vector.shape_cast %432 : vector<128xf32> to vector<1x1x128xf32>
    %436 = vector.broadcast %435 : vector<1x1x128xf32> to vector<8x8x128xf32>
    %437 = arith.mulf %434, %436 : vector<8x8x128xf32>
    %438 = arith.addf %430, %437 : vector<8x8x128xf32>
    %c8_402 = arith.constant 8 : index
    %c0_403 = arith.constant 0 : index
    %439 = vector.load %arg5[%c8_402, %c0_403] : memref<25x128xf32, #tpu.memory_space<vmem>>, vector<1x128xf32>
    %440 = vector.shape_cast %439 : vector<1x128xf32> to vector<128xf32>
    %c3_404 = arith.constant 3 : index
    %c3_405 = arith.constant 3 : index
    %c0_406 = arith.constant 0 : index
    %c0_407 = arith.constant 0 : index
    %441 = vector.load %arg8[%c3_404, %c3_405, %c0_406, %c0_407] : memref<5x12x8x128xf32, #tpu.memory_space<vmem>>, vector<1x8x8x128xf32>
    %442 = vector.shape_cast %441 : vector<1x8x8x128xf32> to vector<8x8x128xf32>
    %443 = vector.shape_cast %440 : vector<128xf32> to vector<1x1x128xf32>
    %444 = vector.broadcast %443 : vector<1x1x128xf32> to vector<8x8x128xf32>
    %445 = arith.mulf %442, %444 : vector<8x8x128xf32>
    %446 = arith.addf %438, %445 : vector<8x8x128xf32>
    %c9_408 = arith.constant 9 : index
    %c0_409 = arith.constant 0 : index
    %447 = vector.load %arg5[%c9_408, %c0_409] : memref<25x128xf32, #tpu.memory_space<vmem>>, vector<1x128xf32>
    %448 = vector.shape_cast %447 : vector<1x128xf32> to vector<128xf32>
    %c0_410 = arith.constant 0 : index
    %c0_411 = arith.constant 0 : index
    %c0_412 = arith.constant 0 : index
    %c0_413 = arith.constant 0 : index
    %449 = vector.load %arg8[%c0_410, %c0_411, %c0_412, %c0_413] : memref<5x12x8x128xf32, #tpu.memory_space<vmem>>, vector<1x8x8x128xf32>
    %450 = vector.shape_cast %449 : vector<1x8x8x128xf32> to vector<8x8x128xf32>
    %451 = vector.shape_cast %448 : vector<128xf32> to vector<1x1x128xf32>
    %452 = vector.broadcast %451 : vector<1x1x128xf32> to vector<8x8x128xf32>
    %453 = arith.mulf %450, %452 : vector<8x8x128xf32>
    %454 = arith.addf %446, %453 : vector<8x8x128xf32>
    %c10_414 = arith.constant 10 : index
    %c0_415 = arith.constant 0 : index
    %455 = vector.load %arg5[%c10_414, %c0_415] : memref<25x128xf32, #tpu.memory_space<vmem>>, vector<1x128xf32>
    %456 = vector.shape_cast %455 : vector<1x128xf32> to vector<128xf32>
    %c1_416 = arith.constant 1 : index
    %c0_417 = arith.constant 0 : index
    %c0_418 = arith.constant 0 : index
    %c0_419 = arith.constant 0 : index
    %457 = vector.load %arg8[%c1_416, %c0_417, %c0_418, %c0_419] : memref<5x12x8x128xf32, #tpu.memory_space<vmem>>, vector<1x8x8x128xf32>
    %458 = vector.shape_cast %457 : vector<1x8x8x128xf32> to vector<8x8x128xf32>
    %459 = vector.shape_cast %456 : vector<128xf32> to vector<1x1x128xf32>
    %460 = vector.broadcast %459 : vector<1x1x128xf32> to vector<8x8x128xf32>
    %461 = arith.mulf %458, %460 : vector<8x8x128xf32>
    %462 = arith.addf %454, %461 : vector<8x8x128xf32>
    %c11_420 = arith.constant 11 : index
    %c0_421 = arith.constant 0 : index
    %463 = vector.load %arg5[%c11_420, %c0_421] : memref<25x128xf32, #tpu.memory_space<vmem>>, vector<1x128xf32>
    %464 = vector.shape_cast %463 : vector<1x128xf32> to vector<128xf32>
    %c2_422 = arith.constant 2 : index
    %c0_423 = arith.constant 0 : index
    %c0_424 = arith.constant 0 : index
    %c0_425 = arith.constant 0 : index
    %465 = vector.load %arg8[%c2_422, %c0_423, %c0_424, %c0_425] : memref<5x12x8x128xf32, #tpu.memory_space<vmem>>, vector<1x8x8x128xf32>
    %466 = vector.shape_cast %465 : vector<1x8x8x128xf32> to vector<8x8x128xf32>
    %467 = vector.shape_cast %464 : vector<128xf32> to vector<1x1x128xf32>
    %468 = vector.broadcast %467 : vector<1x1x128xf32> to vector<8x8x128xf32>
    %469 = arith.mulf %466, %468 : vector<8x8x128xf32>
    %470 = arith.addf %462, %469 : vector<8x8x128xf32>
    %c12_426 = arith.constant 12 : index
    %c0_427 = arith.constant 0 : index
    %471 = vector.load %arg5[%c12_426, %c0_427] : memref<25x128xf32, #tpu.memory_space<vmem>>, vector<1x128xf32>
    %472 = vector.shape_cast %471 : vector<1x128xf32> to vector<128xf32>
    %c3_428 = arith.constant 3 : index
    %c0_429 = arith.constant 0 : index
    %c0_430 = arith.constant 0 : index
    %c0_431 = arith.constant 0 : index
    %473 = vector.load %arg8[%c3_428, %c0_429, %c0_430, %c0_431] : memref<5x12x8x128xf32, #tpu.memory_space<vmem>>, vector<1x8x8x128xf32>
    %474 = vector.shape_cast %473 : vector<1x8x8x128xf32> to vector<8x8x128xf32>
    %475 = vector.shape_cast %472 : vector<128xf32> to vector<1x1x128xf32>
    %476 = vector.broadcast %475 : vector<1x1x128xf32> to vector<8x8x128xf32>
    %477 = arith.mulf %474, %476 : vector<8x8x128xf32>
    %478 = arith.addf %470, %477 : vector<8x8x128xf32>
    %c13_432 = arith.constant 13 : index
    %c0_433 = arith.constant 0 : index
    %479 = vector.load %arg5[%c13_432, %c0_433] : memref<25x128xf32, #tpu.memory_space<vmem>>, vector<1x128xf32>
    %480 = vector.shape_cast %479 : vector<1x128xf32> to vector<128xf32>
    %c4_434 = arith.constant 4 : index
    %c0_435 = arith.constant 0 : index
    %c0_436 = arith.constant 0 : index
    %c0_437 = arith.constant 0 : index
    %481 = vector.load %arg8[%c4_434, %c0_435, %c0_436, %c0_437] : memref<5x12x8x128xf32, #tpu.memory_space<vmem>>, vector<1x8x8x128xf32>
    %482 = vector.shape_cast %481 : vector<1x8x8x128xf32> to vector<8x8x128xf32>
    %483 = vector.shape_cast %480 : vector<128xf32> to vector<1x1x128xf32>
    %484 = vector.broadcast %483 : vector<1x1x128xf32> to vector<8x8x128xf32>
    %485 = arith.mulf %482, %484 : vector<8x8x128xf32>
    %486 = arith.addf %478, %485 : vector<8x8x128xf32>
    %c14_438 = arith.constant 14 : index
    %c0_439 = arith.constant 0 : index
    %487 = vector.load %arg5[%c14_438, %c0_439] : memref<25x128xf32, #tpu.memory_space<vmem>>, vector<1x128xf32>
    %488 = vector.shape_cast %487 : vector<1x128xf32> to vector<128xf32>
    %c0_440 = arith.constant 0 : index
    %c1_441 = arith.constant 1 : index
    %c0_442 = arith.constant 0 : index
    %c0_443 = arith.constant 0 : index
    %489 = vector.load %arg8[%c0_440, %c1_441, %c0_442, %c0_443] : memref<5x12x8x128xf32, #tpu.memory_space<vmem>>, vector<1x8x8x128xf32>
    %490 = vector.shape_cast %489 : vector<1x8x8x128xf32> to vector<8x8x128xf32>
    %491 = vector.shape_cast %488 : vector<128xf32> to vector<1x1x128xf32>
    %492 = vector.broadcast %491 : vector<1x1x128xf32> to vector<8x8x128xf32>
    %493 = arith.mulf %490, %492 : vector<8x8x128xf32>
    %494 = arith.addf %486, %493 : vector<8x8x128xf32>
    %c15_444 = arith.constant 15 : index
    %c0_445 = arith.constant 0 : index
    %495 = vector.load %arg5[%c15_444, %c0_445] : memref<25x128xf32, #tpu.memory_space<vmem>>, vector<1x128xf32>
    %496 = vector.shape_cast %495 : vector<1x128xf32> to vector<128xf32>
    %c4_446 = arith.constant 4 : index
    %c1_447 = arith.constant 1 : index
    %c0_448 = arith.constant 0 : index
    %c0_449 = arith.constant 0 : index
    %497 = vector.load %arg8[%c4_446, %c1_447, %c0_448, %c0_449] : memref<5x12x8x128xf32, #tpu.memory_space<vmem>>, vector<1x8x8x128xf32>
    %498 = vector.shape_cast %497 : vector<1x8x8x128xf32> to vector<8x8x128xf32>
    %499 = vector.shape_cast %496 : vector<128xf32> to vector<1x1x128xf32>
    %500 = vector.broadcast %499 : vector<1x1x128xf32> to vector<8x8x128xf32>
    %501 = arith.mulf %498, %500 : vector<8x8x128xf32>
    %502 = arith.addf %494, %501 : vector<8x8x128xf32>
    %c16_450 = arith.constant 16 : index
    %c0_451 = arith.constant 0 : index
    %503 = vector.load %arg5[%c16_450, %c0_451] : memref<25x128xf32, #tpu.memory_space<vmem>>, vector<1x128xf32>
    %504 = vector.shape_cast %503 : vector<1x128xf32> to vector<128xf32>
    %c0_452 = arith.constant 0 : index
    %c2_453 = arith.constant 2 : index
    %c0_454 = arith.constant 0 : index
    %c0_455 = arith.constant 0 : index
    %505 = vector.load %arg8[%c0_452, %c2_453, %c0_454, %c0_455] : memref<5x12x8x128xf32, #tpu.memory_space<vmem>>, vector<1x8x8x128xf32>
    %506 = vector.shape_cast %505 : vector<1x8x8x128xf32> to vector<8x8x128xf32>
    %507 = vector.shape_cast %504 : vector<128xf32> to vector<1x1x128xf32>
    %508 = vector.broadcast %507 : vector<1x1x128xf32> to vector<8x8x128xf32>
    %509 = arith.mulf %506, %508 : vector<8x8x128xf32>
    %510 = arith.addf %502, %509 : vector<8x8x128xf32>
    %c17_456 = arith.constant 17 : index
    %c0_457 = arith.constant 0 : index
    %511 = vector.load %arg5[%c17_456, %c0_457] : memref<25x128xf32, #tpu.memory_space<vmem>>, vector<1x128xf32>
    %512 = vector.shape_cast %511 : vector<1x128xf32> to vector<128xf32>
    %c4_458 = arith.constant 4 : index
    %c2_459 = arith.constant 2 : index
    %c0_460 = arith.constant 0 : index
    %c0_461 = arith.constant 0 : index
    %513 = vector.load %arg8[%c4_458, %c2_459, %c0_460, %c0_461] : memref<5x12x8x128xf32, #tpu.memory_space<vmem>>, vector<1x8x8x128xf32>
    %514 = vector.shape_cast %513 : vector<1x8x8x128xf32> to vector<8x8x128xf32>
    %515 = vector.shape_cast %512 : vector<128xf32> to vector<1x1x128xf32>
    %516 = vector.broadcast %515 : vector<1x1x128xf32> to vector<8x8x128xf32>
    %517 = arith.mulf %514, %516 : vector<8x8x128xf32>
    %518 = arith.addf %510, %517 : vector<8x8x128xf32>
    %c18_462 = arith.constant 18 : index
    %c0_463 = arith.constant 0 : index
    %519 = vector.load %arg5[%c18_462, %c0_463] : memref<25x128xf32, #tpu.memory_space<vmem>>, vector<1x128xf32>
    %520 = vector.shape_cast %519 : vector<1x128xf32> to vector<128xf32>
    %c0_464 = arith.constant 0 : index
    %c3_465 = arith.constant 3 : index
    %c0_466 = arith.constant 0 : index
    %c0_467 = arith.constant 0 : index
    %521 = vector.load %arg8[%c0_464, %c3_465, %c0_466, %c0_467] : memref<5x12x8x128xf32, #tpu.memory_space<vmem>>, vector<1x8x8x128xf32>
    %522 = vector.shape_cast %521 : vector<1x8x8x128xf32> to vector<8x8x128xf32>
    %523 = vector.shape_cast %520 : vector<128xf32> to vector<1x1x128xf32>
    %524 = vector.broadcast %523 : vector<1x1x128xf32> to vector<8x8x128xf32>
    %525 = arith.mulf %522, %524 : vector<8x8x128xf32>
    %526 = arith.addf %518, %525 : vector<8x8x128xf32>
    %c19_468 = arith.constant 19 : index
    %c0_469 = arith.constant 0 : index
    %527 = vector.load %arg5[%c19_468, %c0_469] : memref<25x128xf32, #tpu.memory_space<vmem>>, vector<1x128xf32>
    %528 = vector.shape_cast %527 : vector<1x128xf32> to vector<128xf32>
    %c4_470 = arith.constant 4 : index
    %c3_471 = arith.constant 3 : index
    %c0_472 = arith.constant 0 : index
    %c0_473 = arith.constant 0 : index
    %529 = vector.load %arg8[%c4_470, %c3_471, %c0_472, %c0_473] : memref<5x12x8x128xf32, #tpu.memory_space<vmem>>, vector<1x8x8x128xf32>
    %530 = vector.shape_cast %529 : vector<1x8x8x128xf32> to vector<8x8x128xf32>
    %531 = vector.shape_cast %528 : vector<128xf32> to vector<1x1x128xf32>
    %532 = vector.broadcast %531 : vector<1x1x128xf32> to vector<8x8x128xf32>
    %533 = arith.mulf %530, %532 : vector<8x8x128xf32>
    %534 = arith.addf %526, %533 : vector<8x8x128xf32>
    %c20_474 = arith.constant 20 : index
    %c0_475 = arith.constant 0 : index
    %535 = vector.load %arg5[%c20_474, %c0_475] : memref<25x128xf32, #tpu.memory_space<vmem>>, vector<1x128xf32>
    %536 = vector.shape_cast %535 : vector<1x128xf32> to vector<128xf32>
    %c0_476 = arith.constant 0 : index
    %c4_477 = arith.constant 4 : index
    %c0_478 = arith.constant 0 : index
    %c0_479 = arith.constant 0 : index
    %537 = vector.load %arg8[%c0_476, %c4_477, %c0_478, %c0_479] : memref<5x12x8x128xf32, #tpu.memory_space<vmem>>, vector<1x8x8x128xf32>
    %538 = vector.shape_cast %537 : vector<1x8x8x128xf32> to vector<8x8x128xf32>
    %539 = vector.shape_cast %536 : vector<128xf32> to vector<1x1x128xf32>
    %540 = vector.broadcast %539 : vector<1x1x128xf32> to vector<8x8x128xf32>
    %541 = arith.mulf %538, %540 : vector<8x8x128xf32>
    %542 = arith.addf %534, %541 : vector<8x8x128xf32>
    %c21_480 = arith.constant 21 : index
    %c0_481 = arith.constant 0 : index
    %543 = vector.load %arg5[%c21_480, %c0_481] : memref<25x128xf32, #tpu.memory_space<vmem>>, vector<1x128xf32>
    %544 = vector.shape_cast %543 : vector<1x128xf32> to vector<128xf32>
    %c1_482 = arith.constant 1 : index
    %c4_483 = arith.constant 4 : index
    %c0_484 = arith.constant 0 : index
    %c0_485 = arith.constant 0 : index
    %545 = vector.load %arg8[%c1_482, %c4_483, %c0_484, %c0_485] : memref<5x12x8x128xf32, #tpu.memory_space<vmem>>, vector<1x8x8x128xf32>
    %546 = vector.shape_cast %545 : vector<1x8x8x128xf32> to vector<8x8x128xf32>
    %547 = vector.shape_cast %544 : vector<128xf32> to vector<1x1x128xf32>
    %548 = vector.broadcast %547 : vector<1x1x128xf32> to vector<8x8x128xf32>
    %549 = arith.mulf %546, %548 : vector<8x8x128xf32>
    %550 = arith.addf %542, %549 : vector<8x8x128xf32>
    %c22_486 = arith.constant 22 : index
    %c0_487 = arith.constant 0 : index
    %551 = vector.load %arg5[%c22_486, %c0_487] : memref<25x128xf32, #tpu.memory_space<vmem>>, vector<1x128xf32>
    %552 = vector.shape_cast %551 : vector<1x128xf32> to vector<128xf32>
    %c2_488 = arith.constant 2 : index
    %c4_489 = arith.constant 4 : index
    %c0_490 = arith.constant 0 : index
    %c0_491 = arith.constant 0 : index
    %553 = vector.load %arg8[%c2_488, %c4_489, %c0_490, %c0_491] : memref<5x12x8x128xf32, #tpu.memory_space<vmem>>, vector<1x8x8x128xf32>
    %554 = vector.shape_cast %553 : vector<1x8x8x128xf32> to vector<8x8x128xf32>
    %555 = vector.shape_cast %552 : vector<128xf32> to vector<1x1x128xf32>
    %556 = vector.broadcast %555 : vector<1x1x128xf32> to vector<8x8x128xf32>
    %557 = arith.mulf %554, %556 : vector<8x8x128xf32>
    %558 = arith.addf %550, %557 : vector<8x8x128xf32>
    %c23_492 = arith.constant 23 : index
    %c0_493 = arith.constant 0 : index
    %559 = vector.load %arg5[%c23_492, %c0_493] : memref<25x128xf32, #tpu.memory_space<vmem>>, vector<1x128xf32>
    %560 = vector.shape_cast %559 : vector<1x128xf32> to vector<128xf32>
    %c3_494 = arith.constant 3 : index
    %c4_495 = arith.constant 4 : index
    %c0_496 = arith.constant 0 : index
    %c0_497 = arith.constant 0 : index
    %561 = vector.load %arg8[%c3_494, %c4_495, %c0_496, %c0_497] : memref<5x12x8x128xf32, #tpu.memory_space<vmem>>, vector<1x8x8x128xf32>
    %562 = vector.shape_cast %561 : vector<1x8x8x128xf32> to vector<8x8x128xf32>
    %563 = vector.shape_cast %560 : vector<128xf32> to vector<1x1x128xf32>
    %564 = vector.broadcast %563 : vector<1x1x128xf32> to vector<8x8x128xf32>
    %565 = arith.mulf %562, %564 : vector<8x8x128xf32>
    %566 = arith.addf %558, %565 : vector<8x8x128xf32>
    %c24_498 = arith.constant 24 : index
    %c0_499 = arith.constant 0 : index
    %567 = vector.load %arg5[%c24_498, %c0_499] : memref<25x128xf32, #tpu.memory_space<vmem>>, vector<1x128xf32>
    %568 = vector.shape_cast %567 : vector<1x128xf32> to vector<128xf32>
    %c4_500 = arith.constant 4 : index
    %c4_501 = arith.constant 4 : index
    %c0_502 = arith.constant 0 : index
    %c0_503 = arith.constant 0 : index
    %569 = vector.load %arg8[%c4_500, %c4_501, %c0_502, %c0_503] : memref<5x12x8x128xf32, #tpu.memory_space<vmem>>, vector<1x8x8x128xf32>
    %570 = vector.shape_cast %569 : vector<1x8x8x128xf32> to vector<8x8x128xf32>
    %571 = vector.shape_cast %568 : vector<128xf32> to vector<1x1x128xf32>
    %572 = vector.broadcast %571 : vector<1x1x128xf32> to vector<8x8x128xf32>
    %573 = arith.mulf %570, %572 : vector<8x8x128xf32>
    %574 = arith.addf %566, %573 : vector<8x8x128xf32>
    %c1_504 = arith.constant 1 : index
    %c0_505 = arith.constant 0 : index
    %c0_506 = arith.constant 0 : index
    %c0_507 = arith.constant 0 : index
    %575 = vector.load %arg3[%c1_504, %c0_505, %c0_506, %c0_507] : memref<2x8x8x128xf32, #tpu.memory_space<vmem>>, vector<1x8x8x128xf32>
    %576 = vector.shape_cast %575 : vector<1x8x8x128xf32> to vector<8x8x128xf32>
    %577 = arith.mulf %576, %574 : vector<8x8x128xf32>
    %c1_508 = arith.constant 1 : index
    %c0_509 = arith.constant 0 : index
    %c0_510 = arith.constant 0 : index
    %c0_511 = arith.constant 0 : index
    %578 = vector.load %arg7[%c1_508, %c0_509, %c0_510, %c0_511] : memref<2x8x8x128xf32, #tpu.memory_space<vmem>>, vector<1x8x8x128xf32>
    %579 = vector.shape_cast %578 : vector<1x8x8x128xf32> to vector<8x8x128xf32>
    %580 = vector.shape_cast %577 : vector<8x8x128xf32> to vector<1x8x8x128xf32>
    tpu.vector_store %arg7[%c1_508, %c0_509, %c0_510, %c0_511], %580 {strides = array<i32>} : memref<2x8x8x128xf32, #tpu.memory_space<vmem>>, vector<1x8x8x128xf32>,
    return
  }
  func.func @transform_0(%arg0: i32, %arg1: i32, %arg2: memref<1xi32, #tpu.memory_space<smem>>) -> (i32, i32, i32, i32) {
    %c0_i32 = arith.constant 0 : i32
    %c0_i32_0 = arith.constant 0 : i32
    %c0_i32_1 = arith.constant 0 : i32
    return %arg1, %c0_i32, %c0_i32_0, %arg0 : i32, i32, i32, i32
  }
  func.func @transform_1(%arg0: i32, %arg1: i32, %arg2: memref<1xi32, #tpu.memory_space<smem>>) -> (i32, i32, i32, i32) {
    %c0_i32 = arith.constant 0 : i32
    %c0_i32_0 = arith.constant 0 : i32
    %c0_i32_1 = arith.constant 0 : i32
    return %arg1, %c0_i32, %c0_i32_0, %arg0 : i32, i32, i32, i32
  }
  func.func @transform_2(%arg0: i32, %arg1: i32, %arg2: memref<1xi32, #tpu.memory_space<smem>>) -> (i32, i32) {
    %c0_i32 = arith.constant 0 : i32
    %c0_i32_0 = arith.constant 0 : i32
    return %c0_i32, %arg0 : i32, i32
  }
  func.func @transform_3(%arg0: i32, %arg1: i32, %arg2: memref<1xi32, #tpu.memory_space<smem>>) -> (i32, i32) {
    %c0_i32 = arith.constant 0 : i32
    %c0_i32_0 = arith.constant 0 : i32
    return %c0_i32, %arg0 : i32, i32
  }
  func.func @transform_4(%arg0: i32, %arg1: i32, %arg2: memref<1xi32, #tpu.memory_space<smem>>) -> (i32, i32, i32, i32) {
    %c0_i32 = arith.constant 0 : i32
    %c0_i32_0 = arith.constant 0 : i32
    %c0_i32_1 = arith.constant 0 : i32
    return %arg1, %c0_i32, %c0_i32_0, %arg0 : i32, i32, i32, i32
  }
}

</mosaic_0001>

<bundles_post_ra>
// kernel: tpu_custom_call.1
= control target key start
LH: loop header
LB: loop body
LE: loop exit
PB: predicated region body
PF: predicated region fallthrough
CT: control target
= control target key end

     0   :  { %11 = vsyncpa [#allocation6], 0  ;;  %s3599_s0 = inlined_call_operand.<no memory space> [shape: s32[1], index: 0, kind: input, shape index: {}]   ;;  %s3600_s1 = inlined_call_operand.hbm [shape: f32[2,8,8,128], index: 1, kind: input, shape index: {}]   ;;  %s3601_s2 = inlined_call_operand.hbm [shape: f32[2,8,8,128], index: 2, kind: input, shape index: {}]   ;;  %s3602_s3 = inlined_call_operand.hbm [shape: f32[25,128], index: 3, kind: input, shape index: {}]   ;;  %s3603_s4 = inlined_call_operand.vmem [shape: f32[1,128], index: 4, kind: input, shape index: {}]   ;;  %s3604_s5 = inlined_call_operand.hbm [shape: f32[2,8,8,128], index: 5, kind: output, shape index: {}]  }
   0x1   :  { %12 = vsyncpa [#allocation9], 0 }
   0x2   :  { %13 = vsyncpa [#allocation7], 0  ;;  %s2046_s18 = smov [#allocation8]   ;;  %s2047_s19 = smov [#allocation5]  }
   0x3   :  { %s31_s0 = sshll.u32 %s2046_s18, 4  ;;  %s19_s20 = sshll.u32 %s2047_s19, 4  ;;  %s32_s0 = int_to_ptr.vmem [resolvable:$true] %s31_s0  ;;  %s2083_s20 = int_to_ptr.vmem [resolvable:$true] %s19_s20 }
   0x4   :  { %s1952_s23 = scalar_lea.hbm %s3601_s2, 2048 }
   0x5   :  { %p1953_p0 = scmp.ne.s32.totalorder %s3601_s2, %s1952_s23  ;;  %p1956_p1 = scmp.lt.u32.totalorder %s1952_s23, %s3601_s2 }
   0x7   :  { %p1958_p2 = pnand %p1956_p1, %p1953_p0 }
   0x9   :  { %1961 = shalt.err (!%p1958_p2)
}
   0xa   :  { %s1962_s28 = scalar_lea.vmem %s32_s0, 2048  ;;  %p1967_p4 = scmp.lt.s32.totalorder %s32_s0, %s32_s0 }
   0xb   :  { %p1963_p3 = scmp.ne.s32.totalorder %s32_s0, %s1962_s28  ;;  %p1968_p5 = scmp.lt.s32.totalorder %s1962_s28, %s1962_s28 }
   0xd   :  { %p1969_p6 = por %p1968_p5, %p1967_p4 }
   0xf   :  { %p1970_p7 = pnand %p1969_p6, %p1963_p3 }
  0x11   :  { %1973 = shalt.err (!%p1970_p7)
}
  0x12   :  { %s2048_s29 = smov 128   ;;  %s2049_s30 = smov 8  }
  0x13   :  { %37 = dma.hbm_to_vmem [thread:$0]  %s3601_s2, 2048, %s32_s0, [#allocation9], %s2048_s29, %s2048_s29, %s2049_s30  }
  0x14   :  { %s1974_s10 = scalar_lea.hbm %s3600_s1, 2048 }
  0x15   :  { %p1975_p8 = scmp.ne.s32.totalorder %s3600_s1, %s1974_s10  ;;  %p1978_p9 = scmp.lt.u32.totalorder %s1974_s10, %s3600_s1 }
  0x17   :  { %p1980_p10 = pnand %p1978_p9, %p1975_p8 }
  0x19   :  { %1983 = shalt.err (!%p1980_p10)
}
  0x1a   :  { %s1984_s15 = scalar_lea.vmem %s2083_s20, 2048  ;;  %p1989_p12 = scmp.lt.s32.totalorder %s2083_s20, %s2083_s20 }
  0x1b   :  { %p1985_p11 = scmp.ne.s32.totalorder %s2083_s20, %s1984_s15  ;;  %p1990_p13 = scmp.lt.s32.totalorder %s1984_s15, %s1984_s15 }
  0x1d   :  { %p1991_p0 = por %p1990_p13, %p1989_p12 }
  0x1f   :  { %p1992_p1 = pnand %p1991_p0, %p1985_p11 }
  0x21   :  { %1995 = shalt.err (!%p1992_p1)
}
  0x22   :  { %25 = dma.hbm_to_vmem [thread:$0]  %s3600_s1, 2048, %s2083_s20, [#allocation6], %s2048_s29, %s2048_s29, %s2049_s30  }
  0x23   :  { %s2050_s17 = smov [#allocation10]   ;;  %s1996_s21 = scalar_lea.hbm %s3602_s3, 512 }
  0x24   :  { %s43_s18 = sshll.u32 %s2050_s17, 4  ;;  %p1997_p2 = scmp.ne.s32.totalorder %s3602_s3, %s1996_s21  ;;  %s44_s18 = int_to_ptr.vmem [resolvable:$true] %s43_s18 }
  0x25   :  { %p2000_p3 = scmp.lt.u32.totalorder %s1996_s21, %s3602_s3 }
  0x27   :  { %p2002_p4 = pnand %p2000_p3, %p1997_p2 }
  0x29   :  { %2005 = shalt.err (!%p2002_p4)
}
  0x2a   :  { %s2006_s26 = scalar_lea.vmem %s44_s18, 512  ;;  %p2011_p6 = scmp.lt.s32.totalorder %s44_s18, %s44_s18 }
  0x2b   :  { %p2007_p5 = scmp.ne.s32.totalorder %s44_s18, %s2006_s26  ;;  %p2012_p7 = scmp.lt.s32.totalorder %s2006_s26, %s2006_s26 }
  0x2d   :  { %p2013_p8 = por %p2012_p7, %p2011_p6 }
  0x2f   :  { %p2014_p9 = pnand %p2013_p8, %p2007_p5 }
  0x31   :  { %2017 = shalt.err (!%p2014_p9)
}
  0x32   :  { %49 = dma.hbm_to_vmem [thread:$0]  %s3602_s3, 512, %s44_s18, [#allocation9], %s2048_s29, %s2048_s29, %s2049_s30  }
  0x33   :  { %2040 = dma.done.wait [#allocation6], 2048  }
  0x34   :  { %2041 = vsyncadd [#allocation6], 4294965248 }
  0x35   :  { %2042 = dma.done.wait [#allocation9], 2560  }
  0x36   :  { %2043 = vsyncadd [#allocation9], 4294964736  ;;  %v3605_v0 = vmov 0.0   ;;  %v107_v1 = vld [vmem:[#allocation8] sm:$0x7f]  ;;  %v2168_v17 = vld [vmem:[#allocation8 + $0x8] sm:$0xff] }
  0x37   :  { %68 = vst [vmem:[#allocation2 + $0x10] sm:$0x3] %v3605_v0  ;;  %69 = vst [vmem:[#allocation2 + $0x18] sm:$0x3] %v3605_v0  ;;  %v108_v2 = vld [vmem:[#allocation8 + $0x8] sm:$0x7f] }
  0x38   :  { %70 = vst [vmem:[#allocation2 + $0x20] sm:$0x3] %v3605_v0  ;;  %71 = vst [vmem:[#allocation2 + $0x28] sm:$0x3] %v3605_v0  ;;  %v109_v3 = vld [vmem:[#allocation8 + $0x10] sm:$0x7f] }
  0x39   :  { %72 = vst [vmem:[#allocation2 + $0x30] sm:$0x3] %v3605_v0  ;;  %73 = vst [vmem:[#allocation2 + $0x38] sm:$0x3] %v3605_v0  ;;  %v110_v4 = vld [vmem:[#allocation8 + $0x18] sm:$0x7f] }
  0x3a   :  { %74 = vst [vmem:[#allocation2 + $0x40] sm:$0x3] %v3605_v0  ;;  %75 = vst [vmem:[#allocation2 + $0x48] sm:$0x3] %v3605_v0  ;;  %v111_v5 = vld [vmem:[#allocation8 + $0x20] sm:$0x7f] }
  0x3b   :  { %99 = vst [vmem:[#allocation2 + $0x70] sm:$0x1] %v3605_v0  ;;  %100 = vst [vmem:[#allocation2 + $0x78] sm:$0x1] %v3605_v0  ;;  %v112_v6 = vld [vmem:[#allocation8 + $0x28] sm:$0x7f] }
  0x3c   :  { %101 = vst [vmem:[#allocation2 + $0x80] sm:$0x1] %v3605_v0  ;;  %102 = vst [vmem:[#allocation2 + $0x88] sm:$0x1] %v3605_v0  ;;  %v113_v7 = vld [vmem:[#allocation8 + $0x30] sm:$0x7f] }
  0x3d   :  { %103 = vst [vmem:[#allocation2 + $0x90] sm:$0x1] %v3605_v0  ;;  %104 = vst [vmem:[#allocation2 + $0x98] sm:$0x1] %v3605_v0  ;;  %v161_v8 = vld [vmem:[#allocation8 + $0x1] sm:$0x7f] }
  0x3e   :  { %105 = vst [vmem:[#allocation2 + $0xa0] sm:$0x1] %v3605_v0  ;;  %106 = vst [vmem:[#allocation2 + $0xa8] sm:$0x1] %v3605_v0  ;;  %v162_v9 = vld [vmem:[#allocation8 + $0x9] sm:$0x7f] }
  0x3f   :  { %153 = vst [vmem:[#allocation2 + $0x137] sm:$0x1] %v3605_v0  ;;  %154 = vst [vmem:[#allocation2 + $0x13f] sm:$0x1] %v3605_v0  ;;  %v163_v10 = vld [vmem:[#allocation8 + $0x11] sm:$0x7f] }
  0x40   :  { %155 = vst [vmem:[#allocation2 + $0x147] sm:$0x1] %v3605_v0  ;;  %156 = vst [vmem:[#allocation2 + $0x14f] sm:$0x1] %v3605_v0  ;;  %v164_v11 = vld [vmem:[#allocation8 + $0x19] sm:$0x7f] }
  0x41   :  { %157 = vst [vmem:[#allocation2 + $0x157] sm:$0x1] %v3605_v0  ;;  %158 = vst [vmem:[#allocation2 + $0x15f] sm:$0x1] %v3605_v0  ;;  %v165_v12 = vld [vmem:[#allocation8 + $0x21] sm:$0x7f] }
  0x42   :  { %159 = vst [vmem:[#allocation2 + $0x167] sm:$0x1] %v3605_v0  ;;  %160 = vst [vmem:[#allocation2 + $0x16f] sm:$0x1] %v3605_v0  ;;  %v166_v13 = vld [vmem:[#allocation8 + $0x29] sm:$0x7f] }
  0x43   :  { %184 = vst [vmem:[#allocation2 + $0x196] sm:$0x3] %v3605_v0  ;;  %185 = vst [vmem:[#allocation2 + $0x19e] sm:$0x3] %v3605_v0  ;;  %v167_v14 = vld [vmem:[#allocation8 + $0x31] sm:$0x7f] }
  0x44   :  { %186 = vst [vmem:[#allocation2 + $0x1a6] sm:$0x3] %v3605_v0  ;;  %187 = vst [vmem:[#allocation2 + $0x1ae] sm:$0x3] %v3605_v0  ;;  %v114_v15 = vld [vmem:[#allocation8 + $0x38] sm:$0x7f] }
  0x45   :  { %188 = vst [vmem:[#allocation2 + $0x1b6] sm:$0x3] %v3605_v0  ;;  %189 = vst [vmem:[#allocation2 + $0x1be] sm:$0x3] %v3605_v0  ;;  %v129_v16 = vld [vmem:[#allocation8] sm:$0xff]  ;;  %v1040_v20 = vld [vmem:[#allocation8 + $0x48] sm:$0xff] }
  0x46   :  { %190 = vst [vmem:[#allocation2 + $0x1c6] sm:$0x3] %v3605_v0  ;;  %191 = vst [vmem:[#allocation2 + $0x1ce] sm:$0x3] %v3605_v0  ;;  %v2170_v18 = vld [vmem:[#allocation10] ss:$0 sm:$0xff] }
  0x47   :  { %1008 = vst [vmem:[#allocation2 + $0x68] sm:$0xff] %v3605_v0  ;;  %115 = vst [vmem:[#allocation2 + $0x71] sm:$0x7f] %v107_v1  ;;  %v1039_v19 = vld [vmem:[#allocation8 + $0x40] sm:$0xff]  ;;  %v1041_v21 = vld [vmem:[#allocation8 + $0x50] sm:$0xff]  ;;  %v2200_v33 = vmul.f32 %v2170_v18, %v129_v16  ;;  %v1125_v36 = vmul.f32 %v2170_v18, %v1040_v20  ;;  %v2220_v41 = vmul.f32 %v2170_v18, %v2168_v17 }
  0x48   :  { %116 = vst [vmem:[#allocation2 + $0x79] sm:$0x7f] %v108_v2  ;;  %117 = vst [vmem:[#allocation2 + $0x81] sm:$0x7f] %v109_v3  ;;  %v2172_v22 = vld [vmem:[#allocation8 + $0x58] sm:$0xff]  ;;  %v2174_v23 = vld [vmem:[#allocation8 + $0x60] sm:$0xff]  ;;  %v1124_v30 = vmul.f32 %v2170_v18, %v1039_v19  ;;  %v1126_v43 = vmul.f32 %v2170_v18, %v1041_v21 }
  0x49   :  { %118 = vst [vmem:[#allocation2 + $0x89] sm:$0x7f] %v110_v4  ;;  %119 = vst [vmem:[#allocation2 + $0x91] sm:$0x7f] %v111_v5  ;;  %v2176_v24 = vld [vmem:[#allocation8 + $0x10] sm:$0xff]  ;;  %v2180_v25 = vld [vmem:[#allocation8 + $0x68] sm:$0xff]  ;;  %v1128_v63 = vmul.f32 %v2170_v18, %v2174_v23 }
  0x4a   :  { %120 = vst [vmem:[#allocation2 + $0x99] sm:$0x7f] %v112_v6  ;;  %121 = vst [vmem:[#allocation2 + $0xa1] sm:$0x7f] %v113_v7  ;;  %v2182_v26 = vld [vmem:[#allocation8 + $0x70] sm:$0xff]  ;;  %v2184_v27 = vld [vmem:[#allocation8 + $0x78] sm:$0xff]  ;;  %v2258_v55 = vmul.f32 %v2170_v18, %v2176_v24  ;;  %v1127_v7 = vmul.f32 %v2170_v18, %v2172_v22 }
  0x4b   :  { %169 = vst [vmem:[#allocation2 + $0x130] sm:$0x7f] %v161_v8  ;;  %170 = vst [vmem:[#allocation2 + $0x138] sm:$0x7f] %v162_v9  ;;  %v2186_v28 = vld [vmem:[#allocation8 + $0x18] sm:$0xff]  ;;  %v133_v53 = vld [vmem:[#allocation8 + $0x20] sm:$0xff] }
  0x4c   :  { %171 = vst [vmem:[#allocation2 + $0x140] sm:$0x7f] %v163_v10  ;;  %172 = vst [vmem:[#allocation2 + $0x148] sm:$0x7f] %v164_v11  ;;  %v2188_v29 = vld [vmem:[#allocation10 + $0x2] ss:$0 sm:$0xff]  ;;  %v230_v57 = vmul.f32 %v2170_v18, %v2186_v28 }
  0x4d   :  { %173 = vst [vmem:[#allocation2 + $0x150] sm:$0x7f] %v165_v12  ;;  %174 = vst [vmem:[#allocation2 + $0x158] sm:$0x7f] %v166_v13  ;;  %v168_v31 = vld [vmem:[#allocation8 + $0x39] sm:$0x7f]  ;;  %v2203_v34 = vmul.f32 %v2188_v29, %v129_v16  ;;  %v2216_v40 = vmul.f32 %v2188_v29, %v1039_v19  ;;  %v2233_v46 = vmul.f32 %v2188_v29, %v2168_v17 }
  0x4e   :  { %175 = vst [vmem:[#allocation2 + $0x160] sm:$0x7f] %v167_v14  ;;  %122 = vst [vmem:[#allocation2 + $0xa9] sm:$0x7f] %v114_v15  ;;  %v2197_v32 = vld [vmem:[%s3603_s4] ss:$0 sm:$0xff]  ;;  %v2240_v48 = vmul.f32 %v2188_v29, %v1040_v20  ;;  %v2262_v56 = vmul.f32 %v2188_v29, %v2176_v24  ;;  %v2281_v62 = vmul.f32 %v2188_v29, %v1041_v21 }
  0x4f   :  { %3661 = vst [vmem:[#allocation15_spill] sm:$0xff] %v2168_v17  ;;  %1047 = vst [vmem:[#allocation2 + $0xd0] sm:$0xff] %v1039_v19  ;;  %v2205_v35 = vld [vmem:[#allocation10 + $0xb] ss:$0 sm:$0xff]  ;;  %v2208_v37 = vld [vmem:[#allocation2 + $0x70] sm:$0xff]  ;;  %v2254_v54 = vadd.f32 %v2197_v32, %v1124_v30  ;;  %v2274_v60 = vadd.f32 %v2197_v32, %v1125_v36  ;;  %v2289_v4 = vadd.f32 %v2197_v32, %v1126_v43  ;;  %s2052_s4 = smov [#allocation11]  }
  0x50   :  { %1048 = vst [vmem:[#allocation2 + $0xd8] sm:$0xff] %v1040_v20  ;;  %3662 = vst [vmem:[#allocation16_spill] sm:$0xff] %v2176_v24  ;;  %v2210_v38 = vld [vmem:[#allocation2 + $0x78] sm:$0xff]  ;;  %v2213_v39 = vmul.f32 %v2205_v35, %v129_v16  ;;  %v2222_v42 = vld [vmem:[#allocation10 + $0x7] ss:$0 sm:$0xff]  ;;  %v2237_v47 = vmul.f32 %v2205_v35, %v2168_v17  ;;  %v2278_v61 = vmul.f32 %v2205_v35, %v2176_v24  ;;  %s1867_s28 = sshll.u32 %s2052_s4, 4  ;;  %s1868_s28 = int_to_ptr.vmem [resolvable:$true] %s1867_s28 }
  0x51   :  { %1049 = vst [vmem:[#allocation2 + $0xe0] sm:$0xff] %v1041_v21  ;;  %1050 = vst [vmem:[#allocation2 + $0xe8] sm:$0xff] %v2172_v22  ;;  %v2227_v44 = vld [vmem:[#allocation2 + $0x80] sm:$0xff]  ;;  %v2229_v45 = vld [vmem:[#allocation2 + $0x88] sm:$0xff]  ;;  %v2243_v49 = vmul.f32 %v2222_v42, %v1040_v20  ;;  %v2292_v5 = vmul.f32 %v2222_v42, %v1041_v21  ;;  %v2296_v6 = vmul.f32 %v2188_v29, %v2186_v28  ;;  %s2018_s6 = scalar_lea.vmem %s1868_s28, 2048  ;;  %p2023_p11 = scmp.lt.s32.totalorder %s1868_s28, %s1868_s28 }
  0x52   :  { %1051 = vst [vmem:[#allocation2 + $0xf0] sm:$0xff] %v2174_v23  ;;  %1052 = vst [vmem:[#allocation2 + $0xf8] sm:$0xff] %v2180_v25  ;;  %v2247_v50 = vld [vmem:[#allocation2 + $0x90] sm:$0xff]  ;;  %v2249_v51 = vld [vmem:[#allocation2 + $0x98] sm:$0xff]  ;;  %v2305_v12 = vmul.f32 %v2222_v42, %v2186_v28  ;;  %v2309_v13 = vmul.f32 %v2205_v35, %v2186_v28  ;;  %v2312_v14 = vadd.f32 %v2197_v32, %v1128_v63  ;;  %p2019_p10 = scmp.ne.s32.totalorder %s1868_s28, %s2018_s6  ;;  %p2024_p12 = scmp.lt.s32.totalorder %s2018_s6, %s2018_s6 }
  0x53   :  { %1053 = vst [vmem:[#allocation2 + $0x100] sm:$0xff] %v2182_v26  ;;  %1054 = vst [vmem:[#allocation2 + $0x108] sm:$0xff] %v2184_v27  ;;  %v2251_v52 = vld [vmem:[#allocation2 + $0xa0] sm:$0xff]  ;;  %v2271_v59 = vld [vmem:[#allocation8 + $0x28] sm:$0xff]  ;;  %v1129_v15 = vmul.f32 %v2170_v18, %v2180_v25  ;;  %v2319_v21 = vadd.f32 %v2197_v32, %v230_v57  ;;  %v2323_v28 = vmul.f32 %v2188_v29, %v2172_v22 }
  0x54   :  { %176 = vst [vmem:[#allocation2 + $0x168] sm:$0x7f] %v168_v31  ;;  %3663 = vst [vmem:[#allocation17_spill] sm:$0xff] %v2213_v39  ;;  %v2268_v58 = vld [vmem:[#allocation2 + $0x150] sm:$0xff]  ;;  %v2285_v1 = vld [vmem:[#allocation2 + $0x158] sm:$0xff]  ;;  %v2327_v30 = vmul.f32 %v2222_v42, %v2172_v22  ;;  %v231_v31 = vmul.f32 %v2170_v18, %v133_v53  ;;  %v2337_v57 = vmul.f32 %v2188_v29, %v133_v53  ;;  %p2025_p13 = por %p2024_p12, %p2023_p11 }
  0x55   :  { %3664 = vst [vmem:[#allocation18_spill] sm:$0xff] %v2222_v42  ;;  %1011 = vst [vmem:[#allocation2 + $0x70] sm:$0x1] %v3605_v0  ;;  %v1019_v2 = vld [vmem:[#allocation8 + $0x40] sm:$0x7f]  ;;  %v2301_v11 = vld [vmem:[#allocation8 + $0x30] sm:$0xff]  ;;  %v1130_v22 = vmul.f32 %v2170_v18, %v2182_v26  ;;  %v2388_v17 = vmul.f32 %v2188_v29, %v2271_v59 }
  0x56   :  { %1012 = vst [vmem:[#allocation2 + $0x78] sm:$0x1] %v3605_v0  ;;  %3665 = vst [vmem:[#allocation19_spill] sm:$0xff] %v2227_v44  ;;  %v1020_v3 = vld [vmem:[#allocation8 + $0x48] sm:$0x7f]  ;;  %v2316_v20 = vld [vmem:[#allocation8 + $0x38] sm:$0xff]  ;;  %v2384_v24 = vadd.f32 %v2197_v32, %v231_v31  ;;  %v2404_v31 = vmul.f32 %v2188_v29, %v2180_v25  ;;  %p2026_p0 = pnand %p2025_p13, %p2019_p10 }
  0x57   :  { %3666 = vst [vmem:[#allocation20_spill] sm:$0xff] %v2229_v45  ;;  %3667 = vst [vmem:[#allocation21_spill] sm:$0xff] %v2237_v47  ;;  %v1021_v8 = vld [vmem:[#allocation8 + $0x50] sm:$0x7f]  ;;  %v1022_v9 = vld [vmem:[#allocation8 + $0x58] sm:$0x7f] }
  0x58   :  { %3668 = vst [vmem:[#allocation22_spill] sm:$0xff] %v2243_v49  ;;  %1013 = vst [vmem:[#allocation2 + $0x80] sm:$0x1] %v3605_v0  ;;  %v1023_v10 = vld [vmem:[#allocation8 + $0x60] sm:$0x7f]  ;;  %v2330_v36 = vld [vmem:[#allocation2 + $0x130] sm:$0xff] }
  0x59   :  { %1014 = vst [vmem:[#allocation2 + $0x88] sm:$0x1] %v3605_v0  ;;  %3669 = vst [vmem:[#allocation23_spill] sm:$0xff] %v2247_v50  ;;  %v1024_v16 = vld [vmem:[#allocation8 + $0x68] sm:$0x7f]  ;;  %v2332_v43 = vld [vmem:[#allocation2 + $0x138] sm:$0xff] }
  0x5a   :  { %3670 = vst [vmem:[#allocation24_spill] sm:$0xff] %v2249_v51  ;;  %3671 = vst [vmem:[#allocation25_spill] sm:$0xff] %v2251_v52  ;;  %v1025_v19 = vld [vmem:[#allocation8 + $0x70] sm:$0x7f]  ;;  %v2334_v63 = vld [vmem:[#allocation2 + $0x140] sm:$0xff] }
  0x5b   :  { %1015 = vst [vmem:[#allocation2 + $0x90] sm:$0x1] %v3605_v0  ;;  %1016 = vst [vmem:[#allocation2 + $0x98] sm:$0x1] %v3605_v0  ;;  %v1068_v47 = vld [vmem:[#allocation8 + $0x49] sm:$0x7f] }
  0x5c   :  { %3672 = vst [vmem:[#allocation26_spill] sm:$0xff] %v2268_v58  ;;  %1017 = vst [vmem:[#allocation2 + $0xa0] sm:$0x1] %v3605_v0  ;;  %v1069_v39 = vld [vmem:[#allocation8 + $0x51] sm:$0x7f] }
  0x5d   :  { %3673 = vst [vmem:[#allocation27_spill] sm:$0xff] %v2278_v61  ;;  %3674 = vst [vmem:[#allocation28_spill] sm:$0xff] %v2281_v62  ;;  %v1067_v61 = vld [vmem:[#allocation8 + $0x41] sm:$0x7f]  ;;  %v77_v49 = vld [vmem:[#allocation8 + $0x8] sm:$0x3f] }
  0x5e   :  { %3675 = vst [vmem:[#allocation29_spill] sm:$0xff] %v2285_v1  ;;  %1063 = vst [vmem:[#allocation2 + $0x157] sm:$0x1] %v3605_v0  ;;  %v79_v62 = vld [vmem:[#allocation8 + $0x18] sm:$0x3f] }
  0x5f   :  { %3676 = vst [vmem:[#allocation30_spill] sm:$0xff] %v2292_v5  ;;  %1027 = vst [vmem:[#allocation2 + $0x71] sm:$0x7f] %v1019_v2  ;;  %v2340_v2 = vadd.f32 %v2197_v32, %v1129_v15  ;;  %v2358_v15 = vadd.f32 %v2197_v32, %v1127_v7  ;;  %v2372_v7 = vmul.f32 %v2188_v29, %v2174_v23 }
  0x60   :  { %1028 = vst [vmem:[#allocation2 + $0x79] sm:$0x7f] %v1020_v3  ;;  %1064 = vst [vmem:[#allocation2 + $0x15f] sm:$0x1] %v3605_v0  ;;  %v2346_v3 = vmul.f32 %v2188_v29, %v2182_v26 }
  0x61   :  { %3677 = vst [vmem:[#allocation31_spill] sm:$0xff] %v2305_v12  ;;  %3678 = vst [vmem:[#allocation32_spill] sm:$0xff] %v2309_v13  ;;  %v232_v13 = vmul.f32 %v2170_v18, %v2271_v59  ;;  %v1072_v12 = vld [vmem:[#allocation8 + $0x69] sm:$0x7f] }
  0x62   :  { %1029 = vst [vmem:[#allocation2 + $0x81] sm:$0x7f] %v1021_v8  ;;  %1030 = vst [vmem:[#allocation2 + $0x89] sm:$0x7f] %v1022_v9  ;;  %v2348_v8 = vld [vmem:[#allocation10 + $0x1] ss:$0 sm:$0xff] }
  0x63   :  { %1031 = vst [vmem:[#allocation2 + $0x91] sm:$0x7f] %v1023_v10  ;;  %3679 = vst [vmem:[#allocation33_spill] sm:$0xff] %v2323_v28  ;;  %v2353_v9 = vld [vmem:[#allocation2 + $0x148] sm:$0xff]  ;;  %v2355_v10 = vld [vmem:[#allocation2 + $0x160] sm:$0xff] }
  0x64   :  { %3680 = vst [vmem:[#allocation34_spill] sm:$0xff] %v2327_v30  ;;  %1032 = vst [vmem:[#allocation2 + $0x99] sm:$0x7f] %v1024_v16  ;;  %v2361_v16 = vmul.f32 %v2222_v42, %v133_v53  ;;  %v2376_v30 = vmul.f32 %v2222_v42, %v2174_v23  ;;  %v2392_v23 = vmul.f32 %v2222_v42, %v2271_v59  ;;  %v996_v28 = vld [vmem:[#allocation8 + $0x68] sm:$0x3f] }
  0x65   :  { %1033 = vst [vmem:[#allocation2 + $0xa1] sm:$0x7f] %v1025_v19  ;;  %3681 = vst [vmem:[#allocation35_spill] sm:$0xff] %v2346_v3  ;;  %v2364_v19 = vmul.f32 %v2205_v35, %v133_v53  ;;  %v2379_v53 = vadd.f32 %v2197_v32, %v1130_v22  ;;  %v233_v22 = vmul.f32 %v2170_v18, %v2301_v11 }
  0x66   :  { %1059 = vst [vmem:[#allocation2 + $0x137] sm:$0x1] %v3605_v0  ;;  %1060 = vst [vmem:[#allocation2 + $0x13f] sm:$0x1] %v3605_v0 }
  0x67   :  { %1061 = vst [vmem:[#allocation2 + $0x147] sm:$0x1] %v3605_v0  ;;  %3682 = vst [vmem:[#allocation36_spill] sm:$0xff] %v2355_v10  ;;  %v2435_v3 = vadd.f32 %v2197_v32, %v233_v22  ;;  %v2454_v22 = vmul.f32 %v2222_v42, %v2316_v20  ;;  %v82_v10 = vld [vmem:[#allocation8 + $0x30] sm:$0x3f] }
  0x68   :  { %3683 = vst [vmem:[#allocation37_spill] sm:$0xff] %v2361_v16  ;;  %3684 = vst [vmem:[#allocation38_spill] sm:$0xff] %v2364_v19  ;;  %v1131_v19 = vmul.f32 %v2170_v18, %v2184_v27  ;;  %v1071_v16 = vld [vmem:[#allocation8 + $0x61] sm:$0x7f] }
  0x69   :  { %1062 = vst [vmem:[#allocation2 + $0x14f] sm:$0x1] %v3605_v0  ;;  %1065 = vst [vmem:[#allocation2 + $0x167] sm:$0x1] %v3605_v0  ;;  %v1070_v0 = vld [vmem:[#allocation8 + $0x59] sm:$0x7f] }
  0x6a   :  { %3685 = vst [vmem:[#allocation39_spill] sm:$0xff] %v2372_v7  ;;  %3686 = vst [vmem:[#allocation40_spill] sm:$0xff] %v2376_v30  ;;  %v234_v30 = vmul.f32 %v2170_v18, %v2316_v20  ;;  %v2409_v5 = vadd.f32 %v2197_v32, %v1131_v19  ;;  %v236_v18 = vadd.f32 %v2197_v32, %v2220_v41 }
  0x6b   :  { %1075 = vst [vmem:[#allocation2 + $0x130] sm:$0x7f] %v1067_v61  ;;  %1076 = vst [vmem:[#allocation2 + $0x138] sm:$0x7f] %v1068_v47  ;;  %v2396_v47 = vld [vmem:[#allocation2 + $0xa8] sm:$0xff]  ;;  %v2400_v61 = vmul.f32 %v2205_v35, %v2271_v59  ;;  %v2415_v59 = vmul.f32 %v2222_v42, %v2180_v25  ;;  %v258_v19 = vmul.f32 %v2348_v8, %v2208_v37 }
  0x6c   :  { %1077 = vst [vmem:[#allocation2 + $0x140] sm:$0x7f] %v1069_v39  ;;  %3687 = vst [vmem:[#allocation41_spill] sm:$0xff] %v2388_v17  ;;  %v1073_v39 = vld [vmem:[#allocation8 + $0x71] sm:$0x7f]  ;;  %v237_v25 = vadd.f32 %v2197_v32, %v2258_v55  ;;  %v2439_v41 = vmul.f32 %v2188_v29, %v2301_v11  ;;  %v2447_v55 = vmul.f32 %v2222_v42, %v2182_v26 }
  0x6d   :  { %3688 = vst [vmem:[#allocation42_spill] sm:$0xff] %v2392_v23  ;;  %1078 = vst [vmem:[#allocation2 + $0x148] sm:$0x7f] %v1070_v0  ;;  %v3692_v0 = vmov 0.0   ;;  %v2420_v17 = vld [vmem:[#allocation10 + $0xa] ss:$0 sm:$0xff]  ;;  %v2450_v7 = vadd.f32 %v2197_v32, %v234_v30  ;;  %v262_v30 = vmul.f32 %v2348_v8, %v2247_v50 }
  0x6e   :  { %1079 = vst [vmem:[#allocation2 + $0x150] sm:$0x7f] %v1071_v16  ;;  %1080 = vst [vmem:[#allocation2 + $0x158] sm:$0x7f] %v1072_v12  ;;  %v1026_v12 = vld [vmem:[#allocation8 + $0x78] sm:$0x7f]  ;;  %v240_v16 = vadd.f32 %v2197_v32, %v232_v13  ;;  %v259_v13 = vmul.f32 %v2348_v8, %v2210_v38 }
  0x6f   :  { %3689 = vst [vmem:[#allocation43_spill] sm:$0xff] %v2396_v47  ;;  %3690 = vst [vmem:[#allocation44_spill] sm:$0xff] %v2400_v61  ;;  %v235_v61 = vadd.f32 %v2197_v32, %v2200_v33  ;;  %v257_v47 = vmul.f32 0.0, %v2348_v8  ;;  %v2432_v33 = vld [vmem:[#allocation10 + $0x6] ss:$0 sm:$0xff]  ;;  %v2465_v32 = vmul.f32 0.0, %v2420_v17 }
  0x70   :  { %3691 = vst [vmem:[#allocation45_spill] sm:$0xff] %v2404_v31  ;;  %1081 = vst [vmem:[#allocation2 + $0x160] sm:$0x7f] %v1073_v39  ;;  %v2426_v39 = vld [vmem:[#allocation10 + $0x4] ss:$0 sm:$0xff] }
  0x71   :  { %1018 = vst [vmem:[#allocation2 + $0xa8] sm:$0x1] %v3692_v0  ;;  %3693 = vst [vmem:[#allocation46_spill] sm:$0xff] %v2415_v59  ;;  %v76_v59 = vld [vmem:[#allocation8] sm:$0x3f]  ;;  %v2469_v20 = vmul.f32 %v2426_v39, %v2208_v37 }
  0x72   :  { %1034 = vst [vmem:[#allocation2 + $0xa9] sm:$0x7f] %v1026_v12  ;;  %3694 = vst [vmem:[#allocation47_spill] sm:$0xff] %v2439_v41  ;;  %v2443_v12 = vmul.f32 %v2222_v42, %v2301_v11  ;;  %v78_v31 = vld [vmem:[#allocation8 + $0x10] sm:$0x3f]  ;;  %v2458_v41 = vmul.f32 %v2222_v42, %v2184_v27  ;;  %v260_v11 = vmul.f32 %v2348_v8, %v2227_v44 }
  0x73   :  { %3695 = vst [vmem:[#allocation48_spill] sm:$0xff] %v2447_v55  ;;  %84 = vst [vmem:[#allocation2 + $0x12] sm:$0x3f] %v76_v59  ;;  %v80_v26 = vld [vmem:[#allocation8 + $0x20] sm:$0x3f]  ;;  %v2462_v55 = vld [vmem:[#allocation2 + $0x168] sm:$0xff]  ;;  %v261_v27 = vmul.f32 %v2348_v8, %v2229_v45  ;;  %v2487_v42 = vmul.f32 %v2426_v39, %v2210_v38 }
  0x74   :  { %3696 = vst [vmem:[#allocation49_spill] sm:$0xff] %v2454_v22  ;;  %3697 = vst [vmem:[#allocation50_spill] sm:$0xff] %v2458_v41  ;;  %v81_v59 = vld [vmem:[#allocation8 + $0x28] sm:$0x3f]  ;;  %v2483_v22 = vadd.f32 %v2254_v54, %v257_v47  ;;  %v2502_v54 = vmul.f32 %v2426_v39, %v2227_v44 }
  0x75   :  { %85 = vst [vmem:[#allocation2 + $0x1a] sm:$0x3f] %v77_v49  ;;  %86 = vst [vmem:[#allocation2 + $0x22] sm:$0x3f] %v78_v31  ;;  %v2476_v49 = vadd.f32 %v257_v47, %v235_v61  ;;  %v2480_v31 = vmul.f32 %v2420_v17, %v2208_v37  ;;  %v2493_v61 = vld [vmem:[#allocation10 + $0x3] ss:$0 sm:$0xff]  ;;  %v2497_v37 = vmul.f32 %v2420_v17, %v2210_v38 }
  0x76   :  { %87 = vst [vmem:[#allocation2 + $0x2a] sm:$0x3f] %v79_v62  ;;  %3698 = vst [vmem:[#allocation51_spill] sm:$0xff] %v2462_v55  ;;  %v266_v62 = vadd.f32 %v258_v19, %v236_v18  ;;  %v1074_v18 = vld [vmem:[#allocation8 + $0x79] sm:$0x7f]  ;;  %v268_v19 = vadd.f32 %v260_v11, %v2319_v21  ;;  %v322_v47 = vmul.f32 %v2493_v61, %v2268_v58 }
  0x77   :  { %3699 = vst [vmem:[#allocation52_spill] sm:$0xff] %v2465_v32  ;;  %88 = vst [vmem:[#allocation2 + $0x32] sm:$0x3f] %v80_v26  ;;  %v267_v32 = vadd.f32 %v259_v13, %v237_v25  ;;  %v2491_v26 = vmul.f32 %v2432_v33, %v2210_v38  ;;  %v2506_v25 = vld [vmem:[#allocation2 + $0x70] sm:$0xff]  ;;  %v269_v13 = vadd.f32 %v261_v27, %v2384_v24  ;;  %v2516_v11 = vld [vmem:[#allocation2 + $0x78] sm:$0xff] }
  0x78   :  { %89 = vst [vmem:[#allocation2 + $0x3a] sm:$0x3f] %v81_v59  ;;  %1066 = vst [vmem:[#allocation2 + $0x16f] sm:$0x1] %v3692_v0  ;;  %v270_v59 = vadd.f32 %v262_v30, %v240_v16  ;;  %v2510_v16 = vmul.f32 %v2420_v17, %v2227_v44  ;;  %v263_v21 = vmul.f32 %v2348_v8, %v2249_v51  ;;  %v192_v30 = vld [vmem:[#allocation8 + $0x2] sm:$0x3f] }
  0x79   :  { %3700 = vst [vmem:[#allocation53_spill] sm:$0xff] %v2480_v31  ;;  %3701 = vst [vmem:[#allocation54_spill] sm:$0xff] %v2491_v26  ;;  %v194_v31 = vld [vmem:[#allocation8 + $0x12] sm:$0x3f]  ;;  %v2519_v26 = vadd.f32 %v2203_v34, %v266_v62  ;;  %v2530_v24 = vmul.f32 %v2432_v33, %v2229_v45  ;;  %v196_v27 = vld [vmem:[#allocation8 + $0x22] sm:$0x3f]  ;;  %v2534_v34 = vmul.f32 %v2420_v17, %v2229_v45 }
  0x7a   :  { %3702 = vst [vmem:[#allocation55_spill] sm:$0xff] %v2497_v37  ;;  %1082 = vst [vmem:[#allocation2 + $0x168] sm:$0x7f] %v1074_v18  ;;  %v300_v38 = vadd.f32 %v2337_v57, %v270_v59  ;;  %v193_v37 = vld [vmem:[#allocation8 + $0xa] sm:$0x3f]  ;;  %v2522_v18 = vadd.f32 %v2233_v46, %v267_v32  ;;  %v2538_v46 = vmul.f32 %v2426_v39, %v2247_v50 }
  0x7b   :  { %3703 = vst [vmem:[#allocation56_spill] sm:$0xff] %v2510_v16  ;;  %v2526_v16 = vmul.f32 %v2426_v39, %v2229_v45  ;;  %3704 = vst [vmem:[#allocation57_spill] sm:$0xff] %v2530_v24  ;;  %v195_v57 = vld [vmem:[#allocation8 + $0x1a] sm:$0x3f]  ;;  %v197_v59 = vld [vmem:[#allocation8 + $0x2a] sm:$0x3f]  ;;  %v2542_v32 = vmul.f32 %v2432_v33, %v2247_v50  ;;  %v264_v62 = vmul.f32 %v2348_v8, %v2251_v52 }
  0x7c   :  { %200 = vst [vmem:[#allocation2 + $0x190] sm:$0x3f] %v192_v30  ;;  %201 = vst [vmem:[#allocation2 + $0x198] sm:$0x3f] %v193_v37  ;;  %v2546_v37 = vld [vmem:[#allocation10 + $0x5] ss:$0 sm:$0xff]  ;;  %v2561_v44 = vmul.f32 %v2420_v17, %v2247_v50  ;;  %v351_v55 = vmul.f32 %v2426_v39, %v2249_v51  ;;  %v330_v41 = vadd.f32 %v322_v47, %v300_v38 }
  0x7d   :  { %202 = vst [vmem:[#allocation2 + $0x1a0] sm:$0x3f] %v194_v31  ;;  %3705 = vst [vmem:[#allocation58_spill] sm:$0xff] %v2534_v34  ;;  %v2548_v31 = vld [vmem:[#allocation2 + $0x80] sm:$0xff]  ;;  %v2550_v30 = vld [vmem:[#allocation2 + $0x88] sm:$0xff]  ;;  %v2557_v34 = vadd.f32 %v2262_v56, %v268_v19  ;;  %v2576_v56 = vadd.f32 %v263_v21, %v2435_v3  ;;  %v2580_v19 = vmul.f32 %v2432_v33, %v2249_v51 }
  0x7e   :  { %3706 = vst [vmem:[#allocation59_spill] sm:$0xff] %v2542_v32  ;;  %v2552_v24 = vld [vmem:[#allocation2 + $0x90] sm:$0xff]  ;;  %203 = vst [vmem:[#allocation2 + $0x1a8] sm:$0x3f] %v195_v57  ;;  %v2570_v57 = vld [vmem:[#allocation2 + $0x18] sm:$0xff]  ;;  %v1154_v47 = vmul.f32 %v2348_v8, %v2506_v25  ;;  %v380_v3 = vmul.f32 %v2546_v37, %v2285_v1  ;;  %v1157_v21 = vmul.f32 %v2348_v8, %v2550_v30 }
  0x7f   :  { %204 = vst [vmem:[#allocation2 + $0x1b0] sm:$0x3f] %v196_v27  ;;  %205 = vst [vmem:[#allocation2 + $0x1b8] sm:$0x3f] %v197_v59  ;;  %v2554_v45 = vld [vmem:[#allocation2 + $0x10] sm:$0xff]  ;;  %v2567_v32 = vld [vmem:[#allocation2 + $0x38] sm:$0xff]  ;;  %v2573_v27 = vadd.f32 %v2296_v6, %v269_v13  ;;  %v2595_v6 = vmul.f32 %v2426_v39, %v2251_v52  ;;  %v1155_v13 = vmul.f32 %v2348_v8, %v2516_v11 }
  0x80   :  { %3707 = vst [vmem:[#allocation60_spill] sm:$0xff] %v2554_v45  ;;  %3708 = vst [vmem:[#allocation61_spill] sm:$0xff] %v2561_v44  ;;  %v2565_v23 = vld [vmem:[#allocation2 + $0x30] sm:$0xff]  ;;  %v2584_v38 = vld [vmem:[#allocation2 + $0x98] sm:$0xff]  ;;  %v2610_v44 = vmul.f32 %v2432_v33, %v2251_v52  ;;  %v2614_v45 = vmul.f32 %v2426_v39, %v2506_v25  ;;  %v1156_v52 = vmul.f32 %v2348_v8, %v2548_v31 }
  0x81   :  { %3709 = vst [vmem:[#allocation62_spill] sm:$0xff] %v2565_v23  ;;  %3710 = vst [vmem:[#allocation63_spill] sm:$0xff] %v2567_v32  ;;  %v2587_v59 = vld [vmem:[#allocation2 + $0x20] sm:$0xff]  ;;  %v2589_v50 = vld [vmem:[#allocation2 + $0x28] sm:$0xff]  ;;  %v1158_v32 = vmul.f32 %v2348_v8, %v2552_v24 }
  0x82   :  { %982 = vst [vmem:[#allocation2 + $0x10] sm:$0x3] %v3692_v0  ;;  %3711 = vst [vmem:[#allocation64_spill] sm:$0xff] %v2570_v57  ;;  %v993_v51 = vld [vmem:[#allocation8 + $0x50] sm:$0x3f]  ;;  %v2606_v57 = vadd.f32 %v264_v62, %v2450_v7  ;;  %v2618_v23 = vld [vmem:[#allocation2 + $0xa0] sm:$0xff]  ;;  %v359_v7 = vadd.f32 %v351_v55, %v330_v41  ;;  %v2622_v62 = vmul.f32 %v2420_v17, %v2506_v25 }
  0x83   :  { %3712 = vst [vmem:[#allocation65_spill] sm:$0xff] %v2576_v56  ;;  %983 = vst [vmem:[#allocation2 + $0x18] sm:$0x3] %v3692_v0  ;;  %v995_v56 = vld [vmem:[#allocation8 + $0x60] sm:$0x3f]  ;;  %v2634_v41 = vmul.f32 %v2426_v39, %v2516_v11  ;;  %v2637_v55 = vadd.f32 %v1158_v32, %v2340_v2  ;;  %v1159_v25 = vmul.f32 %v2348_v8, %v2584_v38 }
  0x84   :  { %3713 = vst [vmem:[#allocation66_spill] sm:$0xff] %v2587_v59  ;;  %3714 = vst [vmem:[#allocation67_spill] sm:$0xff] %v2589_v50  ;;  %v991_v50 = vld [vmem:[#allocation8 + $0x40] sm:$0x3f]  ;;  %v992_v59 = vld [vmem:[#allocation8 + $0x48] sm:$0x3f]  ;;  %v1160_v2 = vmul.f32 %v2348_v8, %v2618_v23 }
  0x85   :  { %986 = vst [vmem:[#allocation2 + $0x30] sm:$0x3] %v3692_v0  ;;  %987 = vst [vmem:[#allocation2 + $0x38] sm:$0x3] %v3692_v0  ;;  %v2665_v32 = vadd.f32 %v1159_v25, %v2379_v53  ;;  %v2669_v8 = vld [vmem:[#allocation2 + $0x198] sm:$0xff] }
  0x86   :  { %3715 = vst [vmem:[#allocation68_spill] sm:$0xff] %v2595_v6  ;;  %984 = vst [vmem:[#allocation2 + $0x20] sm:$0x3] %v3692_v0  ;;  %v994_v6 = vld [vmem:[#allocation8 + $0x58] sm:$0x3f]  ;;  %v2686_v53 = vld [vmem:[#allocation2 + $0x1b0] sm:$0xff] }
  0x87   :  { %985 = vst [vmem:[#allocation2 + $0x28] sm:$0x3] %v3692_v0  ;;  %3716 = vst [vmem:[#allocation69_spill] sm:$0xff] %v2606_v57  ;;  %v2627_v57 = vadd.f32 %v1157_v21, %v2312_v14  ;;  %v83_v14 = vld [vmem:[#allocation8 + $0x38] sm:$0x3f]  ;;  %v2674_v21 = vadd.f32 %v1156_v52, %v2358_v15  ;;  %v2692_v52 = vmul.f32 %v2420_v17, %v2548_v31 }
  0x88   :  { %999 = vst [vmem:[#allocation2 + $0x12] sm:$0x3f] %v991_v50  ;;  %1000 = vst [vmem:[#allocation2 + $0x1a] sm:$0x3f] %v992_v59  ;;  %v198_v50 = vld [vmem:[#allocation8 + $0x32] sm:$0x3f]  ;;  %v2642_v59 = vadd.f32 %v1155_v13, %v2289_v4  ;;  %v2662_v4 = vmul.f32 %v2432_v33, %v2548_v31  ;;  %v388_v13 = vadd.f32 %v380_v3, %v359_v7 }
  0x89   :  { %1001 = vst [vmem:[#allocation2 + $0x22] sm:$0x3f] %v993_v51  ;;  %3717 = vst [vmem:[#allocation70_spill] sm:$0xff] %v2622_v62  ;;  %v2630_v51 = vadd.f32 %v1154_v47, %v2274_v60  ;;  %v2646_v60 = vmul.f32 %v2432_v33, %v2516_v11  ;;  %v2650_v47 = vmul.f32 %v2420_v17, %v2516_v11  ;;  %v287_v11 = vmul.f32 0.0, %v2188_v29  ;;  %v2684_v29 = vld [vmem:[#allocation2 + $0x1a8] sm:$0xff]  ;;  %v2688_v25 = vld [vmem:[#allocation2 + $0x1b8] sm:$0xff] }
  0x8a   :  { %1002 = vst [vmem:[#allocation2 + $0x2a] sm:$0x3f] %v994_v6  ;;  %1003 = vst [vmem:[#allocation2 + $0x32] sm:$0x3f] %v995_v56  ;;  %v199_v56 = vld [vmem:[#allocation8 + $0x3a] sm:$0x3f]  ;;  %v318_v3 = vmul.f32 %v2493_v61, %v2330_v36 }
  0x8b   :  { %1004 = vst [vmem:[#allocation2 + $0x3a] sm:$0x3f] %v996_v28  ;;  %90 = vst [vmem:[#allocation2 + $0x42] sm:$0x3f] %v82_v10  ;;  %v2654_v28 = vld [vmem:[#allocation2 + $0x190] sm:$0xff]  ;;  %v2658_v10 = vmul.f32 %v2426_v39, %v2548_v31  ;;  %v2671_v6 = vld [vmem:[#allocation2 + $0x1a0] sm:$0xff]  ;;  %v295_v15 = vadd.f32 %v287_v11, %v2476_v49  ;;  %v2706_v31 = vmul.f32 %v2432_v33, %v2550_v30 }
  0x8c   :  { %206 = vst [vmem:[#allocation2 + $0x1c0] sm:$0x3f] %v198_v50  ;;  %3718 = vst [vmem:[#allocation71_spill] sm:$0xff] %v2650_v47  ;;  %v2677_v50 = vadd.f32 %v1160_v2, %v2409_v5  ;;  %v2696_v5 = vmul.f32 %v2426_v39, %v2550_v30  ;;  %v1095_v7 = vld [vmem:[#allocation8 + $0x42] sm:$0x3f]  ;;  %v2714_v49 = vmul.f32 %v2426_v39, %v2552_v24 }
  0x8d   :  { %91 = vst [vmem:[#allocation2 + $0x4a] sm:$0x3f] %v83_v14  ;;  %207 = vst [vmem:[#allocation2 + $0x1c8] sm:$0x3f] %v199_v56  ;;  %v2680_v14 = vmul.f32 0.0, %v2493_v61  ;;  %v319_v47 = vmul.f32 %v2493_v61, %v2332_v43 }
  0x8e   :  { %3719 = vst [vmem:[#allocation72_spill] sm:$0xff] %v2654_v28  ;;  %1087 = vst [vmem:[#allocation2 + $0x196] sm:$0x3] %v3692_v0  ;;  %v1096_v56 = vld [vmem:[#allocation8 + $0x4a] sm:$0x3f] }
  0x8f   :  { %3720 = vst [vmem:[#allocation73_spill] sm:$0xff] %v2669_v8  ;;  %3721 = vst [vmem:[#allocation74_spill] sm:$0xff] %v2671_v6  ;;  %v1097_v2 = vld [vmem:[#allocation8 + $0x52] sm:$0x3f]  ;;  %v325_v62 = vadd.f32 %v2680_v14, %v295_v15  ;;  %v1190_v6 = vadd.f32 %v2483_v22, %v287_v11  ;;  %v327_v8 = vadd.f32 %v319_v47, %v2522_v18  ;;  %v1099_v15 = vld [vmem:[#allocation8 + $0x62] sm:$0x3f] }
  0x90   :  { %1088 = vst [vmem:[#allocation2 + $0x19e] sm:$0x3] %v3692_v0  ;;  %1089 = vst [vmem:[#allocation2 + $0x1a6] sm:$0x3] %v3692_v0  ;;  %v997_v22 = vld [vmem:[#allocation8 + $0x70] sm:$0x3f]  ;;  %v2740_v47 = vmul.f32 %v2432_v33, %v2552_v24 }
  0x91   :  { %3722 = vst [vmem:[#allocation75_spill] sm:$0xff] %v2684_v29  ;;  %3723 = vst [vmem:[#allocation76_spill] sm:$0xff] %v2686_v53  ;;  %v375_v53 = vmul.f32 %v2546_v37, %v2330_v36  ;;  %v418_v29 = vadd.f32 %v2610_v44, %v388_v13  ;;  %v1101_v11 = vld [vmem:[#allocation8 + $0x72] sm:$0x3f] }
  0x92   :  { %3724 = vst [vmem:[#allocation77_spill] sm:$0xff] %v2688_v25  ;;  %3725 = vst [vmem:[#allocation78_spill] sm:$0xff] %v2692_v52  ;;  %v2710_v52 = vmul.f32 %v2420_v17, %v2550_v30  ;;  %v326_v25 = vadd.f32 %v318_v3, %v2519_v26  ;;  %v320_v30 = vmul.f32 %v2493_v61, %v2334_v63  ;;  %v2734_v44 = vld [vmem:[#allocation2 + $0x40] sm:$0xff] }
  0x93   :  { %1090 = vst [vmem:[#allocation2 + $0x1ae] sm:$0x3] %v3692_v0  ;;  %1091 = vst [vmem:[#allocation2 + $0x1b6] sm:$0x3] %v3692_v0  ;;  %v354_v26 = vadd.f32 %v2469_v20, %v325_v62  ;;  %v2736_v18 = vld [vmem:[#allocation2 + $0x1c0] sm:$0xff]  ;;  %v2744_v20 = vmul.f32 %v2420_v17, %v2552_v24  ;;  %v2761_v24 = vmul.f32 %v2420_v17, %v2584_v38 }
  0x94   :  { %1092 = vst [vmem:[#allocation2 + $0x1be] sm:$0x3] %v3692_v0  ;;  %3726 = vst [vmem:[#allocation79_spill] sm:$0xff] %v2710_v52  ;;  %v1098_v52 = vld [vmem:[#allocation8 + $0x5a] sm:$0x3f]  ;;  %v355_v3 = vadd.f32 %v2487_v42, %v326_v25  ;;  %v328_v28 = vadd.f32 %v320_v30, %v2557_v34  ;;  %v2748_v42 = vmul.f32 %v2426_v39, %v2584_v38  ;;  %v2753_v13 = vld [vmem:[#allocation2 + $0x48] sm:$0xff] }
  0x95   :  { %1103 = vst [vmem:[#allocation2 + $0x190] sm:$0x3f] %v1095_v7  ;;  %1104 = vst [vmem:[#allocation2 + $0x198] sm:$0x3f] %v1096_v56  ;;  %v321_v7 = vmul.f32 %v2493_v61, %v2353_v9  ;;  %v1100_v56 = vld [vmem:[#allocation8 + $0x6a] sm:$0x3f]  ;;  %v2757_v25 = vmul.f32 %v2432_v33, %v2584_v38 }
  0x96   :  { %1105 = vst [vmem:[#allocation2 + $0x1a0] sm:$0x3f] %v1097_v2  ;;  %1106 = vst [vmem:[#allocation2 + $0x1a8] sm:$0x3f] %v1098_v52  ;;  %v376_v2 = vmul.f32 %v2546_v37, %v2332_v43  ;;  %v1893_v34 = vld [vmem:[#allocation10 + $0xc] ss:$0 sm:$0xff]  ;;  %v2763_v52 = vadd.f32 %v375_v53, %v354_v26  ;;  %v379_v53 = vmul.f32 %v2546_v37, %v2268_v58 }
  0x97   :  { %1107 = vst [vmem:[#allocation2 + $0x1b0] sm:$0x3f] %v1099_v15  ;;  %1108 = vst [vmem:[#allocation2 + $0x1b8] sm:$0x3f] %v1100_v56  ;;  %v329_v62 = vadd.f32 %v321_v7, %v2573_v27  ;;  %v998_v27 = vld [vmem:[#allocation8 + $0x78] sm:$0x3f]  ;;  %v2772_v56 = vmul.f32 %v2426_v39, %v2618_v23  ;;  %v448_v26 = vadd.f32 %v2443_v12, %v418_v29 }
  0x98   :  { %3727 = vst [vmem:[#allocation80_spill] sm:$0xff] %v2734_v44  ;;  %3728 = vst [vmem:[#allocation81_spill] sm:$0xff] %v2736_v18  ;;  %v2765_v30 = vadd.f32 %v376_v2, %v355_v3  ;;  %v2768_v7 = vld [vmem:[#allocation2 + $0x1c8] sm:$0xff]  ;;  %v1102_v15 = vld [vmem:[#allocation8 + $0x7a] sm:$0x3f]  ;;  %v2782_v3 = vmul.f32 %v2432_v33, %v2618_v23  ;;  %v356_v2 = vadd.f32 %v2502_v54, %v327_v8 }
  0x99   :  { %3729 = vst [vmem:[#allocation82_spill] sm:$0xff] %v2744_v20  ;;  %988 = vst [vmem:[#allocation2 + $0x40] sm:$0x3] %v3692_v0  ;;  %v358_v38 = vadd.f32 %v2538_v46, %v329_v62  ;;  %v2787_v46 = vmul.f32 0.0, %v2205_v35  ;;  %v2792_v62 = vmul.f32 %v1893_v34, %v2330_v36  ;;  %v2797_v12 = vmul.f32 %v1893_v34, %v2332_v43  ;;  %v3740_v18 = vld [vmem:[#allocation59_spill] sm:$0xff] }
  0x9a   :  { %1005 = vst [vmem:[#allocation2 + $0x42] sm:$0x3f] %v997_v22  ;;  %1093 = vst [vmem:[#allocation2 + $0x1c6] sm:$0x3] %v3692_v0  ;;  %v1219_v22 = vadd.f32 %v1190_v6, %v2680_v14  ;;  %v1200_v6 = vld [vmem:[#allocation2 + $0x130] sm:$0xff]  ;;  %v2789_v14 = vmul.f32 0.0, %v1893_v34  ;;  %v377_v23 = vmul.f32 %v2546_v37, %v2334_v63  ;;  %v2802_v54 = vmul.f32 %v1893_v34, %v2334_v63 }
  0x9b   :  { %3730 = vst [vmem:[#allocation83_spill] sm:$0xff] %v2753_v13  ;;  %3731 = vst [vmem:[#allocation84_spill] sm:$0xff] %v2761_v24  ;;  %v378_v35 = vmul.f32 %v2546_v37, %v2353_v9  ;;  %v1191_v36 = vadd.f32 %v2216_v40, %v2630_v51  ;;  %v1269_v29 = vmul.f32 %v2546_v37, %v1200_v6  ;;  %v2844_v13 = vld [vmem:[#allocation2 + $0x150] sm:$0xff] }
  0x9c   :  { %1109 = vst [vmem:[#allocation2 + $0x1c0] sm:$0x3f] %v1101_v11  ;;  %989 = vst [vmem:[#allocation2 + $0x48] sm:$0x3] %v3692_v0  ;;  %v357_v11 = vadd.f32 %v2526_v16, %v328_v28  ;;  %v1201_v16 = vld [vmem:[#allocation2 + $0x138] sm:$0xff]  ;;  %v1212_v28 = vmul.f32 %v2493_v61, %v1200_v6  ;;  %v1248_v8 = vadd.f32 %v2614_v45, %v1219_v22  ;;  %v2827_v22 = vld [vmem:[#allocation2 + $0x148] sm:$0xff] }
  0x9d   :  { %3732 = vst [vmem:[#allocation85_spill] sm:$0xff] %v2768_v7  ;;  %1006 = vst [vmem:[#allocation2 + $0x4a] sm:$0x3f] %v998_v27  ;;  %v2794_v27 = vld [vmem:[#allocation10 + $0x8] ss:$0 sm:$0xff]  ;;  %v2822_v40 = vmul.f32 %v1893_v34, %v2268_v58  ;;  %v1192_v45 = vadd.f32 %v2240_v48, %v2642_v59  ;;  %v1213_v51 = vmul.f32 %v2493_v61, %v1201_v16 }
  0x9e   :  { %1094 = vst [vmem:[#allocation2 + $0x1ce] sm:$0x3] %v3692_v0  ;;  %1110 = vst [vmem:[#allocation2 + $0x1c8] sm:$0x3f] %v1102_v15  ;;  %v387_v0 = vadd.f32 %v379_v53, %v358_v38  ;;  %v2811_v15 = vadd.f32 %v377_v23, %v356_v2  ;;  %v386_v38 = vadd.f32 %v378_v35, %v357_v11  ;;  %v1202_v35 = vld [vmem:[#allocation2 + $0x140] sm:$0xff] }
  0x9f   :  { %3733 = vst [vmem:[#allocation86_spill] sm:$0xff] %v2794_v27  ;;  %3734 = vst [vmem:[#allocation87_spill] sm:$0xff] %v2797_v12  ;;  %v2814_v53 = vmul.f32 %v1893_v34, %v2353_v9  ;;  %v2818_v24 = vmul.f32 %v2794_v27, %v2268_v58  ;;  %v323_v2 = vmul.f32 %v2493_v61, %v2285_v1  ;;  %v3738_v58 = vld [vmem:[#allocation33_spill] sm:$0xff] }
  0xa0   :  { %3735 = vst [vmem:[#allocation88_spill] sm:$0xff] %v2802_v54  ;;  %v417_v20 = vadd.f32 %v2580_v19, %v387_v0  ;;  %v469_v11 = vmul.f32 %v2794_v27, %v2285_v1  ;;  %v2834_v6 = vmul.f32 %v1893_v34, %v2285_v1  ;;  %v3737_v19 = vld [vmem:[#allocation36_spill] sm:$0xff]  ;;  %v1220_v48 = vadd.f32 %v1212_v28, %v1191_v36  ;;  %v3741_v36 = vld [vmem:[#allocation42_spill] sm:$0xff] }
  0xa1   :  { %3736 = vst [vmem:[#allocation89_spill] sm:$0xff] %v2814_v53  ;;  %v470_v0 = vmul.f32 %v2794_v27, %v3737_v19  ;;  %v2840_v23 = vmul.f32 %v2493_v61, %v3737_v19  ;;  %v1277_v59 = vadd.f32 %v1269_v29, %v1248_v8  ;;  %v1194_v7 = vadd.f32 %v3738_v58, %v2627_v57  ;;  %v3742_v58 = vld [vmem:[#allocation39_spill] sm:$0xff] }
  0xa2   :  { %3739 = vst [vmem:[#allocation33_spill] sm:$0xff] %v2844_v13  ;;  %v2847_v44 = vadd.f32 %v3740_v18, %v386_v38  ;;  %v2851_v34 = vmul.f32 %v2546_v37, %v3737_v19  ;;  %v1215_v53 = vmul.f32 %v2493_v61, %v2827_v22  ;;  %v447_v28 = vadd.f32 %v3741_v36, %v417_v20  ;;  %v3743_v18 = vld [vmem:[#allocation28_spill] sm:$0xff] }
  0xa3   :  { %v2853_v1 = vadd.f32 %v470_v0, %v448_v26  ;;  %v1221_v8 = vadd.f32 %v1213_v51, %v1192_v45  ;;  %v1270_v29 = vmul.f32 %v2546_v37, %v1201_v16  ;;  %v1195_v57 = vadd.f32 %v3742_v58, %v2637_v55  ;;  %v1205_v0 = vld [vmem:[#allocation2 + $0x158] sm:$0xff] }
  0xa4   :  { %v1193_v38 = vadd.f32 %v3743_v18, %v2674_v21  ;;  %v1214_v54 = vmul.f32 %v2493_v61, %v1202_v35  ;;  %v1223_v19 = vadd.f32 %v1215_v53, %v1194_v7  ;;  %v1216_v26 = vmul.f32 %v2493_v61, %v2844_v13  ;;  %v3744_v7 = vld [vmem:[#allocation45_spill] sm:$0xff] }
  0xa5   :  { %v1306_v12 = vadd.f32 %v2646_v60, %v1277_v59  ;;  %v1249_v20 = vadd.f32 %v2634_v41, %v1220_v48  ;;  %v2869_v45 = vmul.f32 %v2794_v27, %v1201_v16  ;;  %v1271_v51 = vmul.f32 %v2546_v37, %v1202_v35  ;;  %v1206_v48 = vld [vmem:[#allocation2 + $0x160] sm:$0xff] }
  0xa6   :  { %v1224_v55 = vadd.f32 %v1216_v26, %v1195_v57  ;;  %v1252_v36 = vadd.f32 %v2714_v49, %v1223_v19  ;;  %v1273_v21 = vmul.f32 %v2546_v37, %v2844_v13  ;;  %v1196_v53 = vadd.f32 %v3744_v7, %v2665_v32  ;;  %v3745_v26 = vld [vmem:[#allocation22_spill] sm:$0xff] }
  0xa7   :  { %v2877_v58 = vadd.f32 %v469_v11, %v447_v28  ;;  %v1250_v60 = vadd.f32 %v2658_v10, %v1221_v8  ;;  %v2881_v41 = vmul.f32 %v2794_v27, %v1202_v35  ;;  %v1217_v16 = vmul.f32 %v2493_v61, %v1205_v0  ;;  %v3746_v11 = vld [vmem:[#allocation35_spill] sm:$0xff] }
  0xa8   :  { %v1222_v59 = vadd.f32 %v1214_v54, %v1193_v38  ;;  %v1281_v57 = vadd.f32 %v1273_v21, %v1252_v36  ;;  %v1253_v49 = vadd.f32 %v2748_v42, %v1224_v55  ;;  %v1274_v19 = vmul.f32 %v2546_v37, %v1205_v0  ;;  %v1235_v36 = vld [vmem:[#allocation2 + $0xa8] sm:$0xff] }
  0xa9   :  { %v1278_v18 = vadd.f32 %v1270_v29, %v1249_v20  ;;  %v2887_v13 = vadd.f32 %v3745_v26, %v1306_v12  ;;  %v1225_v32 = vadd.f32 %v1217_v16, %v1196_v53  ;;  %v1197_v10 = vadd.f32 %v3746_v11, %v2677_v50  ;;  %v3747_v20 = vld [vmem:[#allocation65_spill] sm:$0xff]  ;;  %v3749_v50 = vld [vmem:[#allocation46_spill] sm:$0xff] }
  0xaa   :  { %v1272_v35 = vmul.f32 %v2546_v37, %v2827_v22  ;;  %v1310_v28 = vadd.f32 %v2757_v25, %v1281_v57  ;;  %v1282_v8 = vadd.f32 %v1274_v19, %v1253_v49  ;;  %v1218_v54 = vmul.f32 %v2493_v61, %v1206_v48  ;;  %v3748_v12 = vld [vmem:[#allocation41_spill] sm:$0xff]  ;;  %v3751_v49 = vld [vmem:[#allocation48_spill] sm:$0xff] }
  0xab   :  { %v1279_v38 = vadd.f32 %v1271_v51, %v1250_v60  ;;  %v1254_v42 = vadd.f32 %v2772_v56, %v1225_v32  ;;  %v1275_v29 = vmul.f32 %v2546_v37, %v1206_v48  ;;  %v301_v55 = vadd.f32 %v3748_v12, %v3747_v20  ;;  %v1264_v56 = vld [vmem:[#allocation2 + $0x168] sm:$0xff] }
  0xac   :  { %v1311_v21 = vadd.f32 %v2782_v3, %v1282_v8  ;;  %v1339_v7 = vadd.f32 %v3749_v50, %v1310_v28  ;;  %v1360_v53 = vmul.f32 %v2794_v27, %v1205_v0  ;;  %v1226_v16 = vadd.f32 %v1218_v54, %v1197_v10  ;;  %v3755_v8 = vld [vmem:[#allocation43_spill] sm:$0xff] }
  0xad   :  { %v1251_v25 = vadd.f32 %v2696_v5, %v1222_v59  ;;  %v1283_v57 = vadd.f32 %v1275_v29, %v1254_v42  ;;  %v1361_v61 = vmul.f32 %v2794_v27, %v1206_v48  ;;  %v331_v51 = vadd.f32 %v323_v2, %v301_v55  ;;  %v3753_v59 = vld [vmem:[#allocation68_spill] sm:$0xff]  ;;  %v3758_v29 = vld [vmem:[#allocation50_spill] sm:$0xff]  ;;  %v3759_v50 = vld [vmem:[#allocation51_spill] sm:$0xff] }
  0xae   :  { %v2904_v60 = vadd.f32 %v1360_v53, %v1339_v7  ;;  %v1340_v19 = vadd.f32 %v3751_v49, %v1311_v21  ;;  %v1247_v26 = vmul.f32 %v2426_v39, %v1235_v36  ;;  %v1304_v3 = vmul.f32 %v2432_v33, %v1235_v36  ;;  %v2928_v55 = vld [vmem:[#allocation2 + $0x68] sm:$0xff]  ;;  %v3763_v49 = vld [vmem:[#allocation49_spill] sm:$0xff] }
  0xaf   :  { %v1307_v32 = vadd.f32 %v2662_v4, %v1278_v18  ;;  %v1308_v0 = vadd.f32 %v2706_v31, %v1279_v38  ;;  %v2913_v5 = vmul.f32 %v2794_v27, %v2827_v22  ;;  %v360_v48 = vadd.f32 %v3753_v59, %v331_v51  ;;  %v3756_v31 = vld [vmem:[#allocation69_spill] sm:$0xff]  ;;  %v3757_v18 = vld [vmem:[#allocation47_spill] sm:$0xff]  ;;  %v3762_v51 = vld [vmem:[#allocation18_spill] sm:$0xff] }
  0xb0   :  { %3750 = vst [vmem:[#allocation59_spill] sm:$0xff] %v2904_v60  ;;  %v2916_v2 = vadd.f32 %v1361_v61, %v1340_v19  ;;  %v1255_v11 = vadd.f32 %v1247_v26, %v1226_v16  ;;  %v1312_v10 = vadd.f32 %v1304_v3, %v1283_v57  ;;  %v1276_v28 = vmul.f32 %v2546_v37, %v1264_v56  ;;  %v2937_v16 = vld [vmem:[#allocation10 + $0x9] ss:$0 sm:$0xff]  ;;  %v3766_v3 = vld [vmem:[#allocation30_spill] sm:$0xff]  ;;  %v3797_v60 = vld [vmem:[#allocation17_spill] sm:$0xff] }
  0xb1   :  { %3752 = vst [vmem:[#allocation42_spill] sm:$0xff] %v2913_v5  ;;  %v353_v54 = vmul.f32 %v2426_v39, %v3755_v8  ;;  %v389_v42 = vadd.f32 %v2851_v34, %v360_v48  ;;  %v411_v4 = vmul.f32 %v2432_v33, %v3755_v8  ;;  %v302_v22 = vadd.f32 %v3757_v18, %v3756_v31  ;;  %v3768_v31 = vld [vmem:[#allocation19_spill] sm:$0xff] }
  0xb2   :  { %3754 = vst [vmem:[#allocation39_spill] sm:$0xff] %v2916_v2  ;;  %v1284_v38 = vadd.f32 %v1276_v28, %v1255_v11  ;;  %v1341_v20 = vadd.f32 %v3758_v29, %v1312_v10  ;;  %v1362_v12 = vmul.f32 %v2794_v27, %v1264_v56  ;;  %v412_v36 = vmul.f32 %v2928_v55, %v2432_v33  ;;  %v3767_v10 = vld [vmem:[#allocation15_spill] sm:$0xff] }
  0xb3   :  { %v1280_v21 = vadd.f32 %v1272_v35, %v1251_v25  ;;  %v419_v39 = vadd.f32 %v411_v4, %v389_v42  ;;  %v382_v34 = vmul.f32 %v2546_v37, %v3759_v50  ;;  %v332_v7 = vadd.f32 %v2840_v23, %v302_v22  ;;  %3760 = vst [vmem:[#allocation28_spill] sm:$0xff] %v2937_v16  ;;  %v3764_v35 = vld [vmem:[#allocation62_spill] sm:$0xff]  ;;  %v3769_v22 = vld [vmem:[#allocation16_spill] sm:$0xff] }
  0xb4   :  { %v471_v53 = vmul.f32 %v2794_v27, %v3759_v50  ;;  %v2939_v57 = vadd.f32 %v1362_v12, %v1341_v20  ;;  %v1313_v61 = vadd.f32 %v1284_v38, %v412_v36  ;;  %v442_v56 = vmul.f32 %v2928_v55, %v3762_v51  ;;  %v3765_v37 = vld [vmem:[#allocation54_spill] sm:$0xff]  ;;  %v3800_v50 = vld [vmem:[#allocation21_spill] sm:$0xff] }
  0xb5   :  { %v449_v19 = vadd.f32 %v3763_v49, %v419_v39  ;;  %v500_v25 = vmul.f32 %v2937_v16, %v3764_v35  ;;  %v361_v26 = vadd.f32 %v353_v54, %v332_v7  ;;  %v413_v23 = vadd.f32 %v3765_v37, %v2763_v52  ;;  %v3777_v37 = vld [vmem:[#allocation37_spill] sm:$0xff] }
  0xb6   :  { %3761 = vst [vmem:[#allocation45_spill] sm:$0xff] %v2939_v57  ;;  %v1336_v59 = vadd.f32 %v3766_v3, %v1307_v32  ;;  %v1342_v48 = vadd.f32 %v1313_v61, %v442_v56  ;;  %v472_v11 = vmul.f32 %v2928_v55, %v2794_v27  ;;  %v435_v28 = vmul.f32 %v3762_v51, %v3767_v10  ;;  %v3778_v3 = vld [vmem:[#allocation64_spill] sm:$0xff] }
  0xb7   :  { %v479_v42 = vadd.f32 %v471_v53, %v449_v19  ;;  %v390_v4 = vadd.f32 %v382_v34, %v361_v26  ;;  %v406_v18 = vmul.f32 %v2432_v33, %v3768_v31  ;;  %v436_v54 = vmul.f32 %v3762_v51, %v3769_v22  ;;  %v3771_v34 = vld [vmem:[#allocation57_spill] sm:$0xff]  ;;  %v3772_v53 = vld [vmem:[#allocation63_spill] sm:$0xff] }
  0xb8   :  { %v1309_v38 = vadd.f32 %v2740_v47, %v1280_v21  ;;  %v2958_v52 = vadd.f32 %v1342_v48, %v472_v11  ;;  %v443_v32 = vadd.f32 %v435_v28, %v413_v23  ;;  %v465_v29 = vmul.f32 %v2794_v27, %v2332_v43  ;;  %v3773_v43 = vld [vmem:[#allocation31_spill] sm:$0xff] }
  0xb9   :  { %v508_v20 = vadd.f32 %v500_v25, %v479_v42  ;;  %v420_v12 = vadd.f32 %v412_v36, %v390_v4  ;;  %v414_v39 = vadd.f32 %v406_v18, %v2765_v30  ;;  %v415_v7 = vadd.f32 %v3771_v34, %v2811_v15  ;;  %v3774_v36 = vld [vmem:[#allocation60_spill] sm:$0xff]  ;;  %v3776_v25 = vld [vmem:[#allocation61_spill] sm:$0xff] }
  0xba   :  { %3770 = vst [vmem:[#allocation22_spill] sm:$0xff] %v2958_v52  ;;  %v501_v33 = vmul.f32 %v2937_v16, %v3772_v53  ;;  %v473_v61 = vadd.f32 %v465_v29, %v443_v32  ;;  %v466_v47 = vmul.f32 %v2794_v27, %v2334_v63  ;;  %v467_v21 = vmul.f32 %v2794_v27, %v2353_v9  ;;  %v3783_v18 = vld [vmem:[#allocation40_spill] sm:$0xff]  ;;  %v3011_v34 = vld [vmem:[#allocation10 + $0x17] ss:$0 sm:$0xff] }
  0xbb   :  { %v450_v51 = vadd.f32 %v442_v56, %v420_v12  ;;  %v444_v49 = vadd.f32 %v436_v54, %v414_v39  ;;  %v445_v19 = vadd.f32 %v3773_v43, %v415_v7  ;;  %v496_v30 = vmul.f32 %v2937_v16, %v3774_v36  ;;  %v3007_v12 = vld [vmem:[#allocation10 + $0x16] ss:$0 sm:$0xff] }
  0xbc   :  { %v2976_v15 = vadd.f32 %v2869_v45, %v2887_v13  ;;  %v537_v26 = vadd.f32 %v3776_v25, %v508_v20  ;;  %v446_v23 = vadd.f32 %v3777_v37, %v2847_v44  ;;  %v497_v48 = vmul.f32 %v2937_v16, %v3778_v3  ;;  %v3781_v13 = vld [vmem:[#allocation34_spill] sm:$0xff]  ;;  %v2996_v44 = vld [vmem:[#allocation10 + $0x15] ss:$0 sm:$0xff]  ;;  %v3004_v20 = vld [vmem:[#allocation10 + $0xe] ss:$0 sm:$0xff] }
  0xbd   :  { %v480_v10 = vadd.f32 %v472_v11, %v450_v51  ;;  %v2985_v56 = vmul.f32 %v2928_v55, %v2937_v16  ;;  %v474_v28 = vadd.f32 %v466_v47, %v444_v49  ;;  %v475_v42 = vadd.f32 %v467_v21, %v445_v19  ;;  %3785 = vst [vmem:[#allocation68_spill] sm:$0xff] %v3004_v20  ;;  %v3788_v47 = vld [vmem:[#allocation66_spill] sm:$0xff]  ;;  %v3789_v43 = vld [vmem:[#allocation53_spill] sm:$0xff]  ;;  %v3790_v37 = vld [vmem:[#allocation55_spill] sm:$0xff] }
  0xbe   :  { %3775 = vst [vmem:[#allocation35_spill] sm:$0xff] %v2976_v15  ;;  %v2988_v4 = vadd.f32 %v2881_v41, %v1336_v59  ;;  %v2991_v45 = vadd.f32 %v3781_v13, %v1308_v0  ;;  %v2994_v22 = vadd.f32 %v3783_v18, %v1309_v38  ;;  %v476_v54 = vadd.f32 %v2818_v24, %v446_v23  ;;  %v3786_v59 = vld [vmem:[#allocation38_spill] sm:$0xff]  ;;  %v3787_v38 = vld [vmem:[#allocation24_spill] sm:$0xff]  ;;  %v3013_v24 = vld [vmem:[#allocation10 + $0x10] ss:$0 sm:$0xff] }
  0xbf   :  { %3779 = vst [vmem:[#allocation65_spill] sm:$0xff] %v2985_v56  ;;  %v3001_v11 = vmul.f32 %v2928_v55, %v2996_v44  ;;  %v509_v32 = vadd.f32 %v501_v33, %v480_v10  ;;  %v503_v29 = vadd.f32 %v2985_v56, %v474_v28  ;;  %v504_v41 = vadd.f32 %v496_v30, %v475_v42  ;;  %v3030_v30 = vld [vmem:[#allocation10 + $0x12] ss:$0 sm:$0xff]  ;;  %v3792_v42 = vld [vmem:[#allocation52_spill] sm:$0xff] }
  0xc0   :  { %3780 = vst [vmem:[#allocation41_spill] sm:$0xff] %v2988_v4  ;;  %3782 = vst [vmem:[#allocation46_spill] sm:$0xff] %v2991_v45  ;;  %v566_v0 = vadd.f32 %v3786_v59, %v537_v26  ;;  %v530_v39 = vmul.f32 %v2420_v17, %v3787_v38  ;;  %v505_v7 = vadd.f32 %v497_v48, %v476_v54  ;;  %v3791_v48 = vld [vmem:[#allocation67_spill] sm:$0xff]  ;;  %v3801_v4 = vld [vmem:[#allocation73_spill] sm:$0xff] }
  0xc1   :  { %3784 = vst [vmem:[#allocation48_spill] sm:$0xff] %v2994_v22  ;;  %v498_v33 = vmul.f32 %v2937_v16, %v3788_v47  ;;  %v3019_v21 = vmul.f32 %v2928_v55, %v3007_v12  ;;  %v3023_v51 = vmul.f32 %v2928_v55, %v3011_v34  ;;  %v3027_v49 = vmul.f32 %v2928_v55, %v3004_v20 }
  0xc2   :  { %v533_v19 = vadd.f32 %v3789_v43, %v504_v41  ;;  %v538_v25 = vadd.f32 %v530_v39, %v509_v32  ;;  %v641_v26 = vmul.f32 %v3004_v20, %v3774_v36  ;;  %v534_v23 = vadd.f32 %v3790_v37, %v505_v7  ;;  %v3794_v39 = vld [vmem:[#allocation44_spill] sm:$0xff] }
  0xc3   :  { %v499_v10 = vmul.f32 %v2937_v16, %v3791_v48  ;;  %v502_v28 = vadd.f32 %v2985_v56, %v473_v61  ;;  %v532_v13 = vadd.f32 %v3792_v42, %v503_v29  ;;  %v3041_v18 = vmul.f32 %v3013_v24, %v3774_v36  ;;  %v3796_v37 = vld [vmem:[#allocation56_spill] sm:$0xff]  ;;  %v3802_v16 = vld [vmem:[#allocation58_spill] sm:$0xff] }
  0xc4   :  { %v506_v54 = vadd.f32 %v498_v33, %v2877_v58  ;;  %v3045_v32 = vadd.f32 %v2822_v40, %v566_v0  ;;  %v642_v41 = vmul.f32 %v3004_v20, %v3778_v3  ;;  %v700_v59 = vmul.f32 %v3013_v24, %v3778_v3  ;;  %v3067_v0 = vld [vmem:[#allocation10 + $0xd] ss:$0 sm:$0xff] }
  0xc5   :  { %v3053_v61 = vmul.f32 %v3030_v30, %v3778_v3  ;;  %v643_v29 = vmul.f32 %v3004_v20, %v3788_v47  ;;  %v3059_v36 = vmul.f32 %v3013_v24, %v3788_v47  ;;  %v644_v40 = vmul.f32 %v3004_v20, %v3791_v48  ;;  %3793 = vst [vmem:[#allocation69_spill] sm:$0xff] %v3067_v0 }
  0xc6   :  { %v3065_v58 = vmul.f32 %v3013_v24, %v3791_v48  ;;  %v567_v7 = vadd.f32 %v3794_v39, %v538_v25  ;;  %v507_v3 = vadd.f32 %v499_v10, %v2853_v1  ;;  %v3073_v33 = vmul.f32 %v3004_v20, %v3764_v35 }
  0xc7   :  { %v3077_v43 = vmul.f32 %v2928_v55, %v2420_v17  ;;  %v535_v52 = vadd.f32 %v3796_v37, %v506_v54  ;;  %v3082_v57 = vmul.f32 %v3013_v24, %v3764_v35  ;;  %v561_v2 = vadd.f32 %v2787_v46, %v532_v13  ;;  %v3799_v17 = vld [vmem:[#allocation72_spill] sm:$0xff] }
  0xc8   :  { %v562_v25 = vadd.f32 %v3797_v60, %v533_v19  ;;  %v646_v1 = vmul.f32 %v3004_v20, %v3772_v53  ;;  %v3091_v39 = vmul.f32 %v2928_v55, %v3067_v0  ;;  %v612_v54 = vmul.f32 %v3067_v0, %v3799_v17 }
  0xc9   :  { %3795 = vst [vmem:[#allocation47_spill] sm:$0xff] %v3077_v43  ;;  %v531_v10 = vadd.f32 %v3077_v43, %v502_v28  ;;  %v590_v37 = vadd.f32 %v2789_v14, %v561_v2  ;;  %v563_v13 = vadd.f32 %v3800_v50, %v534_v23  ;;  %v613_v60 = vmul.f32 %v3067_v0, %v3801_v4  ;;  %v3108_v2 = vld [vmem:[#allocation10 + $0xf] ss:$0 sm:$0xff]  ;;  %v3805_v23 = vld [vmem:[#allocation27_spill] sm:$0xff] }
  0xca   :  { %3798 = vst [vmem:[#allocation50_spill] sm:$0xff] %v3091_v39  ;;  %v591_v42 = vadd.f32 %v2792_v62, %v562_v25  ;;  %v596_v19 = vadd.f32 %v2834_v6, %v567_v7  ;;  %v536_v28 = vadd.f32 %v3802_v16, %v507_v3  ;;  %v3104_v22 = vmul.f32 %v3013_v24, %v3772_v53  ;;  %v3804_v25 = vld [vmem:[#allocation87_spill] sm:$0xff]  ;;  %v3115_v16 = vld [vmem:[#allocation10 + $0x11] ss:$0 sm:$0xff] }
  0xcb   :  { %v560_v27 = vadd.f32 %v2787_v46, %v531_v10  ;;  %v619_v5 = vadd.f32 %v3091_v39, %v590_v37  ;;  %3803 = vst [vmem:[#allocation18_spill] sm:$0xff] %v3108_v2  ;;  %v592_v50 = vadd.f32 %v3804_v25, %v563_v13  ;;  %v564_v45 = vadd.f32 %v3805_v23, %v535_v52  ;;  %v3807_v46 = vld [vmem:[#allocation74_spill] sm:$0xff]  ;;  %v3809_v25 = vld [vmem:[#allocation32_spill] sm:$0xff]  ;;  %v3810_v43 = vld [vmem:[#allocation75_spill] sm:$0xff] }
  0xcc   :  { %v620_v62 = vadd.f32 %v612_v54, %v591_v42  ;;  %v671_v6 = vmul.f32 %v3108_v2, %v3799_v17  ;;  %3806 = vst [vmem:[#allocation49_spill] sm:$0xff] %v3115_v16  ;;  %v672_v7 = vmul.f32 %v3108_v2, %v3801_v4  ;;  %v614_v3 = vmul.f32 %v3067_v0, %v3807_v46  ;;  %v3808_v54 = vld [vmem:[#allocation88_spill] sm:$0xff] }
  0xcd   :  { %v589_v8 = vadd.f32 %v2789_v14, %v560_v27  ;;  %v649_v10 = vadd.f32 %v641_v26, %v619_v5  ;;  %v621_v42 = vadd.f32 %v613_v60, %v592_v50  ;;  %v593_v13 = vadd.f32 %v3808_v54, %v564_v45  ;;  %v3127_v27 = vld [vmem:[#allocation10 + $0x13] ss:$0 sm:$0xff]  ;;  %v3812_v50 = vld [vmem:[#allocation76_spill] sm:$0xff] }
  0xce   :  { %v650_v37 = vadd.f32 %v642_v41, %v620_v62  ;;  %v3125_v14 = vmul.f32 %v2928_v55, %v3108_v2  ;;  %v565_v23 = vadd.f32 %v3809_v25, %v536_v28  ;;  %v615_v15 = vmul.f32 %v3067_v0, %v3810_v43  ;;  %v3811_v60 = vld [vmem:[#allocation89_spill] sm:$0xff] }
  0xcf   :  { %v618_v52 = vadd.f32 %v3091_v39, %v589_v8  ;;  %v679_v56 = vadd.f32 %v671_v6, %v649_v10  ;;  %v728_v5 = vmul.f32 %v3115_v16, %v3799_v17  ;;  %v622_v41 = vadd.f32 %v614_v3, %v593_v13 }
  0xd0   :  { %v680_v26 = vadd.f32 %v672_v7, %v650_v37  ;;  %v651_v8 = vadd.f32 %v643_v29, %v621_v42  ;;  %v594_v62 = vadd.f32 %v3811_v60, %v565_v23  ;;  %v616_v54 = vmul.f32 %v3067_v0, %v3812_v50 }
  0xd1   :  { %v648_v45 = vadd.f32 %v3027_v49, %v618_v52  ;;  %v708_v39 = vadd.f32 %v700_v59, %v679_v56  ;;  %v729_v28 = vmul.f32 %v3115_v16, %v3801_v4  ;;  %v788_v6 = vmul.f32 %v3127_v27, %v3801_v4  ;;  %v3813_v59 = vld [vmem:[#allocation77_spill] sm:$0xff] }
  0xd2   :  { %v673_v17 = vmul.f32 %v3108_v2, %v3807_v46  ;;  %v730_v29 = vmul.f32 %v3115_v16, %v3807_v46  ;;  %v623_v3 = vadd.f32 %v615_v15, %v594_v62  ;;  %v624_v10 = vadd.f32 %v616_v54, %v3045_v32 }
  0xd3   :  { %v678_v7 = vadd.f32 %v3125_v14, %v648_v45  ;;  %v737_v37 = vadd.f32 %v729_v28, %v708_v39  ;;  %v652_v42 = vadd.f32 %v644_v40, %v622_v41  ;;  %v674_v56 = vmul.f32 %v3108_v2, %v3810_v43  ;;  %v3814_v40 = vld [vmem:[#allocation80_spill] sm:$0xff] }
  0xd4   :  { %v617_v13 = vmul.f32 %v3067_v0, %v3813_v59  ;;  %v709_v52 = vadd.f32 %v3059_v36, %v680_v26  ;;  %v3154_v25 = vadd.f32 %v673_v17, %v651_v8  ;;  %v3158_v23 = vmul.f32 %v3115_v16, %v3810_v43  ;;  %v3815_v36 = vld [vmem:[#allocation81_spill] sm:$0xff] }
  0xd5   :  { %v707_v4 = vadd.f32 %v3041_v18, %v678_v7  ;;  %v676_v15 = vmul.f32 %v3108_v2, %v3813_v59  ;;  %v647_v39 = vmul.f32 %v3004_v20, %v3814_v40  ;;  %v654_v41 = vadd.f32 %v646_v1, %v624_v10  ;;  %v3184_v7 = vld [vmem:[#allocation10 + $0x14] ss:$0 sm:$0xff] }
  0xd6   :  { %v625_v32 = vadd.f32 %v617_v13, %v596_v19  ;;  %v653_v60 = vadd.f32 %v3073_v33, %v623_v3  ;;  %v675_v18 = vmul.f32 %v3108_v2, %v3812_v50  ;;  %v677_v26 = vmul.f32 %v3108_v2, %v3815_v36 }
  0xd7   :  { %v736_v45 = vadd.f32 %v728_v5, %v707_v4  ;;  %v3169_v8 = vadd.f32 %v674_v56, %v652_v42  ;;  %v684_v54 = vadd.f32 %v676_v15, %v654_v41  ;;  %v705_v19 = vmul.f32 %v3013_v24, %v3814_v40  ;;  %v3816_v5 = vld [vmem:[#allocation83_spill] sm:$0xff]  ;;  %v3817_v42 = vld [vmem:[#allocation85_spill] sm:$0xff] }
  0xd8   :  { %v655_v62 = vadd.f32 %v647_v39, %v625_v32  ;;  %v3176_v1 = vmul.f32 %v3115_v16, %v3812_v50  ;;  %v3180_v33 = vmul.f32 %v3115_v16, %v3813_v59  ;;  %v706_v17 = vmul.f32 %v3013_v24, %v3816_v5 }
  0xd9   :  { %v766_v28 = vadd.f32 %v3053_v61, %v736_v45  ;;  %v713_v3 = vadd.f32 %v705_v19, %v684_v54  ;;  %v734_v10 = vmul.f32 %v3115_v16, %v3815_v36  ;;  %v735_v61 = vmul.f32 %v3115_v16, %v3817_v42 }
  0xda   :  { %v685_v56 = vadd.f32 %v677_v26, %v655_v62  ;;  %v3190_v13 = vadd.f32 %v675_v18, %v653_v60  ;;  %v3194_v4 = vmul.f32 %v3030_v30, %v3814_v40  ;;  %v764_v15 = vmul.f32 %v3030_v30, %v3816_v5  ;;  %v1939_v62 = vld [vmem:[#allocation8 + $0x10] sm:$0xff] }
  0xdb   :  { %v3200_v32 = vmul.f32 %v2928_v55, %v3030_v30  ;;  %v742_v41 = vadd.f32 %v734_v10, %v713_v3  ;;  %v796_v45 = vadd.f32 %v788_v6, %v766_v28  ;;  %v818_v54 = vmul.f32 %v3184_v7, %v3788_v47  ;;  %v3215_v6 = vld [vmem:[#allocation10 + $0x18] ss:$0 sm:$0xff] }
  0xdc   :  { %v714_v39 = vadd.f32 %v706_v17, %v685_v56  ;;  %v3206_v60 = vmul.f32 %v3127_v27, %v3815_v36  ;;  %v3210_v18 = vmul.f32 %v2928_v55, %v3127_v27  ;;  %v848_v26 = vmul.f32 %v2996_v44, %v3768_v31 }
  0xdd   :  { %3818 = vst [vmem:[#allocation62_spill] sm:$0xff] %v3200_v32  ;;  %v878_v19 = vmul.f32 %v1939_v62, %v3007_v12  ;;  %v772_v3 = vadd.f32 %v764_v15, %v742_v41  ;;  %v826_v28 = vadd.f32 %v818_v54, %v796_v45  ;;  %v759_v10 = vmul.f32 %v3030_v30, %v3788_v47 }
  0xde   :  { %v743_v17 = vadd.f32 %v735_v61, %v714_v39  ;;  %v3221_v56 = vmul.f32 %v3184_v7, %v3816_v5  ;;  %v794_v0 = vmul.f32 %v3127_v27, %v3817_v42  ;;  %v3227_v31 = vmul.f32 %v2928_v55, %v3184_v7 }
  0xdf   :  { %v3231_v61 = vmul.f32 %v2928_v55, %v3215_v6  ;;  %v856_v39 = vadd.f32 %v848_v26, %v826_v28  ;;  %v767_v41 = vadd.f32 %v759_v10, %v737_v37  ;;  %v789_v47 = vmul.f32 %v3127_v27, %v3807_v46  ;;  %v3819_v26 = vld [vmem:[#allocation20_spill] sm:$0xff]  ;;  %v1940_v28 = vld [vmem:[#allocation8 + $0x18] sm:$0xff] }
  0xe0   :  { %v773_v15 = vadd.f32 %v3200_v32, %v743_v17  ;;  %v908_v5 = vmul.f32 %v3011_v34, %v2334_v63  ;;  %v938_v45 = vmul.f32 %v3215_v6, %v3807_v46  ;;  %v738_v54 = vadd.f32 %v730_v29, %v709_v52 }
  0xe1   :  { %v760_v62 = vmul.f32 %v3030_v30, %v3791_v48  ;;  %v886_v20 = vadd.f32 %v878_v19, %v856_v39  ;;  %v797_v16 = vadd.f32 %v789_v47, %v767_v41  ;;  %v819_v37 = vmul.f32 %v3184_v7, %v3791_v48  ;;  %v954_v19 = vld [vmem:[#allocation5] sm:$0xff] }
  0xe2   :  { %v803_v2 = vadd.f32 %v3210_v18, %v773_v15  ;;  %v849_v17 = vmul.f32 %v2996_v44, %v3819_v26  ;;  %v879_v63 = vmul.f32 %v1940_v28, %v3007_v12  ;;  %v790_v46 = vmul.f32 %v3127_v27, %v3810_v43  ;;  %v3820_v26 = vld [vmem:[#allocation23_spill] sm:$0xff] }
  0xe3   :  { %v768_v10 = vadd.f32 %v760_v62, %v738_v54  ;;  %v802_v29 = vadd.f32 %v794_v0, %v772_v3  ;;  %v916_v32 = vadd.f32 %v908_v5, %v886_v20  ;;  %v827_v15 = vadd.f32 %v819_v37, %v797_v16  ;;  %v1941_v3 = vld [vmem:[#allocation8 + $0x20] sm:$0xff] }
  0xe4   :  { %v833_v52 = vadd.f32 %v3227_v31, %v803_v2  ;;  %v909_v39 = vmul.f32 %v3011_v34, %v2353_v9  ;;  %v820_v41 = vmul.f32 %v3184_v7, %v3764_v35  ;;  %v710_v47 = vadd.f32 %v3065_v58, %v3154_v25 }
  0xe5   :  { %v798_v48 = vadd.f32 %v790_v46, %v768_v10  ;;  %v946_v54 = vadd.f32 %v938_v45, %v916_v32  ;;  %v857_v62 = vadd.f32 %v849_v17, %v827_v15  ;;  %v850_v0 = vmul.f32 %v2996_v44, %v3820_v26  ;;  %v3821_v45 = vld [vmem:[#allocation26_spill] sm:$0xff] }
  0xe6   :  { %v880_v20 = vmul.f32 %v1941_v3, %v3007_v12  ;;  %v863_v2 = vadd.f32 %v3001_v11, %v833_v52  ;;  %v739_v9 = vadd.f32 %v3158_v23, %v710_v47  ;;  %v761_v5 = vmul.f32 %v3030_v30, %v3764_v35  ;;  %v955_v52 = vld [vmem:[#allocation5 + $0x8] sm:$0xff] }
  0xe7   :  { %v828_v16 = vadd.f32 %v820_v41, %v798_v48  ;;  %v832_v37 = vadd.f32 %v3227_v31, %v802_v29  ;;  %v962_v28 = vmul.f32 %v954_v19, %v946_v54  ;;  %v887_v58 = vadd.f32 %v879_v63, %v857_v62  ;;  %v1942_v47 = vld [vmem:[#allocation8 + $0x28] sm:$0xff] }
  0xe8   :  { %v939_v25 = vmul.f32 %v3215_v6, %v3810_v43  ;;  %v910_v17 = vmul.f32 %v3011_v34, %v3821_v45  ;;  %v769_v10 = vadd.f32 %v761_v5, %v739_v9  ;;  %v791_v46 = vmul.f32 %v3127_v27, %v3812_v50  ;;  %v3823_v5 = vld [vmem:[#allocation25_spill] sm:$0xff] }
  0xe9   :  { %v858_v32 = vadd.f32 %v850_v0, %v828_v16  ;;  %970 = vst [vmem:[#allocation11] sm:$0xff] %v962_v28  ;;  %v917_v23 = vadd.f32 %v909_v39, %v887_v58  ;;  %v940_v35 = vmul.f32 %v3215_v6, %v3812_v50  ;;  %v821_v29 = vmul.f32 %v3184_v7, %v3772_v53  ;;  %v3292_v16 = vld [vmem:[#allocation10 + $0xb] ss:$0 sm:$0xff]  ;;  %v1943_v58 = vld [vmem:[#allocation8 + $0x30] sm:$0xff] }
  0xea   :  { %v711_v63 = vadd.f32 %v3082_v57, %v3169_v8  ;;  %v893_v43 = vadd.f32 %v3019_v21, %v863_v2  ;;  %v799_v19 = vadd.f32 %v791_v46, %v769_v10  ;;  %v851_v48 = vmul.f32 %v2996_v44, %v3787_v38  ;;  %v3822_v57 = vld [vmem:[#allocation29_spill] sm:$0xff] }
  0xeb   :  { %v888_v15 = vadd.f32 %v880_v20, %v858_v32  ;;  %v947_v41 = vadd.f32 %v939_v25, %v917_v23  ;;  %v881_v39 = vmul.f32 %v1942_v47, %v3007_v12  ;;  %v762_v54 = vmul.f32 %v3030_v30, %v3772_v53  ;;  %v956_v20 = vld [vmem:[#allocation5 + $0x10] sm:$0xff]  ;;  %v3825_v23 = vld [vmem:[#allocation35_spill] sm:$0xff]  ;;  %v957_v47 = vld [vmem:[#allocation5 + $0x18] sm:$0xff] }
  0xec   :  { %v740_v50 = vadd.f32 %v3176_v1, %v711_v63  ;;  %v829_v26 = vadd.f32 %v821_v29, %v799_v19  ;;  %v911_v8 = vmul.f32 %v3011_v34, %v3822_v57  ;;  %v792_v0 = vmul.f32 %v3127_v27, %v3813_v59  ;;  %v3824_v46 = vld [vmem:[#allocation65_spill] sm:$0xff]  ;;  %v3826_v19 = vld [vmem:[#allocation47_spill] sm:$0xff]  ;;  %v3828_v57 = vld [vmem:[#allocation36_spill] sm:$0xff] }
  0xed   :  { %v918_v62 = vadd.f32 %v910_v17, %v888_v15  ;;  %v963_v3 = vmul.f32 %v955_v52, %v947_v41  ;;  %v822_v2 = vmul.f32 %v3184_v7, %v3814_v40  ;;  %v712_v1 = vadd.f32 %v3104_v22, %v3190_v13  ;;  %v961_v13 = vld [vmem:[#allocation5 + $0x38] sm:$0xff] }
  0xee   :  { %v770_v38 = vadd.f32 %v762_v54, %v740_v50  ;;  %v859_v9 = vadd.f32 %v851_v48, %v829_v26  ;;  %v852_v28 = vmul.f32 %v2996_v44, %v3823_v5  ;;  %v882_v25 = vmul.f32 %v1943_v58, %v3007_v12  ;;  %v3827_v54 = vld [vmem:[#allocation43_spill] sm:$0xff] }
  0xef   :  { %v948_v53 = vadd.f32 %v940_v35, %v918_v62  ;;  %971 = vst [vmem:[#allocation11 + $0x8] sm:$0xff] %v963_v3  ;;  %v741_v45 = vadd.f32 %v3180_v33, %v712_v1  ;;  %v862_v17 = vadd.f32 %v3001_v11, %v832_v37  ;;  %v923_v40 = vadd.f32 %v3023_v51, %v893_v43  ;;  %v3309_v11 = vld [vmem:[#allocation10 + $0xc] ss:$0 sm:$0xff]  ;;  %v3325_v3 = vld [vmem:[#allocation2 + $0x10] sm:$0xff] }
  0xf0   :  { %v800_v32 = vadd.f32 %v792_v0, %v770_v38  ;;  %v889_v22 = vadd.f32 %v881_v39, %v859_v9  ;;  %v1393_v35 = vadd.f32 %v3825_v23, %v3824_v46  ;;  %v3304_v29 = vmul.f32 %v2928_v55, %v3292_v16  ;;  %v1944_v38 = vld [vmem:[#allocation8 + $0x38] sm:$0xff] }
  0xf1   :  { %v964_v10 = vmul.f32 %v956_v20, %v948_v53  ;;  %v771_v52 = vadd.f32 %v3194_v4, %v741_v45  ;;  %v892_v15 = vadd.f32 %v3019_v21, %v862_v17  ;;  %v953_v33 = vadd.f32 %v3231_v61, %v923_v40  ;;  %v3831_v53 = vld [vmem:[#allocation33_spill] sm:$0xff]  ;;  %v3832_v9 = vld [vmem:[#allocation86_spill] sm:$0xff] }
  0xf2   :  { %v830_v63 = vadd.f32 %v822_v2, %v800_v32  ;;  %v919_v37 = vadd.f32 %v911_v8, %v889_v22  ;;  %v941_v43 = vmul.f32 %v3215_v6, %v3813_v59  ;;  %v1422_v48 = vadd.f32 %v1393_v35, %v3826_v19  ;;  %v960_v8 = vld [vmem:[#allocation5 + $0x30] sm:$0xff]  ;;  %v3829_v2 = vld [vmem:[#allocation46_spill] sm:$0xff] }
  0xf3   :  { %972 = vst [vmem:[#allocation11 + $0x10] sm:$0xff] %v964_v10  ;;  %v3316_v41 = vmul.f32 %v2928_v55, %v3309_v11  ;;  %v801_v4 = vadd.f32 %v3206_v60, %v771_v52  ;;  %v922_v21 = vadd.f32 %v3023_v51, %v892_v15  ;;  %v969_v50 = vmul.f32 %v961_v13, %v953_v33  ;;  %v3833_v10 = vld [vmem:[#allocation48_spill] sm:$0xff]  ;;  %v3348_v35 = vld [vmem:[#allocation2 + $0x30] sm:$0xff]  ;;  %v3835_v52 = vld [vmem:[#allocation50_spill] sm:$0xff] }
  0xf4   :  { %v860_v39 = vadd.f32 %v852_v28, %v830_v63  ;;  %v853_v62 = vmul.f32 %v2996_v44, %v3827_v54  ;;  %v949_v26 = vadd.f32 %v941_v43, %v919_v37  ;;  %v912_v59 = vmul.f32 %v3011_v34, %v3828_v57  ;;  %v3830_v44 = vld [vmem:[#allocation42_spill] sm:$0xff]  ;;  %v3834_v13 = vld [vmem:[#allocation28_spill] sm:$0xff]  ;;  %v958_v63 = vld [vmem:[#allocation5 + $0x20] sm:$0xff] }
  0xf5   :  { %v1451_v0 = vadd.f32 %v3304_v29, %v1422_v48  ;;  %v831_v20 = vadd.f32 %v3221_v56, %v801_v4  ;;  %v883_v60 = vmul.f32 %v1944_v38, %v3007_v12  ;;  %v952_v51 = vadd.f32 %v3231_v61, %v922_v21  ;;  %977 = vst [vmem:[#allocation11 + $0x38] sm:$0xff] %v969_v50  ;;  %v3334_v28 = vld [vmem:[#allocation2 + $0x18] sm:$0xff]  ;;  %v3339_v56 = vld [vmem:[#allocation2 + $0x28] sm:$0xff]  ;;  %v3836_v33 = vld [vmem:[#allocation41_spill] sm:$0xff] }
  0xf6   :  { %v890_v55 = vadd.f32 %v882_v25, %v860_v39  ;;  %v1366_v1 = vadd.f32 %v3830_v44, %v3829_v2  ;;  %v1359_v5 = vmul.f32 %v3832_v9, %v3831_v53  ;;  %v965_v58 = vmul.f32 %v957_v47, %v949_v26  ;;  %v3337_v25 = vld [vmem:[#allocation2 + $0x20] sm:$0xff]  ;;  %v3357_v43 = vld [vmem:[#allocation2 + $0x38] sm:$0xff]  ;;  %v1605_v50 = vld [vmem:[#allocation2 + $0x190] sm:$0xff] }
  0xf7   :  { %v1480_v32 = vadd.f32 %v3316_v41, %v1451_v0  ;;  %v942_v12 = vmul.f32 %v3215_v6, %v3815_v36  ;;  %v861_v17 = vadd.f32 %v853_v62, %v831_v20  ;;  %v968_v40 = vmul.f32 %v960_v8, %v952_v51  ;;  %v3837_v47 = vld [vmem:[#allocation51_spill] sm:$0xff]  ;;  %v3370_v54 = vld [vmem:[#allocation2 + $0x198] sm:$0xff]  ;;  %v3838_v62 = vld [vmem:[#allocation52_spill] sm:$0xff] }
  0xf8   :  { %v920_v45 = vadd.f32 %v912_v59, %v890_v55  ;;  %v3344_v22 = vadd.f32 %v1359_v5, %v3833_v10  ;;  %v1387_v23 = vmul.f32 %v3834_v13, %v3325_v3  ;;  %973 = vst [vmem:[#allocation11 + $0x18] sm:$0xff] %v965_v58  ;;  %v1394_v37 = vadd.f32 %v3836_v33, %v3824_v46  ;;  %v959_v0 = vld [vmem:[#allocation5 + $0x28] sm:$0xff]  ;;  %v3379_v55 = vld [vmem:[#allocation10 + $0x15] ss:$0 sm:$0xff]  ;;  %v3388_v51 = vld [vmem:[#allocation10 + $0x16] ss:$0 sm:$0xff] }
  0xf9   :  { %v1509_v15 = vadd.f32 %v1480_v32, %v3835_v52  ;;  %v3355_v36 = vmul.f32 %v3834_v13, %v3334_v28  ;;  %v891_v48 = vadd.f32 %v883_v60, %v861_v17  ;;  %v913_v39 = vmul.f32 %v3011_v34, %v3837_v47  ;;  %976 = vst [vmem:[#allocation11 + $0x30] sm:$0xff] %v968_v40  ;;  %v1721_v60 = vld [vmem:[#allocation2 + $0x80] sm:$0xff]  ;;  %v3839_v53 = vld [vmem:[#allocation49_spill] sm:$0xff]  ;;  %v3840_v47 = vld [vmem:[#allocation68_spill] sm:$0xff] }
  0xfa   :  { %v950_v19 = vadd.f32 %v942_v12, %v920_v45  ;;  %v3363_v4 = vmul.f32 %v3834_v13, %v3337_v25  ;;  %v3367_v21 = vmul.f32 %v3834_v13, %v3339_v56  ;;  %v1423_v26 = vadd.f32 %v1394_v37, %v3838_v62  ;;  %v1750_v2 = vld [vmem:[#allocation2 + $0xe0] sm:$0xff]  ;;  %v1945_v40 = vld [vmem:[#allocation2 + $0xd0] sm:$0xff]  ;;  %v3842_v62 = vld [vmem:[#allocation18_spill] sm:$0xff] }
  0xfb   :  { %v1538_v46 = vadd.f32 %v1509_v15, %v3027_v49  ;;  %v3375_v57 = vmul.f32 %v3834_v13, %v3348_v35  ;;  %v921_v59 = vadd.f32 %v913_v39, %v891_v48  ;;  %v943_v8 = vmul.f32 %v3215_v6, %v3817_v42  ;;  %v3398_v45 = vld [vmem:[#allocation2 + $0x140] sm:$0xff] }
  0xfc   :  { %v966_v34 = vmul.f32 %v958_v63, %v950_v19  ;;  %v3383_v49 = vmul.f32 %v3834_v13, %v3357_v43  ;;  %v1588_v38 = vmul.f32 %v3013_v24, %v3325_v3  ;;  %v1452_v44 = vadd.f32 %v3304_v29, %v1423_v26  ;;  %v3400_v12 = vld [vmem:[#allocation2 + $0x1a0] sm:$0xff]  ;;  %v1462_v13 = vld [vmem:[#allocation2 + $0x130] sm:$0xff] }
  0xfd   :  { %v1567_v20 = vadd.f32 %v1538_v46, %v3125_v14  ;;  %v951_v42 = vadd.f32 %v943_v8, %v921_v59  ;;  %v1617_v9 = vmul.f32 %v3839_v53, %v1605_v50  ;;  %v1646_v5 = vmul.f32 %v3030_v30, %v3334_v28  ;;  %v3396_v14 = vld [vmem:[#allocation10 + $0x17] ss:$0 sm:$0xff] }
  0xfe   :  { %974 = vst [vmem:[#allocation11 + $0x20] sm:$0xff] %v966_v34  ;;  %v1675_v58 = vmul.f32 %v3127_v27, %v3370_v54  ;;  %v1481_v17 = vadd.f32 %v3316_v41, %v1452_v44  ;;  %v1395_v29 = vadd.f32 %v1387_v23, %v1366_v1  ;;  %v1445_v10 = vmul.f32 %v1945_v40, %v3292_v16  ;;  %v3841_v41 = vld [vmem:[#allocation70_spill] sm:$0xff] }
  0xff   :  { %v1596_v32 = vadd.f32 %v1588_v38, %v1567_v20  ;;  %v967_v63 = vmul.f32 %v959_v0, %v951_v42  ;;  %v1704_v15 = vmul.f32 %v3184_v7, %v3337_v25  ;;  %v1733_v33 = vmul.f32 %v3379_v55, %v1721_v60  ;;  %v1722_v0 = vld [vmem:[#allocation2 + $0x88] sm:$0xff]  ;;  %v3843_v20 = vld [vmem:[#allocation69_spill] sm:$0xff] }
 0x100   :  { %v1762_v37 = vmul.f32 %v3388_v51, %v1750_v2  ;;  %v1510_v48 = vadd.f32 %v1481_v17, %v3835_v52  ;;  %v1531_v39 = vmul.f32 %v3840_v47, %v3325_v3  ;;  %v1424_v1 = vadd.f32 %v3841_v41, %v1395_v29 }
 0x101   :  { %v1625_v19 = vadd.f32 %v1617_v9, %v1596_v32  ;;  %975 = vst [vmem:[#allocation11 + $0x28] sm:$0xff] %v967_v63  ;;  %v1791_v23 = vmul.f32 %v3396_v14, %v3398_v45  ;;  %v1820_v46 = vmul.f32 %v3215_v6, %v3400_v12  ;;  %v1560_v26 = vmul.f32 %v3842_v62, %v1605_v50 }
 0x102   :  { %v1474_v34 = vmul.f32 %v3309_v11, %v1462_v13  ;;  %v1539_v8 = vadd.f32 %v1531_v39, %v1510_v48  ;;  %v1453_v52 = vadd.f32 %v1445_v10, %v1424_v1  ;;  %v1503_v38 = vmul.f32 %v3843_v20, %v1605_v50  ;;  %v1463_v50 = vld [vmem:[#allocation2 + $0x138] sm:$0xff]  ;;  %v3435_v48 = vld [vmem:[#allocation2 + $0x148] sm:$0xff] }
 0x103   :  { %v1654_v59 = vadd.f32 %v1646_v5, %v1625_v19  ;;  %v1589_v3 = vmul.f32 %v3013_v24, %v3334_v28  ;;  %v1618_v60 = vmul.f32 %v3839_v53, %v3370_v54  ;;  %v1647_v2 = vmul.f32 %v3030_v30, %v3337_v25  ;;  %v1751_v5 = vld [vmem:[#allocation2 + $0xe8] sm:$0xff]  ;;  %v1946_v13 = vld [vmem:[#allocation2 + $0xd8] sm:$0xff] }
 0x104   :  { %v1676_v44 = vmul.f32 %v3127_v27, %v3400_v12  ;;  %v1568_v9 = vadd.f32 %v1560_v26, %v1539_v8  ;;  %v1482_v32 = vadd.f32 %v1474_v34, %v1453_v52  ;;  %v1396_v17 = vadd.f32 %v3355_v36, %v3344_v22  ;;  %v3437_v39 = vld [vmem:[#allocation2 + $0x1a8] sm:$0xff]  ;;  %v3844_v22 = vld [vmem:[#allocation71_spill] sm:$0xff] }
 0x105   :  { %v1683_v42 = vadd.f32 %v1675_v58, %v1654_v59  ;;  %v1705_v29 = vmul.f32 %v3184_v7, %v3339_v56  ;;  %v1734_v40 = vmul.f32 %v3379_v55, %v1722_v0  ;;  %v1532_v10 = vmul.f32 %v3840_v47, %v3334_v28 }
 0x106   :  { %v1446_v63 = vmul.f32 %v1946_v13, %v3292_v16  ;;  %v1597_v58 = vadd.f32 %v1589_v3, %v1568_v9  ;;  %v1511_v41 = vadd.f32 %v1503_v38, %v1482_v32  ;;  %v1425_v36 = vadd.f32 %v3844_v22, %v1396_v17  ;;  %v3845_v17 = vld [vmem:[#allocation59_spill] sm:$0xff] }
 0x107   :  { %v1712_v19 = vadd.f32 %v1704_v15, %v1683_v42  ;;  %v1763_v1 = vmul.f32 %v3388_v51, %v1751_v5  ;;  %v1561_v26 = vmul.f32 %v3842_v62, %v3370_v54  ;;  %v1475_v34 = vmul.f32 %v3309_v11, %v1463_v50 }
 0x108   :  { %v1504_v28 = vmul.f32 %v3843_v20, %v3370_v54  ;;  %v1626_v15 = vadd.f32 %v1618_v60, %v1597_v58  ;;  %v1540_v8 = vadd.f32 %v1532_v10, %v1511_v41  ;;  %v1454_v0 = vadd.f32 %v1446_v63, %v1425_v36  ;;  %v1947_v10 = vld [vmem:[#allocation2 + $0xe0] sm:$0xff]  ;;  %v3846_v36 = vld [vmem:[#allocation78_spill] sm:$0xff] }
 0x109   :  { %v1741_v59 = vadd.f32 %v1733_v33, %v1712_v19  ;;  %v1792_v52 = vmul.f32 %v3396_v14, %v3435_v48  ;;  %v1821_v38 = vmul.f32 %v3215_v6, %v3437_v39  ;;  %v1590_v3 = vmul.f32 %v3013_v24, %v3337_v25 }
 0x10a   :  { %v1619_v42 = vmul.f32 %v3839_v53, %v3400_v12  ;;  %v1655_v5 = vadd.f32 %v1647_v2, %v1626_v15  ;;  %v1569_v32 = vadd.f32 %v1561_v26, %v1540_v8  ;;  %v1483_v54 = vadd.f32 %v1475_v34, %v1454_v0  ;;  %v1723_v15 = vld [vmem:[#allocation2 + $0x90] sm:$0xff] }
 0x10b   :  { %v1770_v9 = vadd.f32 %v1762_v37, %v1741_v59  ;;  %v1648_v33 = vmul.f32 %v3030_v30, %v3339_v56  ;;  %v1533_v60 = vmul.f32 %v3840_v47, %v3337_v25  ;;  %v1397_v50 = vadd.f32 %v3363_v4, %v3845_v17  ;;  %v1837_v37 = vld [vmem:[#allocation5 + $0x40] sm:$0xff] }
 0x10c   :  { %v1447_v13 = vmul.f32 %v1947_v10, %v3292_v16  ;;  %v1684_v19 = vadd.f32 %v1676_v44, %v1655_v5  ;;  %v1598_v58 = vadd.f32 %v1590_v3, %v1569_v32  ;;  %v1512_v41 = vadd.f32 %v1504_v28, %v1483_v54  ;;  %v3468_v44 = vld [vmem:[#allocation2 + $0x150] sm:$0xff]  ;;  %v1522_v54 = vld [vmem:[#allocation2 + $0x28] sm:$0xff] }
 0x10d   :  { %v1799_v63 = vadd.f32 %v1791_v23, %v1770_v9  ;;  %v1677_v2 = vmul.f32 %v3127_v27, %v3437_v39  ;;  %v1706_v22 = vmul.f32 %v3184_v7, %v3348_v35  ;;  %v1562_v25 = vmul.f32 %v3842_v62, %v3400_v12  ;;  %v1752_v23 = vld [vmem:[#allocation2 + $0xf0] sm:$0xff] }
 0x10e   :  { %v1426_v26 = vadd.f32 %v3846_v36, %v1397_v50  ;;  %v1713_v34 = vadd.f32 %v1705_v29, %v1684_v19  ;;  %v1627_v59 = vadd.f32 %v1619_v42, %v1598_v58  ;;  %v1541_v28 = vadd.f32 %v1533_v60, %v1512_v41  ;;  %v3476_v29 = vld [vmem:[#allocation2 + $0x1b0] sm:$0xff]  ;;  %v3847_v36 = vld [vmem:[#allocation39_spill] sm:$0xff] }
 0x10f   :  { %v1828_v4 = vadd.f32 %v1820_v46, %v1799_v63  ;;  %v1591_v8 = vmul.f32 %v3013_v24, %v3339_v56  ;;  %v1476_v3 = vmul.f32 %v3309_v11, %v3398_v45  ;;  %v1505_v9 = vmul.f32 %v3843_v20, %v3400_v12 }
 0x110   :  { %v1455_v0 = vadd.f32 %v1447_v13, %v1426_v26  ;;  %v1742_v32 = vadd.f32 %v1734_v40, %v1713_v34  ;;  %v1656_v46 = vadd.f32 %v1648_v33, %v1627_v59  ;;  %v1570_v42 = vadd.f32 %v1562_v25, %v1541_v28  ;;  %v1580_v25 = vld [vmem:[#allocation2 + $0x30] sm:$0xff]  ;;  %v1948_v34 = vld [vmem:[#allocation2 + $0xe8] sm:$0xff]  ;;  %v3848_v28 = vld [vmem:[#allocation79_spill] sm:$0xff] }
 0x111   :  { %v1845_v5 = vmul.f32 %v1837_v37, %v1828_v4  ;;  %v1735_v17 = vmul.f32 %v3379_v55, %v1723_v15  ;;  %v1764_v60 = vmul.f32 %v3388_v51, %v1752_v23  ;;  %v1793_v56 = vmul.f32 %v3396_v14, %v3468_v44 }
 0x112   :  { %v1484_v50 = vadd.f32 %v1476_v3, %v1455_v0  ;;  %v1771_v45 = vadd.f32 %v1763_v1, %v1742_v32  ;;  %v1685_v10 = vadd.f32 %v1677_v2, %v1656_v46  ;;  %v1599_v13 = vadd.f32 %v1591_v8, %v1570_v42  ;;  %v1838_v2 = vld [vmem:[#allocation5 + $0x48] sm:$0xff]  ;;  %v1753_v0 = vld [vmem:[#allocation2 + $0xf8] sm:$0xff] }
 0x113   :  { %1854 = vst [vmem:[#allocation11 + $0x40] sm:$0xff] %v1845_v5  ;;  %v1620_v12 = vmul.f32 %v3839_v53, %v3437_v39  ;;  %v1649_v40 = vmul.f32 %v3030_v30, %v3348_v35  ;;  %v1678_v33 = vmul.f32 %v3127_v27, %v3476_v29  ;;  %v1534_v19 = vmul.f32 %v3840_v47, %v1522_v54  ;;  %v3502_v42 = vld [vmem:[#allocation2 + $0x158] sm:$0xff] }
 0x114   :  { %v1513_v63 = vadd.f32 %v1505_v9, %v1484_v50  ;;  %v1800_v58 = vadd.f32 %v1792_v52, %v1771_v45  ;;  %v1714_v41 = vadd.f32 %v1706_v22, %v1685_v10  ;;  %v1398_v1 = vadd.f32 %v3367_v21, %v3847_v36  ;;  %v1724_v22 = vld [vmem:[#allocation2 + $0x98] sm:$0xff]  ;;  %v3520_v36 = vld [vmem:[#allocation2 + $0x40] sm:$0xff] }
 0x115   :  { %v1628_v37 = vadd.f32 %v1620_v12, %v1599_v13  ;;  %v1707_v26 = vmul.f32 %v3184_v7, %v3357_v43  ;;  %v1563_v35 = vmul.f32 %v3842_v62, %v3437_v39  ;;  %v1448_v59 = vmul.f32 %v1948_v34, %v3292_v16  ;;  %v3506_v54 = vld [vmem:[#allocation2 + $0x38] sm:$0xff]  ;;  %v3849_v34 = vld [vmem:[#allocation45_spill] sm:$0xff] }
 0x116   :  { %v1542_v4 = vadd.f32 %v1534_v19, %v1513_v63  ;;  %v1829_v15 = vadd.f32 %v1821_v38, %v1800_v58  ;;  %v1743_v23 = vadd.f32 %v1735_v17, %v1714_v41  ;;  %v1427_v8 = vadd.f32 %v3848_v28, %v1398_v1  ;;  %v3504_v38 = vld [vmem:[#allocation2 + $0x1b8] sm:$0xff] }
 0x117   :  { %v1657_v52 = vadd.f32 %v1649_v40, %v1628_v37  ;;  %v1592_v21 = vmul.f32 %v3013_v24, %v1580_v25  ;;  %v1477_v43 = vmul.f32 %v3309_v11, %v3435_v48  ;;  %v1506_v9 = vmul.f32 %v3843_v20, %v3437_v39  ;;  %v1839_v40 = vld [vmem:[#allocation5 + $0x50] sm:$0xff] }
 0x118   :  { %v1571_v3 = vadd.f32 %v1563_v35, %v1542_v4  ;;  %v1846_v5 = vmul.f32 %v1838_v2, %v1829_v15  ;;  %v1772_v32 = vadd.f32 %v1764_v60, %v1743_v23  ;;  %v1456_v17 = vadd.f32 %v1448_v59, %v1427_v8  ;;  %v1754_v35 = vld [vmem:[#allocation2 + $0x100] sm:$0xff]  ;;  %v1949_v15 = vld [vmem:[#allocation2 + $0xf0] sm:$0xff] }
 0x119   :  { %v1686_v46 = vadd.f32 %v1678_v33, %v1657_v52  ;;  %v1822_v50 = vmul.f32 %v3215_v6, %v3476_v29  ;;  %v1736_v45 = vmul.f32 %v3379_v55, %v1724_v22  ;;  %v1621_v48 = vmul.f32 %v3839_v53, %v3476_v29 }
 0x11a   :  { %v1600_v10 = vadd.f32 %v1592_v21, %v1571_v3  ;;  %1855 = vst [vmem:[#allocation11 + $0x48] sm:$0xff] %v1846_v5  ;;  %v1801_v39 = vadd.f32 %v1793_v56, %v1772_v32  ;;  %v1765_v13 = vmul.f32 %v3388_v51, %v1753_v0  ;;  %v1485_v12 = vadd.f32 %v1477_v43, %v1456_v17  ;;  %v1725_v56 = vld [vmem:[#allocation2 + $0xa0] sm:$0xff]  ;;  %v3850_v43 = vld [vmem:[#allocation82_spill] sm:$0xff] }
 0x11b   :  { %v1715_v60 = vadd.f32 %v1707_v26, %v1686_v46  ;;  %v1794_v33 = vmul.f32 %v3396_v14, %v3502_v42  ;;  %v1823_v63 = vmul.f32 %v3215_v6, %v3504_v38  ;;  %v1650_v58 = vmul.f32 %v3030_v30, %v3506_v54  ;;  %v1783_v21 = vld [vmem:[#allocation2 + $0x160] sm:$0xff] }
 0x11c   :  { %v1629_v19 = vadd.f32 %v1621_v48, %v1600_v10  ;;  %v1830_v41 = vadd.f32 %v1822_v50, %v1801_v39  ;;  %v1514_v1 = vadd.f32 %v1506_v9, %v1485_v12  ;;  %v1535_v2 = vmul.f32 %v3840_v47, %v1580_v25  ;;  %v1812_v32 = vld [vmem:[#allocation2 + $0x1c0] sm:$0xff]  ;;  %v1840_v50 = vld [vmem:[#allocation5 + $0x58] sm:$0xff] }
 0x11d   :  { %v1744_v37 = vadd.f32 %v1736_v45, %v1715_v60  ;;  %v1679_v4 = vmul.f32 %v3127_v27, %v3504_v38  ;;  %v1399_v59 = vadd.f32 %v3375_v57, %v3849_v34  ;;  %v1449_v23 = vmul.f32 %v1949_v15, %v3292_v16  ;;  %v3852_v34 = vld [vmem:[#allocation84_spill] sm:$0xff] }
 0x11e   :  { %v1658_v26 = vadd.f32 %v1650_v58, %v1629_v19  ;;  %v1847_v52 = vmul.f32 %v1839_v40, %v1830_v41  ;;  %v1543_v28 = vadd.f32 %v1535_v2, %v1514_v1  ;;  %v1564_v8 = vmul.f32 %v3842_v62, %v3476_v29  ;;  %v3851_v41 = vld [vmem:[#allocation22_spill] sm:$0xff] }
 0x11f   :  { %v1773_v22 = vadd.f32 %v1765_v13, %v1744_v37  ;;  %v1708_v25 = vmul.f32 %v3184_v7, %v3520_v36  ;;  %v1737_v3 = vmul.f32 %v3379_v55, %v1725_v56  ;;  %v1428_v9 = vadd.f32 %v3850_v43, %v1399_v59 }
 0x120   :  { %v1687_v0 = vadd.f32 %v1679_v4, %v1658_v26  ;;  %1856 = vst [vmem:[#allocation11 + $0x50] sm:$0xff] %v1847_v52  ;;  %v1766_v5 = vmul.f32 %v3388_v51, %v1754_v35  ;;  %v1572_v46 = vadd.f32 %v1564_v8, %v1543_v28  ;;  %v1593_v17 = vmul.f32 %v3013_v24, %v3506_v54  ;;  %v1697_v26 = vld [vmem:[#allocation2 + $0x48] sm:$0xff] }
 0x121   :  { %v1802_v57 = vadd.f32 %v1794_v33, %v1773_v22  ;;  %v1457_v10 = vadd.f32 %v1449_v23, %v1428_v9  ;;  %v1478_v48 = vmul.f32 %v3309_v11, %v3468_v44  ;;  %v1507_v39 = vmul.f32 %v3843_v20, %v3476_v29  ;;  %v1950_v29 = vld [vmem:[#allocation2 + $0xf8] sm:$0xff]  ;;  %v1755_v28 = vld [vmem:[#allocation2 + $0x108] sm:$0xff] }
 0x122   :  { %v1716_v45 = vadd.f32 %v1708_v25, %v1687_v0  ;;  %v1795_v13 = vmul.f32 %v3396_v14, %v1783_v21  ;;  %v1601_v12 = vadd.f32 %v1593_v17, %v1572_v46  ;;  %v1622_v40 = vmul.f32 %v3839_v53, %v3504_v38  ;;  %v1841_v25 = vld [vmem:[#allocation5 + $0x60] sm:$0xff] }
 0x123   :  { %v1831_v60 = vadd.f32 %v1823_v63, %v1802_v57  ;;  %v1824_v19 = vmul.f32 %v3215_v6, %v1812_v32  ;;  %v1486_v58 = vadd.f32 %v1478_v48, %v1457_v10  ;;  %v1400_v37 = vadd.f32 %v3383_v49, %v3851_v41 }
 0x124   :  { %v1745_v33 = vadd.f32 %v1737_v3, %v1716_v45  ;;  %v1630_v1 = vadd.f32 %v1622_v40, %v1601_v12  ;;  %v1651_v44 = vmul.f32 %v3030_v30, %v3520_v36  ;;  %v1450_v63 = vmul.f32 %v1950_v29, %v3292_v16  ;;  %v1726_v16 = vld [vmem:[#allocation2 + $0xa8] sm:$0xff] }
 0x125   :  { %v1848_v56 = vmul.f32 %v1840_v50, %v1831_v60  ;;  %v1515_v4 = vadd.f32 %v1507_v39, %v1486_v58  ;;  %v1536_v35 = vmul.f32 %v3840_v47, %v3506_v54  ;;  %v1429_v59 = vadd.f32 %v3852_v34, %v1400_v37  ;;  %v1784_v50 = vld [vmem:[#allocation2 + $0x168] sm:$0xff] }
 0x126   :  { %v1774_v2 = vadd.f32 %v1766_v5, %v1745_v33  ;;  %v1659_v15 = vadd.f32 %v1651_v44, %v1630_v1  ;;  %v1680_v49 = vmul.f32 %v3127_v27, %v1812_v32  ;;  %v1565_v23 = vmul.f32 %v3842_v62, %v3504_v38  ;;  %v1813_v39 = vld [vmem:[#allocation2 + $0x1c8] sm:$0xff] }
 0x127   :  { %1857 = vst [vmem:[#allocation11 + $0x58] sm:$0xff] %v1848_v56  ;;  %v1479_v52 = vmul.f32 %v3309_v11, %v3502_v42  ;;  %v1544_v8 = vadd.f32 %v1536_v35, %v1515_v4  ;;  %v1458_v0 = vadd.f32 %v1450_v63, %v1429_v59  ;;  %v1508_v54 = vmul.f32 %v3843_v20, %v3504_v38  ;;  %v1951_v1 = vld [vmem:[#allocation2 + $0x68] sm:$0xff] }
 0x128   :  { %v1803_v22 = vadd.f32 %v1795_v13, %v1774_v2  ;;  %v1688_v3 = vadd.f32 %v1680_v49, %v1659_v15  ;;  %v1709_v21 = vmul.f32 %v3184_v7, %v1697_v26  ;;  %v1594_v43 = vmul.f32 %v3013_v24, %v3520_v36  ;;  %v1843_v15 = vld [vmem:[#allocation5 + $0x70] sm:$0xff] }
 0x129   :  { %v1573_v57 = vadd.f32 %v1565_v23, %v1544_v8  ;;  %v1487_v5 = vadd.f32 %v1479_v52, %v1458_v0  ;;  %v1537_v11 = vmul.f32 %v3840_v47, %v3520_v36  ;;  %v1738_v46 = vmul.f32 %v3379_v55, %v1726_v16  ;;  %v1844_v16 = vld [vmem:[#allocation5 + $0x78] sm:$0xff] }
 0x12a   :  { %v1832_v9 = vadd.f32 %v1824_v19, %v1803_v22  ;;  %v1717_v42 = vadd.f32 %v1709_v21, %v1688_v3  ;;  %v1767_v17 = vmul.f32 %v3388_v51, %v1755_v28  ;;  %v1623_v20 = vmul.f32 %v3839_v53, %v1812_v32 }
 0x12b   :  { %v1602_v45 = vadd.f32 %v1594_v43, %v1573_v57  ;;  %v1516_v7 = vadd.f32 %v1508_v54, %v1487_v5  ;;  %v1566_v10 = vmul.f32 %v3842_v62, %v1812_v32  ;;  %v1652_v13 = vmul.f32 %v3030_v30, %v1697_v26  ;;  %v1842_v32 = vld [vmem:[#allocation5 + $0x68] sm:$0xff] }
 0x12c   :  { %v1849_v38 = vmul.f32 %v1841_v25, %v1832_v9  ;;  %v1746_v48 = vadd.f32 %v1738_v46, %v1717_v42  ;;  %v1595_v36 = vmul.f32 %v3013_v24, %v1697_v26  ;;  %v1796_v40 = vmul.f32 %v3396_v14, %v1784_v50 }
 0x12d   :  { %v1631_v60 = vadd.f32 %v1623_v20, %v1602_v45  ;;  %v1545_v47 = vadd.f32 %v1537_v11, %v1516_v7  ;;  %v1681_v19 = vmul.f32 %v3127_v27, %v1813_v39  ;;  %v1624_v41 = vmul.f32 %v3839_v53, %v1813_v39  ;;  %v3853_v53 = vld [vmem:[#allocation62_spill] sm:$0xff] }
 0x12e   :  { %1858 = vst [vmem:[#allocation11 + $0x60] sm:$0xff] %v1849_v38  ;;  %v1775_v12 = vadd.f32 %v1767_v17, %v1746_v48  ;;  %v1825_v62 = vmul.f32 %v3215_v6, %v1813_v39  ;;  %v1739_v30 = vmul.f32 %v1951_v1, %v3379_v55  ;;  %v1768_v63 = vmul.f32 %v1951_v1, %v3388_v51 }
 0x12f   :  { %v1660_v33 = vadd.f32 %v1652_v13, %v1631_v60  ;;  %v1574_v58 = vadd.f32 %v1566_v10, %v1545_v47  ;;  %v1797_v4 = vmul.f32 %v1951_v1, %v3396_v14 }
 0x130   :  { %v1804_v37 = vadd.f32 %v1796_v40, %v1775_v12 }
 0x131   :  { %v1689_v56 = vadd.f32 %v1681_v19, %v1660_v33  ;;  %v1603_v44 = vadd.f32 %v1595_v36, %v1574_v58 }
 0x132   :  { %v1833_v29 = vadd.f32 %v1825_v62, %v1804_v37 }
 0x133   :  { %v1718_v24 = vadd.f32 %v1689_v56, %v3227_v31  ;;  %v1632_v2 = vadd.f32 %v1624_v41, %v1603_v44 }
 0x134   :  { %v1850_v26 = vmul.f32 %v1842_v32, %v1833_v29 }
 0x135   :  { %v1747_v27 = vadd.f32 %v1739_v30, %v1718_v24  ;;  %v1661_v35 = vadd.f32 %v1632_v2, %v3853_v53 }
 0x136   :  { %1859 = vst [vmem:[#allocation11 + $0x68] sm:$0xff] %v1850_v26 }
 0x137   :  { %v1776_v6 = vadd.f32 %v1768_v63, %v1747_v27  ;;  %v1690_v34 = vadd.f32 %v1661_v35, %v3210_v18 }
 0x139   :  { %v1805_v59 = vadd.f32 %v1797_v4, %v1776_v6  ;;  %v1719_v55 = vadd.f32 %v1690_v34, %v3227_v31 }
 0x13b   :  { %v1834_v49 = vadd.f32 %v1805_v59, %v3231_v61  ;;  %v1748_v23 = vadd.f32 %v1739_v30, %v1719_v55 }
 0x13d   :  { %v1851_v52 = vmul.f32 %v1843_v15, %v1834_v49  ;;  %v1777_v51 = vadd.f32 %v1768_v63, %v1748_v23 }
 0x13f   :  { %1860 = vst [vmem:[#allocation11 + $0x70] sm:$0xff] %v1851_v52  ;;  %v1806_v22 = vadd.f32 %v1797_v4, %v1777_v51 }
 0x141   :  { %v1835_v14 = vadd.f32 %v1806_v22, %v3231_v61 }
 0x143   :  { %v1852_v28 = vmul.f32 %v1844_v16, %v1835_v14 }
 0x145   :  { %1861 = vst [vmem:[#allocation11 + $0x78] sm:$0xff] %v1852_v28 }
 0x146   :  { %2029 = shalt.err (!%p2026_p0)
}
 0x147   :  { %s2030_s9 = scalar_lea.hbm %s3604_s5, 2048 }
 0x148   :  { %p2031_p1 = scmp.ne.s32.totalorder %s3604_s5, %s2030_s9  ;;  %p2034_p2 = scmp.lt.u32.totalorder %s2030_s9, %s3604_s5 }
 0x14a   :  { %p2036_p3 = pnand %p2034_p2, %p2031_p1 }
 0x14c   :  { %2039 = shalt.err (!%p2036_p3)
}
 0x14d   :  { %1873 = dma.vmem_to_hbm [thread:$0]  %s1868_s28, 2048, %s3604_s5, [#allocation7], %s2048_s29, %s2048_s29, %s2049_s30  }
 0x14e   :  { %2044 = dma.done.wait [#allocation7], 2048  }
 0x14f   :  { %2045 = vsyncadd [#allocation7], 4294965248 }
 0x150   :  { %1877 = vsyncpa [#allocation6], 1 }
 0x151   :  { %1878 = vsyncpa [#allocation9], 1 }
 0x152   :  { %1879 = vsyncpa [#allocation7], 1 }

</bundles_post_ra>
